<compile_context>
chip_gen: v7x
topology: tpu7x:2x2x1
jax: 0.10.0
libtpu: 0.0.40
codegen_flags: <defaults>
</compile_context>

<pallas_src>
import functools

import jax
import jax.numpy as jnp
from jax import lax
from jax.experimental import pallas as pl
from jax.experimental.pallas import tpu as pltpu

BN_EPS = 1e-5
LANE = 128


def _round_up(x, m):
    return ((x + m - 1) // m) * m


def _vmem_limit_bytes():
    """~75% of physical VMEM: 48 MiB on v7x (64 MiB/TC), 96 MiB on v5e/v6e (128 MiB)."""
    cap = 128 * 1024 * 1024
    try:
        cap = int(pltpu.get_tpu_info().vmem_capacity_bytes)
    except Exception:
        pass
    return int(min(max(cap * 3 // 4, 32 * 1024 * 1024), 100 * 1024 * 1024))


def _pick_row_block(H, W, C4p, requested=None):
    """Rows per block: th divides H, th*W preferably a multiple of 8, sized so the
    f32 (th*W, C4p) accumulator stays within a few MiB (safe on v7x's 64 MiB VMEM)."""
    if requested is not None:
        assert H % requested == 0, "row_block must divide H"
        return requested
    max_rows = max(128, min(2048, (8 * 1024 * 1024) // (4 * C4p)))
    target = max(1, max_rows // max(W, 1))
    divs = [d for d in range(1, H + 1) if H % d == 0 and d <= target] or [1]
    aligned = [d for d in divs if (d * W) % 8 == 0]
    return max(aligned) if aligned else max(divs)


# ---------------------------------------------------------------------------
# Fused Pallas kernel:
#   conv1(1x1)+bn1+relu -> conv2(3x3)+bn2+relu -> conv3(1x1)+bn3
#   + shortcut(1x1 conv + bias + bn) -> add -> relu
# All BN scales are folded into the (bf16) weights; biases added in f32.
# ---------------------------------------------------------------------------
def _bottleneck_kernel(x_ref, w1_ref, b1_ref, w2_ref, b2_ref, w3_ref, ws_ref, bo_ref,
                       o_ref, *scratch, th, W, H, stack_kw):
    h1p_s = scratch[0]                         # (th+2, W+2, Cp) bf16 padded h1 window
    Cin = x_ref.shape[-1]
    Cp = w1_ref.shape[-1]
    C4p = w3_ref.shape[-1]

    r0 = pl.multiple_of(pl.program_id(1) * th, th)   # first output row of this block

    # ---- conv1 (1x1) + bn1 (scale folded into w1) + relu ------------------------
    def conv1(xrows):                          # (rows, W, Cin) bf16 -> (rows, W, Cp) bf16
        rows = xrows.shape[0]
        y = jnp.dot(xrows.reshape(rows * W, Cin), w1_ref[...],
                    preferred_element_type=jnp.float32)
        y = jnp.maximum(y + b1_ref[...], 0.0)
        return y.astype(jnp.bfloat16).reshape(rows, W, Cp)

    x_mid = x_ref[0, pl.ds(r0, th), :, :]                              # (th, W, Cin)
    x_top = x_ref[0, pl.ds(jnp.maximum(r0 - 1, 0), 1), :, :]           # (1,  W, Cin)
    x_bot = x_ref[0, pl.ds(jnp.minimum(r0 + th, H - 1), 1), :, :]      # (1,  W, Cin)

    h1_mid = conv1(x_mid)
    # halo rows outside the image must be exactly zero (conv2 has padding=1)
    top_m = jnp.where(r0 > 0, 1.0, 0.0).astype(jnp.bfloat16)
    bot_m = jnp.where(r0 + th < H, 1.0, 0.0).astype(jnp.bfloat16)
    h1_top = conv1(x_top) * top_m
    h1_bot = conv1(x_bot) * bot_m

    # ---- assemble zero-padded h1 window (th+2, W+2, Cp) in VMEM scratch ----------
    zero_col = jnp.zeros((th + 2, 1, Cp), jnp.bfloat16)
    h1p_s[:, 0:1, :] = zero_col
    h1p_s[:, W + 1:W + 2, :] = zero_col
    h1p_s[0:1, 1:W + 1, :] = h1_top
    h1p_s[1:th + 1, 1:W + 1, :] = h1_mid
    h1p_s[th + 1:th + 2, 1:W + 1, :] = h1_bot

    # ---- conv2 (3x3) + bn2 (scale folded) + relu ---------------------------------
    acc2 = jnp.zeros((th * W, Cp), jnp.float32)
    if stack_kw:
        # Stack the 3 kw taps along K (K = 3*Cp) so each GEMM fills more of the
        # 256-wide MXU on v6e/v7x when Cp == 128.
        lhs_s = scratch[1]                     # (th*W, 3*Cp) bf16
        for kh in range(3):
            for kw in range(3):
                lhs_s[:, kw * Cp:(kw + 1) * Cp] = (
                    h1p_s[kh:kh + th, kw:kw + W, :].reshape(th * W, Cp))
            acc2 = acc2 + jnp.dot(lhs_s[...], w2_ref[kh],
                                  preferred_element_type=jnp.float32)
    else:
        for kh in range(3):
            w2_kh = w2_ref[kh]                 # (3*Cp, Cp)
            for kw in range(3):
                lhs = h1p_s[kh:kh + th, kw:kw + W, :].reshape(th * W, Cp)
                acc2 = acc2 + jnp.dot(lhs, w2_kh[kw * Cp:(kw + 1) * Cp, :],
                                      preferred_element_type=jnp.float32)
    h2 = jnp.maximum(acc2 + b2_ref[...], 0.0).astype(jnp.bfloat16)

    # ---- conv3 + shortcut conv (both BN-folded) into ONE f32 accumulator ---------
    acc3 = jnp.dot(h2, w3_ref[...], preferred_element_type=jnp.float32)
    acc3 = acc3 + jnp.dot(x_mid.reshape(th * W, Cin), ws_ref[...],
                          preferred_element_type=jnp.float32)
    out = jnp.maximum(acc3 + bo_ref[...], 0.0)
    o_ref[...] = out.reshape(1, th, W, C4p).astype(o_ref.dtype)


# ---------------------------------------------------------------------------
# Plain-JAX glue: layout plumbing, BN folding into weights, lane padding
# ---------------------------------------------------------------------------
def fold_bn(gamma, beta, mean, var):
    scale = gamma / jnp.sqrt(var + BN_EPS)
    bias = beta - mean * scale
    return scale, bias


def bottleneck_forward(x_nchw, p, *, row_block=None):
    """Bottleneck(in_planes, planes, stride=1, mhsa=False) forward, NCHW in/out."""
    N, Cin, H, W = x_nchw.shape
    planes = p["w1"].shape[0]
    c4 = 4 * planes
    Cp = _round_up(planes, LANE)      # lane-dense padded channel counts
    C4p = _round_up(c4, LANE)
    th = _pick_row_block(H, W, C4p, row_block)
    HT = H // th
    f32 = jnp.float32

    x_nhwc = jnp.transpose(x_nchw, (0, 2, 3, 1)).astype(jnp.bfloat16)

    # fold BN (eval mode): scales go into the weights, biases stay as f32 adds.
    s1, b1 = fold_bn(*p["bn1"])
    s2, b2 = fold_bn(*p["bn2"])
    s3, b3 = fold_bn(*p["bn3"])
    gs, beta_s, ms, vs = p["bns"]
    ss = gs / jnp.sqrt(vs + BN_EPS)
    bss = (p["cb"] - ms) * ss + beta_s            # shortcut conv bias folded into BN

    def padc(v, c):
        return jnp.pad(v, (0, c - v.shape[0]))

    # weights in (K, C_out) GEMM layout, BN scale folded (f32), zero-padded, bf16.
    w1k = p["w1"].reshape(planes, Cin).T * s1[None, :]
    w1k = jnp.pad(w1k, ((0, 0), (0, Cp - planes))).astype(jnp.bfloat16)
    b1k = padc(b1, Cp).reshape(1, Cp).astype(f32)

    w2t = jnp.transpose(p["w2"], (2, 3, 1, 0)) * s2[None, None, None, :]   # (kh,kw,ci,co)
    w2t = jnp.pad(w2t, ((0, 0), (0, 0), (0, Cp - planes), (0, Cp - planes)))
    w2k = w2t.reshape(3, 3 * Cp, Cp).astype(jnp.bfloat16)                  # kw-major rows
    b2k = padc(b2, Cp).reshape(1, Cp).astype(f32)

    w3k = p["w3"].reshape(c4, planes).T * s3[None, :]
    w3k = jnp.pad(w3k, ((0, Cp - planes), (0, C4p - c4))).astype(jnp.bfloat16)

    wsk = p["ws"].reshape(c4, Cin).T * ss[None, :]
    wsk = jnp.pad(wsk, ((0, 0), (0, C4p - c4))).astype(jnp.bfloat16)

    bok = padc(b3 + bss, C4p).reshape(1, C4p).astype(f32)    # merged bn3 + shortcut bias

    stack_kw = Cp <= 128
    scratch = [pltpu.VMEM((th + 2, W + 2, Cp), jnp.bfloat16)]
    if stack_kw:
        scratch.append(pltpu.VMEM((th * W, 3 * Cp), jnp.bfloat16))

    kern = functools.partial(_bottleneck_kernel, th=th, W=W, H=H, stack_kw=stack_kw)
    out = pl.pallas_call(
        kern,
        out_shape=jax.ShapeDtypeStruct((N, H, W, C4p), jnp.bfloat16),
        grid_spec=pltpu.PrefetchScalarGridSpec(
            num_scalar_prefetch=0,
            grid=(N, HT),
            in_specs=[
                # full x image per n; revisited across row blocks -> one DMA per n
                pl.BlockSpec((1, H, W, Cin), lambda n, r: (n, 0, 0, 0)),
                pl.BlockSpec((Cin, Cp), lambda n, r: (0, 0)),
                pl.BlockSpec((1, Cp), lambda n, r: (0, 0)),
                pl.BlockSpec((3, 3 * Cp, Cp), lambda n, r: (0, 0, 0)),
                pl.BlockSpec((1, Cp), lambda n, r: (0, 0)),
                pl.BlockSpec((Cp, C4p), lambda n, r: (0, 0)),
                pl.BlockSpec((Cin, C4p), lambda n, r: (0, 0)),
                pl.BlockSpec((1, C4p), lambda n, r: (0, 0)),
            ],
            out_specs=pl.BlockSpec((1, th, W, C4p), lambda n, r: (n, r, 0, 0)),
            scratch_shapes=scratch,
        ),
        compiler_params=pltpu.CompilerParams(
            dimension_semantics=("parallel", "parallel"),
            vmem_limit_bytes=_vmem_limit_bytes(),
        ),
    )(x_nhwc, w1k, b1k, w2k, b2k, w3k, wsk, bok)

    out = out[..., :c4]                               # drop lane padding
    return jnp.transpose(out, (0, 3, 1, 2)).astype(jnp.float32)


# ---------------------------------------------------------------------------
# Pure-JAX reference (lax.conv, f32) for correctness check
# ---------------------------------------------------------------------------
def _ref_conv(x, w, pad):
    return lax.conv_general_dilated(
        x, w, (1, 1), [(pad, pad), (pad, pad)],
        dimension_numbers=("NCHW", "OIHW", "NCHW"))


def _ref_bn(x, gamma, beta, mean, var):
    b = lambda a: a[None, :, None, None]
    return (x - b(mean)) / jnp.sqrt(b(var) + BN_EPS) * b(gamma) + b(beta)


def reference_bottleneck(x, p):
    out = jax.nn.relu(_ref_bn(_ref_conv(x, p["w1"], 0), *p["bn1"]))
    out = jax.nn.relu(_ref_bn(_ref_conv(out, p["w2"], 1), *p["bn2"]))
    out = _ref_bn(_ref_conv(out, p["w3"], 0), *p["bn3"])
    sc = _ref_bn(_ref_conv(x, p["ws"], 0) + p["cb"][None, :, None, None], *p["bns"])
    return jax.nn.relu(out + sc)


# ---------------------------------------------------------------------------
def make_params(key, in_planes, planes):
    exp4 = 4 * planes
    ks = jax.random.split(key, 9)

    def rnd(k, shape, scale=0.1):
        return scale * jax.random.normal(k, shape, jnp.float32)

    def bn_params(k, c):
        k1, k2, k3, k4 = jax.random.split(k, 4)
        gamma = 1.0 + 0.1 * jax.random.normal(k1, (c,), jnp.float32)
        beta = 0.1 * jax.random.normal(k2, (c,), jnp.float32)
        mean = 0.1 * jax.random.normal(k3, (c,), jnp.float32)
        var = jax.random.uniform(k4, (c,), jnp.float32, 0.5, 1.5)
        return (gamma, beta, mean, var)

    return {
        "w1": rnd(ks[0], (planes, in_planes, 1, 1)),
        "w2": rnd(ks[1], (planes, planes, 3, 3)),
        "w3": rnd(ks[2], (exp4, planes, 1, 1)),
        "ws": rnd(ks[3], (exp4, in_planes, 1, 1)),   # shortcut conv weight
        "cb": rnd(ks[4], (exp4,)),                   # shortcut conv bias
        "bn1": bn_params(ks[5], planes),
        "bn2": bn_params(ks[6], planes),
        "bn3": bn_params(ks[7], exp4),
        "bns": bn_params(ks[8], exp4),
    }


if __name__ == "__main__":
    key = jax.random.PRNGKey(0)
    k_x, k_p = jax.random.split(key)

    N, Cin, H, W = 2, 4, 16, 16      # small synthetic shapes
    planes = 8                       # expansion*planes = 32 != Cin => conv shortcut

    x = jax.random.normal(k_x, (N, Cin, H, W), jnp.float32)
    params = make_params(k_p, Cin, planes)

    # row_block=8 forces 2 row blocks per image so both halo branches (top-of-image
    # zero halo, in-image halo row) and the dynamic row-offset path are exercised.
    fwd = jax.jit(functools.partial(bottleneck_forward, row_block=8))
    out = jax.block_until_ready(fwd(x, params))
    ref = jax.block_until_ready(reference_bottleneck(x, params))

    assert out.shape == (N, 4 * planes, H, W), out.shape
    # bf16 MXU inputs / bf16 intermediates / bf16 output store vs pure-f32 reference
    # -> relaxed tolerance.
    max_err = float(jnp.max(jnp.abs(out - ref)))
    assert jnp.allclose(out, ref, atol=4e-2, rtol=4e-2), max_err

    print("KERNEL_OK")
</pallas_src>

<mosaic_0001>
module attributes {stable_mosaic.version = 11 : i64} {
  func.func @_bottleneck_kernel(%arg0: i32, %arg1: i32, %arg2: memref<1x16x16x4xbf16, #tpu.memory_space<vmem>>, %arg3: memref<4x128xbf16, #tpu.memory_space<vmem>>, %arg4: memref<1x128xf32, #tpu.memory_space<vmem>>, %arg5: memref<3x384x128xbf16, #tpu.memory_space<vmem>>, %arg6: memref<1x128xf32, #tpu.memory_space<vmem>>, %arg7: memref<128x128xbf16, #tpu.memory_space<vmem>>, %arg8: memref<4x128xbf16, #tpu.memory_space<vmem>>, %arg9: memref<1x128xf32, #tpu.memory_space<vmem>>, %arg10: memref<1x8x16x128xbf16, #tpu.memory_space<vmem>>, %arg11: memref<10x18x128xbf16, #tpu.memory_space<vmem>>, %arg12: memref<128x384xbf16, #tpu.memory_space<vmem>>) attributes {dimension_semantics = [#tpu.dimension_semantics<parallel>, #tpu.dimension_semantics<parallel>], iteration_bounds = array<i64: 2, 2>, scalar_prefetch = 0 : i64, scratch_operands = 2 : i64, tpu.core_type = #tpu.core_type<tc>, window_params = [{transform_indices = @transform_0, window_bounds = array<i64: 1, 16, 16, 4>}, {pipeline_mode = #tpu.pipeline_mode<synchronous>, transform_indices = @transform_1, window_bounds = array<i64: 4, 128>}, {pipeline_mode = #tpu.pipeline_mode<synchronous>, transform_indices = @transform_2, window_bounds = array<i64: 1, 128>}, {pipeline_mode = #tpu.pipeline_mode<synchronous>, transform_indices = @transform_3, window_bounds = array<i64: 3, 384, 128>}, {pipeline_mode = #tpu.pipeline_mode<synchronous>, transform_indices = @transform_4, window_bounds = array<i64: 1, 128>}, {pipeline_mode = #tpu.pipeline_mode<synchronous>, transform_indices = @transform_5, window_bounds = array<i64: 128, 128>}, {pipeline_mode = #tpu.pipeline_mode<synchronous>, transform_indices = @transform_6, window_bounds = array<i64: 4, 128>}, {pipeline_mode = #tpu.pipeline_mode<synchronous>, transform_indices = @transform_7, window_bounds = array<i64: 1, 128>}, {transform_indices = @transform_8, window_bounds = array<i64: 1, 8, 16, 128>}]} {
    %c8_i32 = arith.constant 8 : i32
    %0 = arith.muli %arg1, %c8_i32 : i32
    %1 = tpu.assume_multiple %0, 8 : i32
    %c0 = arith.constant 0 : index
    %2 = arith.index_cast %1 : i32 to index
    %c0_0 = arith.constant 0 : index
    %c0_1 = arith.constant 0 : index
    %3 = vector.load %arg2[%c0, %2, %c0_0, %c0_1] : memref<1x16x16x4xbf16, #tpu.memory_space<vmem>>, vector<1x8x16x4xbf16>
    %4 = vector.shape_cast %3 : vector<1x8x16x4xbf16> to vector<8x16x4xbf16>
    %c1_i32 = arith.constant 1 : i32
    %5 = arith.subi %1, %c1_i32 : i32
    %c0_i32 = arith.constant 0 : i32
    %6 = arith.maxsi %5, %c0_i32 : i32
    %c0_2 = arith.constant 0 : index
    %7 = arith.index_cast %6 : i32 to index
    %c0_3 = arith.constant 0 : index
    %c0_4 = arith.constant 0 : index
    %8 = vector.load %arg2[%c0_2, %7, %c0_3, %c0_4] : memref<1x16x16x4xbf16, #tpu.memory_space<vmem>>, vector<1x1x16x4xbf16>
    %9 = vector.shape_cast %8 : vector<1x1x16x4xbf16> to vector<1x16x4xbf16>
    %c8_i32_5 = arith.constant 8 : i32
    %10 = arith.addi %1, %c8_i32_5 : i32
    %c15_i32 = arith.constant 15 : i32
    %11 = arith.minsi %10, %c15_i32 : i32
    %c0_6 = arith.constant 0 : index
    %12 = arith.index_cast %11 : i32 to index
    %c0_7 = arith.constant 0 : index
    %c0_8 = arith.constant 0 : index
    %13 = vector.load %arg2[%c0_6, %12, %c0_7, %c0_8] : memref<1x16x16x4xbf16, #tpu.memory_space<vmem>>, vector<1x1x16x4xbf16>
    %14 = vector.shape_cast %13 : vector<1x1x16x4xbf16> to vector<1x16x4xbf16>
    %15 = vector.shape_cast %4 : vector<8x16x4xbf16> to vector<128x4xbf16>
    %c0_9 = arith.constant 0 : index
    %c0_10 = arith.constant 0 : index
    %16 = vector.load %arg3[%c0_9, %c0_10] : memref<4x128xbf16, #tpu.memory_space<vmem>>, vector<4x128xbf16>
    %cst = arith.constant dense<0.000000e+00> : vector<128x128xf32>
    %17 = tpu.matmul %15, %16, %cst {dimension_numbers = #tpu.dot_dimension_numbers<[1], [0], [0], [1], [0, 0, 1, 1], [], []>} : vector<128x4xbf16>, vector<4x128xbf16>, vector<128x128xf32> -> vector<128x128xf32>
    %c0_11 = arith.constant 0 : index
    %c0_12 = arith.constant 0 : index
    %18 = vector.load %arg4[%c0_11, %c0_12] : memref<1x128xf32, #tpu.memory_space<vmem>>, vector<1x128xf32>
    %19 = vector.broadcast %18 : vector<1x128xf32> to vector<128x128xf32>
    %20 = arith.addf %17, %19 : vector<128x128xf32>
    %cst_13 = arith.constant 0.000000e+00 : f32
    %21 = vector.broadcast %cst_13 : f32 to vector<128x128xf32>
    %22 = arith.maximumf %20, %21 : vector<128x128xf32>
    %23 = arith.truncf %22 : vector<128x128xf32> to vector<128x128xbf16>
    %24 = vector.shape_cast %23 : vector<128x128xbf16> to vector<8x16x128xbf16>
    %c0_i32_14 = arith.constant 0 : i32
    %25 = arith.cmpi sgt, %1, %c0_i32_14 : i32
    %cst_15 = arith.constant 1.000000e+00 : f32
    %cst_16 = arith.constant 0.000000e+00 : f32
    %26 = arith.select %25, %cst_15, %cst_16 : f32
    %27 = arith.truncf %26 : f32 to bf16
    %c8_i32_17 = arith.constant 8 : i32
    %28 = arith.addi %1, %c8_i32_17 : i32
    %c16_i32 = arith.constant 16 : i32
    %29 = arith.cmpi slt, %28, %c16_i32 : i32
    %cst_18 = arith.constant 1.000000e+00 : f32
    %cst_19 = arith.constant 0.000000e+00 : f32
    %30 = arith.select %29, %cst_18, %cst_19 : f32
    %31 = arith.truncf %30 : f32 to bf16
    %32 = vector.shape_cast %9 : vector<1x16x4xbf16> to vector<16x4xbf16>
    %c0_20 = arith.constant 0 : index
    %c0_21 = arith.constant 0 : index
    %33 = vector.load %arg3[%c0_20, %c0_21] : memref<4x128xbf16, #tpu.memory_space<vmem>>, vector<4x128xbf16>
    %cst_22 = arith.constant dense<0.000000e+00> : vector<16x128xf32>
    %34 = tpu.matmul %32, %33, %cst_22 {dimension_numbers = #tpu.dot_dimension_numbers<[1], [0], [0], [1], [0, 0, 1, 1], [], []>} : vector<16x4xbf16>, vector<4x128xbf16>, vector<16x128xf32> -> vector<16x128xf32>
    %c0_23 = arith.constant 0 : index
    %c0_24 = arith.constant 0 : index
    %35 = vector.load %arg4[%c0_23, %c0_24] : memref<1x128xf32, #tpu.memory_space<vmem>>, vector<1x128xf32>
    %36 = vector.broadcast %35 : vector<1x128xf32> to vector<16x128xf32>
    %37 = arith.addf %34, %36 : vector<16x128xf32>
    %cst_25 = arith.constant 0.000000e+00 : f32
    %38 = vector.broadcast %cst_25 : f32 to vector<16x128xf32>
    %39 = arith.maximumf %37, %38 : vector<16x128xf32>
    %40 = arith.truncf %39 : vector<16x128xf32> to vector<16x128xbf16>
    %41 = vector.shape_cast %40 : vector<16x128xbf16> to vector<1x16x128xbf16>
    %42 = vector.broadcast %27 : bf16 to vector<1x16x128xbf16>
    %43 = arith.mulf %41, %42 : vector<1x16x128xbf16>
    %44 = vector.shape_cast %14 : vector<1x16x4xbf16> to vector<16x4xbf16>
    %c0_26 = arith.constant 0 : index
    %c0_27 = arith.constant 0 : index
    %45 = vector.load %arg3[%c0_26, %c0_27] : memref<4x128xbf16, #tpu.memory_space<vmem>>, vector<4x128xbf16>
    %cst_28 = arith.constant dense<0.000000e+00> : vector<16x128xf32>
    %46 = tpu.matmul %44, %45, %cst_28 {dimension_numbers = #tpu.dot_dimension_numbers<[1], [0], [0], [1], [0, 0, 1, 1], [], []>} : vector<16x4xbf16>, vector<4x128xbf16>, vector<16x128xf32> -> vector<16x128xf32>
    %c0_29 = arith.constant 0 : index
    %c0_30 = arith.constant 0 : index
    %47 = vector.load %arg4[%c0_29, %c0_30] : memref<1x128xf32, #tpu.memory_space<vmem>>, vector<1x128xf32>
    %48 = vector.broadcast %47 : vector<1x128xf32> to vector<16x128xf32>
    %49 = arith.addf %46, %48 : vector<16x128xf32>
    %cst_31 = arith.constant 0.000000e+00 : f32
    %50 = vector.broadcast %cst_31 : f32 to vector<16x128xf32>
    %51 = arith.maximumf %49, %50 : vector<16x128xf32>
    %52 = arith.truncf %51 : vector<16x128xf32> to vector<16x128xbf16>
    %53 = vector.shape_cast %52 : vector<16x128xbf16> to vector<1x16x128xbf16>
    %54 = vector.broadcast %31 : bf16 to vector<1x16x128xbf16>
    %55 = arith.mulf %53, %54 : vector<1x16x128xbf16>
    %cst_32 = arith.constant 0.000000e+00 : bf16
    %56 = vector.broadcast %cst_32 : bf16 to vector<10x1x128xbf16>
    %c0_33 = arith.constant 0 : index
    %c0_34 = arith.constant 0 : index
    %c0_35 = arith.constant 0 : index
    %57 = vector.load %arg11[%c0_33, %c0_34, %c0_35] : memref<10x18x128xbf16, #tpu.memory_space<vmem>>, vector<10x1x128xbf16>
    tpu.vector_store %arg11[%c0_33, %c0_34, %c0_35], %56 {strides = array<i32>} : memref<10x18x128xbf16, #tpu.memory_space<vmem>>, vector<10x1x128xbf16>,
    %c0_36 = arith.constant 0 : index
    %c17 = arith.constant 17 : index
    %c0_37 = arith.constant 0 : index
    %58 = vector.load %arg11[%c0_36, %c17, %c0_37] : memref<10x18x128xbf16, #tpu.memory_space<vmem>>, vector<10x1x128xbf16>
    tpu.vector_store %arg11[%c0_36, %c17, %c0_37], %56 {strides = array<i32>} : memref<10x18x128xbf16, #tpu.memory_space<vmem>>, vector<10x1x128xbf16>,
    %c0_38 = arith.constant 0 : index
    %c1 = arith.constant 1 : index
    %c0_39 = arith.constant 0 : index
    %59 = vector.load %arg11[%c0_38, %c1, %c0_39] : memref<10x18x128xbf16, #tpu.memory_space<vmem>>, vector<1x16x128xbf16>
    tpu.vector_store %arg11[%c0_38, %c1, %c0_39], %43 {strides = array<i32>} : memref<10x18x128xbf16, #tpu.memory_space<vmem>>, vector<1x16x128xbf16>,
    %c1_40 = arith.constant 1 : index
    %c1_41 = arith.constant 1 : index
    %c0_42 = arith.constant 0 : index
    %60 = vector.load %arg11[%c1_40, %c1_41, %c0_42] : memref<10x18x128xbf16, #tpu.memory_space<vmem>>, vector<8x16x128xbf16>
    tpu.vector_store %arg11[%c1_40, %c1_41, %c0_42], %24 {strides = array<i32>} : memref<10x18x128xbf16, #tpu.memory_space<vmem>>, vector<8x16x128xbf16>,
    %c9 = arith.constant 9 : index
    %c1_43 = arith.constant 1 : index
    %c0_44 = arith.constant 0 : index
    %61 = vector.load %arg11[%c9, %c1_43, %c0_44] : memref<10x18x128xbf16, #tpu.memory_space<vmem>>, vector<1x16x128xbf16>
    tpu.vector_store %arg11[%c9, %c1_43, %c0_44], %55 {strides = array<i32>} : memref<10x18x128xbf16, #tpu.memory_space<vmem>>, vector<1x16x128xbf16>,
    %cst_45 = arith.constant 0.000000e+00 : f32
    %62 = vector.broadcast %cst_45 : f32 to vector<128x128xf32>
    %c0_46 = arith.constant 0 : index
    %c0_47 = arith.constant 0 : index
    %c0_48 = arith.constant 0 : index
    %63 = vector.load %arg11[%c0_46, %c0_47, %c0_48] : memref<10x18x128xbf16, #tpu.memory_space<vmem>>, vector<8x16x128xbf16>
    %64 = vector.shape_cast %63 : vector<8x16x128xbf16> to vector<128x128xbf16>
    %c0_49 = arith.constant 0 : index
    %c0_50 = arith.constant 0 : index
    %65 = vector.load %arg12[%c0_49, %c0_50] : memref<128x384xbf16, #tpu.memory_space<vmem>>, vector<128x128xbf16>
    tpu.vector_store %arg12[%c0_49, %c0_50], %64 {strides = array<i32>} : memref<128x384xbf16, #tpu.memory_space<vmem>>, vector<128x128xbf16>,
    %c0_51 = arith.constant 0 : index
    %c1_52 = arith.constant 1 : index
    %c0_53 = arith.constant 0 : index
    %66 = vector.load %arg11[%c0_51, %c1_52, %c0_53] : memref<10x18x128xbf16, #tpu.memory_space<vmem>>, vector<8x16x128xbf16>
    %67 = vector.shape_cast %66 : vector<8x16x128xbf16> to vector<128x128xbf16>
    %c0_54 = arith.constant 0 : index
    %c128 = arith.constant 128 : index
    %68 = vector.load %arg12[%c0_54, %c128] : memref<128x384xbf16, #tpu.memory_space<vmem>>, vector<128x128xbf16>
    tpu.vector_store %arg12[%c0_54, %c128], %67 {strides = array<i32>} : memref<128x384xbf16, #tpu.memory_space<vmem>>, vector<128x128xbf16>,
    %c0_55 = arith.constant 0 : index
    %c2 = arith.constant 2 : index
    %c0_56 = arith.constant 0 : index
    %69 = vector.load %arg11[%c0_55, %c2, %c0_56] : memref<10x18x128xbf16, #tpu.memory_space<vmem>>, vector<8x16x128xbf16>
    %70 = vector.shape_cast %69 : vector<8x16x128xbf16> to vector<128x128xbf16>
    %c0_57 = arith.constant 0 : index
    %c256 = arith.constant 256 : index
    %71 = vector.load %arg12[%c0_57, %c256] : memref<128x384xbf16, #tpu.memory_space<vmem>>, vector<128x128xbf16>
    tpu.vector_store %arg12[%c0_57, %c256], %70 {strides = array<i32>} : memref<128x384xbf16, #tpu.memory_space<vmem>>, vector<128x128xbf16>,
    %c0_58 = arith.constant 0 : index
    %c0_59 = arith.constant 0 : index
    %72 = vector.load %arg12[%c0_58, %c0_59] : memref<128x384xbf16, #tpu.memory_space<vmem>>, vector<128x384xbf16>
    %c0_60 = arith.constant 0 : index
    %c0_61 = arith.constant 0 : index
    %c0_62 = arith.constant 0 : index
    %73 = vector.load %arg5[%c0_60, %c0_61, %c0_62] : memref<3x384x128xbf16, #tpu.memory_space<vmem>>, vector<1x384x128xbf16>
    %74 = vector.shape_cast %73 : vector<1x384x128xbf16> to vector<384x128xbf16>
    %cst_63 = arith.constant dense<0.000000e+00> : vector<128x128xf32>
    %75 = tpu.matmul %72, %74, %cst_63 {dimension_numbers = #tpu.dot_dimension_numbers<[1], [0], [0], [1], [0, 0, 1, 1], [], []>} : vector<128x384xbf16>, vector<384x128xbf16>, vector<128x128xf32> -> vector<128x128xf32>
    %76 = arith.addf %62, %75 : vector<128x128xf32>
    %c1_64 = arith.constant 1 : index
    %c0_65 = arith.constant 0 : index
    %c0_66 = arith.constant 0 : index
    %77 = vector.load %arg11[%c1_64, %c0_65, %c0_66] : memref<10x18x128xbf16, #tpu.memory_space<vmem>>, vector<8x16x128xbf16>
    %78 = vector.shape_cast %77 : vector<8x16x128xbf16> to vector<128x128xbf16>
    %c0_67 = arith.constant 0 : index
    %c0_68 = arith.constant 0 : index
    %79 = vector.load %arg12[%c0_67, %c0_68] : memref<128x384xbf16, #tpu.memory_space<vmem>>, vector<128x128xbf16>
    tpu.vector_store %arg12[%c0_67, %c0_68], %78 {strides = array<i32>} : memref<128x384xbf16, #tpu.memory_space<vmem>>, vector<128x128xbf16>,
    %c1_69 = arith.constant 1 : index
    %c1_70 = arith.constant 1 : index
    %c0_71 = arith.constant 0 : index
    %80 = vector.load %arg11[%c1_69, %c1_70, %c0_71] : memref<10x18x128xbf16, #tpu.memory_space<vmem>>, vector<8x16x128xbf16>
    %81 = vector.shape_cast %80 : vector<8x16x128xbf16> to vector<128x128xbf16>
    %c0_72 = arith.constant 0 : index
    %c128_73 = arith.constant 128 : index
    %82 = vector.load %arg12[%c0_72, %c128_73] : memref<128x384xbf16, #tpu.memory_space<vmem>>, vector<128x128xbf16>
    tpu.vector_store %arg12[%c0_72, %c128_73], %81 {strides = array<i32>} : memref<128x384xbf16, #tpu.memory_space<vmem>>, vector<128x128xbf16>,
    %c1_74 = arith.constant 1 : index
    %c2_75 = arith.constant 2 : index
    %c0_76 = arith.constant 0 : index
    %83 = vector.load %arg11[%c1_74, %c2_75, %c0_76] : memref<10x18x128xbf16, #tpu.memory_space<vmem>>, vector<8x16x128xbf16>
    %84 = vector.shape_cast %83 : vector<8x16x128xbf16> to vector<128x128xbf16>
    %c0_77 = arith.constant 0 : index
    %c256_78 = arith.constant 256 : index
    %85 = vector.load %arg12[%c0_77, %c256_78] : memref<128x384xbf16, #tpu.memory_space<vmem>>, vector<128x128xbf16>
    tpu.vector_store %arg12[%c0_77, %c256_78], %84 {strides = array<i32>} : memref<128x384xbf16, #tpu.memory_space<vmem>>, vector<128x128xbf16>,
    %c0_79 = arith.constant 0 : index
    %c0_80 = arith.constant 0 : index
    %86 = vector.load %arg12[%c0_79, %c0_80] : memref<128x384xbf16, #tpu.memory_space<vmem>>, vector<128x384xbf16>
    %c1_81 = arith.constant 1 : index
    %c0_82 = arith.constant 0 : index
    %c0_83 = arith.constant 0 : index
    %87 = vector.load %arg5[%c1_81, %c0_82, %c0_83] : memref<3x384x128xbf16, #tpu.memory_space<vmem>>, vector<1x384x128xbf16>
    %88 = vector.shape_cast %87 : vector<1x384x128xbf16> to vector<384x128xbf16>
    %cst_84 = arith.constant dense<0.000000e+00> : vector<128x128xf32>
    %89 = tpu.matmul %86, %88, %cst_84 {dimension_numbers = #tpu.dot_dimension_numbers<[1], [0], [0], [1], [0, 0, 1, 1], [], []>} : vector<128x384xbf16>, vector<384x128xbf16>, vector<128x128xf32> -> vector<128x128xf32>
    %90 = arith.addf %76, %89 : vector<128x128xf32>
    %c2_85 = arith.constant 2 : index
    %c0_86 = arith.constant 0 : index
    %c0_87 = arith.constant 0 : index
    %91 = vector.load %arg11[%c2_85, %c0_86, %c0_87] : memref<10x18x128xbf16, #tpu.memory_space<vmem>>, vector<8x16x128xbf16>
    %92 = vector.shape_cast %91 : vector<8x16x128xbf16> to vector<128x128xbf16>
    %c0_88 = arith.constant 0 : index
    %c0_89 = arith.constant 0 : index
    %93 = vector.load %arg12[%c0_88, %c0_89] : memref<128x384xbf16, #tpu.memory_space<vmem>>, vector<128x128xbf16>
    tpu.vector_store %arg12[%c0_88, %c0_89], %92 {strides = array<i32>} : memref<128x384xbf16, #tpu.memory_space<vmem>>, vector<128x128xbf16>,
    %c2_90 = arith.constant 2 : index
    %c1_91 = arith.constant 1 : index
    %c0_92 = arith.constant 0 : index
    %94 = vector.load %arg11[%c2_90, %c1_91, %c0_92] : memref<10x18x128xbf16, #tpu.memory_space<vmem>>, vector<8x16x128xbf16>
    %95 = vector.shape_cast %94 : vector<8x16x128xbf16> to vector<128x128xbf16>
    %c0_93 = arith.constant 0 : index
    %c128_94 = arith.constant 128 : index
    %96 = vector.load %arg12[%c0_93, %c128_94] : memref<128x384xbf16, #tpu.memory_space<vmem>>, vector<128x128xbf16>
    tpu.vector_store %arg12[%c0_93, %c128_94], %95 {strides = array<i32>} : memref<128x384xbf16, #tpu.memory_space<vmem>>, vector<128x128xbf16>,
    %c2_95 = arith.constant 2 : index
    %c2_96 = arith.constant 2 : index
    %c0_97 = arith.constant 0 : index
    %97 = vector.load %arg11[%c2_95, %c2_96, %c0_97] : memref<10x18x128xbf16, #tpu.memory_space<vmem>>, vector<8x16x128xbf16>
    %98 = vector.shape_cast %97 : vector<8x16x128xbf16> to vector<128x128xbf16>
    %c0_98 = arith.constant 0 : index
    %c256_99 = arith.constant 256 : index
    %99 = vector.load %arg12[%c0_98, %c256_99] : memref<128x384xbf16, #tpu.memory_space<vmem>>, vector<128x128xbf16>
    tpu.vector_store %arg12[%c0_98, %c256_99], %98 {strides = array<i32>} : memref<128x384xbf16, #tpu.memory_space<vmem>>, vector<128x128xbf16>,
    %c0_100 = arith.constant 0 : index
    %c0_101 = arith.constant 0 : index
    %100 = vector.load %arg12[%c0_100, %c0_101] : memref<128x384xbf16, #tpu.memory_space<vmem>>, vector<128x384xbf16>
    %c2_102 = arith.constant 2 : index
    %c0_103 = arith.constant 0 : index
    %c0_104 = arith.constant 0 : index
    %101 = vector.load %arg5[%c2_102, %c0_103, %c0_104] : memref<3x384x128xbf16, #tpu.memory_space<vmem>>, vector<1x384x128xbf16>
    %102 = vector.shape_cast %101 : vector<1x384x128xbf16> to vector<384x128xbf16>
    %cst_105 = arith.constant dense<0.000000e+00> : vector<128x128xf32>
    %103 = tpu.matmul %100, %102, %cst_105 {dimension_numbers = #tpu.dot_dimension_numbers<[1], [0], [0], [1], [0, 0, 1, 1], [], []>} : vector<128x384xbf16>, vector<384x128xbf16>, vector<128x128xf32> -> vector<128x128xf32>
    %104 = arith.addf %90, %103 : vector<128x128xf32>
    %c0_106 = arith.constant 0 : index
    %c0_107 = arith.constant 0 : index
    %105 = vector.load %arg6[%c0_106, %c0_107] : memref<1x128xf32, #tpu.memory_space<vmem>>, vector<1x128xf32>
    %106 = vector.broadcast %105 : vector<1x128xf32> to vector<128x128xf32>
    %107 = arith.addf %104, %106 : vector<128x128xf32>
    %cst_108 = arith.constant 0.000000e+00 : f32
    %108 = vector.broadcast %cst_108 : f32 to vector<128x128xf32>
    %109 = arith.maximumf %107, %108 : vector<128x128xf32>
    %110 = arith.truncf %109 : vector<128x128xf32> to vector<128x128xbf16>
    %c0_109 = arith.constant 0 : index
    %c0_110 = arith.constant 0 : index
    %111 = vector.load %arg7[%c0_109, %c0_110] : memref<128x128xbf16, #tpu.memory_space<vmem>>, vector<128x128xbf16>
    %cst_111 = arith.constant dense<0.000000e+00> : vector<128x128xf32>
    %112 = tpu.matmul %110, %111, %cst_111 {dimension_numbers = #tpu.dot_dimension_numbers<[1], [0], [0], [1], [0, 0, 1, 1], [], []>} : vector<128x128xbf16>, vector<128x128xbf16>, vector<128x128xf32> -> vector<128x128xf32>
    %113 = vector.shape_cast %4 : vector<8x16x4xbf16> to vector<128x4xbf16>
    %c0_112 = arith.constant 0 : index
    %c0_113 = arith.constant 0 : index
    %114 = vector.load %arg8[%c0_112, %c0_113] : memref<4x128xbf16, #tpu.memory_space<vmem>>, vector<4x128xbf16>
    %cst_114 = arith.constant dense<0.000000e+00> : vector<128x128xf32>
    %115 = tpu.matmul %113, %114, %cst_114 {dimension_numbers = #tpu.dot_dimension_numbers<[1], [0], [0], [1], [0, 0, 1, 1], [], []>} : vector<128x4xbf16>, vector<4x128xbf16>, vector<128x128xf32> -> vector<128x128xf32>
    %116 = arith.addf %112, %115 : vector<128x128xf32>
    %c0_115 = arith.constant 0 : index
    %c0_116 = arith.constant 0 : index
    %117 = vector.load %arg9[%c0_115, %c0_116] : memref<1x128xf32, #tpu.memory_space<vmem>>, vector<1x128xf32>
    %118 = vector.broadcast %117 : vector<1x128xf32> to vector<128x128xf32>
    %119 = arith.addf %116, %118 : vector<128x128xf32>
    %cst_117 = arith.constant 0.000000e+00 : f32
    %120 = vector.broadcast %cst_117 : f32 to vector<128x128xf32>
    %121 = arith.maximumf %119, %120 : vector<128x128xf32>
    %122 = vector.shape_cast %121 : vector<128x128xf32> to vector<1x8x16x128xf32>
    %123 = arith.truncf %122 : vector<1x8x16x128xf32> to vector<1x8x16x128xbf16>
    %c0_118 = arith.constant 0 : index
    %c0_119 = arith.constant 0 : index
    %c0_120 = arith.constant 0 : index
    %c0_121 = arith.constant 0 : index
    %124 = vector.load %arg10[%c0_118, %c0_119, %c0_120, %c0_121] : memref<1x8x16x128xbf16, #tpu.memory_space<vmem>>, vector<1x8x16x128xbf16>
    tpu.vector_store %arg10[%c0_118, %c0_119, %c0_120, %c0_121], %123 {strides = array<i32>} : memref<1x8x16x128xbf16, #tpu.memory_space<vmem>>, vector<1x8x16x128xbf16>,
    return
  }
  func.func @transform_0(%arg0: i32, %arg1: i32) -> (i32, i32, i32, i32) {
    %c0_i32 = arith.constant 0 : i32
    %c0_i32_0 = arith.constant 0 : i32
    %c0_i32_1 = arith.constant 0 : i32
    %c0_i32_2 = arith.constant 0 : i32
    return %arg0, %c0_i32, %c0_i32_0, %c0_i32_1 : i32, i32, i32, i32
  }
  func.func @transform_1(%arg0: i32, %arg1: i32) -> (i32, i32) {
    %c0_i32 = arith.constant 0 : i32
    %c0_i32_0 = arith.constant 0 : i32
    %c0_i32_1 = arith.constant 0 : i32
    return %c0_i32, %c0_i32_0 : i32, i32
  }
  func.func @transform_2(%arg0: i32, %arg1: i32) -> (i32, i32) {
    %c0_i32 = arith.constant 0 : i32
    %c0_i32_0 = arith.constant 0 : i32
    %c0_i32_1 = arith.constant 0 : i32
    return %c0_i32, %c0_i32_0 : i32, i32
  }
  func.func @transform_3(%arg0: i32, %arg1: i32) -> (i32, i32, i32) {
    %c0_i32 = arith.constant 0 : i32
    %c0_i32_0 = arith.constant 0 : i32
    %c0_i32_1 = arith.constant 0 : i32
    %c0_i32_2 = arith.constant 0 : i32
    return %c0_i32, %c0_i32_0, %c0_i32_1 : i32, i32, i32
  }
  func.func @transform_4(%arg0: i32, %arg1: i32) -> (i32, i32) {
    %c0_i32 = arith.constant 0 : i32
    %c0_i32_0 = arith.constant 0 : i32
    %c0_i32_1 = arith.constant 0 : i32
    return %c0_i32, %c0_i32_0 : i32, i32
  }
  func.func @transform_5(%arg0: i32, %arg1: i32) -> (i32, i32) {
    %c0_i32 = arith.constant 0 : i32
    %c0_i32_0 = arith.constant 0 : i32
    %c0_i32_1 = arith.constant 0 : i32
    return %c0_i32, %c0_i32_0 : i32, i32
  }
  func.func @transform_6(%arg0: i32, %arg1: i32) -> (i32, i32) {
    %c0_i32 = arith.constant 0 : i32
    %c0_i32_0 = arith.constant 0 : i32
    %c0_i32_1 = arith.constant 0 : i32
    return %c0_i32, %c0_i32_0 : i32, i32
  }
  func.func @transform_7(%arg0: i32, %arg1: i32) -> (i32, i32) {
    %c0_i32 = arith.constant 0 : i32
    %c0_i32_0 = arith.constant 0 : i32
    %c0_i32_1 = arith.constant 0 : i32
    return %c0_i32, %c0_i32_0 : i32, i32
  }
  func.func @transform_8(%arg0: i32, %arg1: i32) -> (i32, i32, i32, i32) {
    %c0_i32 = arith.constant 0 : i32
    %c0_i32_0 = arith.constant 0 : i32
    %c0_i32_1 = arith.constant 0 : i32
    return %arg0, %arg1, %c0_i32, %c0_i32_0 : i32, i32, i32, i32
  }
}

</mosaic_0001>

<bundles_post_ra>
// kernel: bottleneck_forward.1
= control target key start
LH: loop header
LB: loop body
LE: loop exit
PB: predicated region body
PF: predicated region fallthrough
CT: control target
= control target key end

     0   :  { %s7147_s0 = inlined_call_operand.hbm [shape: bf16[2,16,16,4], index: 0, kind: input, shape index: {}]   ;;  %s7148_s1 = inlined_call_operand.hbm [shape: bf16[4,128], index: 1, kind: input, shape index: {}]   ;;  %s7149_s2 = inlined_call_operand.hbm [shape: f32[1,128], index: 2, kind: input, shape index: {}]   ;;  %s7150_s3 = inlined_call_operand.hbm [shape: bf16[3,384,128], index: 3, kind: input, shape index: {}]   ;;  %s7151_s4 = inlined_call_operand.hbm [shape: f32[1,128], index: 4, kind: input, shape index: {}]   ;;  %s7152_s5 = inlined_call_operand.hbm [shape: bf16[128,128], index: 5, kind: input, shape index: {}]   ;;  %s7153_s6 = inlined_call_operand.hbm [shape: bf16[4,128], index: 6, kind: input, shape index: {}]   ;;  %s7154_s7 = inlined_call_operand.hbm [shape: f32[1,128], index: 7, kind: input, shape index: {}]   ;;  %s7155_s8 = inlined_call_operand.hbm [shape: bf16[2,16,16,128], index: 8, kind: output, shape index: {}]  }
   0x1   :  { %7167 = sst [smem:[#allocation29_spill]] %s7147_s0 }
   0x2   :  { %7168 = sst [smem:[#allocation30_spill]] %s7148_s1 }
   0x3   :  { %7169 = sst [smem:[#allocation31_spill]] %s7149_s2 }
   0x4   :  { %7170 = sst [smem:[#allocation32_spill]] %s7150_s3 }
   0x5   :  { %7171 = sst [smem:[#allocation33_spill]] %s7151_s4 }
   0x6   :  { %7172 = sst [smem:[#allocation34_spill]] %s7152_s5 }
   0x7   :  { %7173 = sst [smem:[#allocation35_spill]] %s7155_s8 }
   0x8   :  { %13 = vsyncpa [#allocation5], 0 }
   0x9   :  { %15 = vsyncpa [#allocation5 + $0x1], 0 }
   0xa   :  { %16 = vsyncpa [#allocation8], 0 }
   0xb   :  { %17 = vsyncpa [#allocation11], 0 }
   0xc   :  { %18 = vsyncpa [#allocation14], 0 }
   0xd   :  { %19 = vsyncpa [#allocation17], 0 }
   0xe   :  { %20 = vsyncpa [#allocation6], 0 }
   0xf   :  { %22 = vsyncpa [#allocation6 + $0x1], 0  ;;  %s6134_s27 = smov 0   ;;  %s6136_s28 = smov 0  }
  0x10   :  { %s6138_s29 = smov 0   ;;  %s6140_s30 = smov 0  }
  0x11   :  { %s6142_s9 = smov 0   ;;  %s6144_s10 = smov 0  }
  0x12   :  { %s6146_s11 = smov 0   ;;  %s6148_s12 = smov 0  }
  0x13   :  { %s6150_s13 = smov 0   ;;  %s6152_s14 = smov 0  }
  0x14   :  { %s6154_s15 = smov 0  }
  0x15 LB: > { %7174 = sst [smem:[#allocation25_spill]] %s6032_s27  ;;  %s7156_s16 = sadd.s32 4294967295, %s6072_s15   ;;  %s6072_s15 = sphi %s6154_s15, %s28_s15   ;;  %s6068_s14 = sphi %s6152_s14, %s7232_s14   ;;  %s6064_s13 = sphi %s6150_s13, %s7231_s13   ;;  %s6060_s12 = sphi %s6148_s12, %s7230_s12   ;;  %s6056_s11 = sphi %s6146_s11, %s7229_s11   ;;  %s6052_s10 = sphi %s6144_s10, %s7228_s10   ;;  %s6048_s9 = sphi %s6142_s9, %s7227_s9   ;;  %s6044_s30 = sphi %s6140_s30, %s7226_s30   ;;  %s6040_s29 = sphi %s6138_s29, %s7225_s29   ;;  %s6036_s28 = sphi %s6136_s28, %s7224_s28   ;;  %s6032_s27 = sphi %s6134_s27, %s7223_s27  }
  0x16   : > { %7175 = sst [smem:[#allocation26_spill]] %s6056_s11  ;;  %p4473_p0 = scmp.ge.s32.totalorder %s6072_s15, 1 }
  0x17   : > { %7176 = sst [smem:[#allocation27_spill]] %s6060_s12  ;;  %p6193_p1 = scmp.eq.s32.totalorder %s7156_s16, 0 }
  0x18   : > { %p246_p2 = scmp.lt.s32.totalorder %s6072_s15, 5  ;;  %s6074_s19 = smov [#allocation7]  }
  0x19   : > { %s7177_s17 = scalar_select %p6193_p1, 1, 0 }
  0x1a   : > { %p6198_p3 = pnand %p4473_p0, %p246_p2  ;;  %s259_s20 = sshll.u32 %s6074_s19, 4  ;;  %s260_s20 = int_to_ptr.vmem [resolvable:$true] %s259_s20 }
  0x1b   : > { %s6075_s21 = smov [#allocation10]   ;;  %s6076_s24 = smov [#allocation13]  }
  0x1c   : > { %s7178_s18 = scalar_select %p6198_p3, 1, 0 }
  0x1d   : > { %p5438_p4 = pneg %p6198_p3  ;;  %s280_s22 = sshll.u32 %s6075_s21, 4  ;;  %s6210_s22 = int_to_ptr.vmem [resolvable:$true] %s280_s22 }
  0x1e   : > { %7179 = sst [smem:[#allocation28_spill]] %s7178_s18  ;;  %s6212_s25 = sshll.u32 %s6076_s24, 4  ;;  %s305_s25 = int_to_ptr.vmem [resolvable:$true] %s6212_s25 }
  0x1f   : > { %p6206_p5 = pnand %p5438_p4, %p6193_p1  ;;  %s7181_s1 = sld [smem:[#allocation30_spill]] }
  0x21   : > { %p6222_p7 = pneg %p6206_p5 }
  0x25   : > { %s5708_s19 = scalar_lea.hbm %s7181_s1, 32 }
  0x26   : > { %p5709_p6 = scmp.ne.s32.totalorder %s7181_s1, %s5708_s19  ;;  %p5715_p10 = scmp.lt.u32.totalorder %s5708_s19, %s7181_s1 }
  0x28   : > { %p5711_p8 = pnand %p6222_p7, %p5709_p6 }
  0x2a   : > { %p5712_p9 = pneg %p5711_p8 }
  0x2c   : > { %p5717_p11 = pnand %p5715_p10, %p5712_p9 }
  0x2e   : > { %5720 = shalt.err (!%p5717_p11)
}
  0x2f   : > { %s5721_s16 = scalar_lea.vmem %s260_s20, 32  ;;  %p5729_p2 = scmp.lt.s32.totalorder %s260_s20, %s260_s20 }
  0x30   : > { %p5722_p12 = scmp.ne.s32.totalorder %s260_s20, %s5721_s16  ;;  %p5730_p4 = scmp.lt.s32.totalorder %s5721_s16, %s5721_s16 }
  0x32   : > { %p5724_p13 = pnand %p5722_p12, %p6222_p7  ;;  %p5731_p3 = por %p5730_p4, %p5729_p2 }
  0x34   : > { %p5725_p0 = pneg %p5724_p13 }
  0x36   : > { %p5732_p1 = pnand %p5731_p3, %p5725_p0 }
  0x38   : > { %5735 = shalt.err (!%p5732_p1)
}
  0x39   : > { %5441 = dma.hbm_to_vmem [thread:$0]  (!%p6206_p5), %s7181_s1, 32, %s260_s20, [#allocation8]  }
  0x3a   : > { %s7183_s3 = sld [smem:[#allocation32_spill]] }
  0x40   : > { %s5736_s19 = scalar_lea.hbm %s7183_s3, 9216 }
  0x41   : > { %p5737_p6 = scmp.ne.s32.totalorder %s7183_s3, %s5736_s19  ;;  %p5743_p1 = scmp.lt.u32.totalorder %s5736_s19, %s7183_s3 }
  0x43   : > { %p5739_p8 = pnand %p5737_p6, %p6222_p7 }
  0x45   : > { %p5740_p9 = pneg %p5739_p8 }
  0x47   : > { %p5745_p3 = pnand %p5743_p1, %p5740_p9 }
  0x49   : > { %5748 = shalt.err (!%p5745_p3)
}
  0x4a   : > { %s5749_s20 = scalar_lea.vmem %s6210_s22, 9216  ;;  %p5757_p13 = scmp.lt.s32.totalorder %s6210_s22, %s6210_s22 }
  0x4b   : > { %p5750_p10 = scmp.ne.s32.totalorder %s6210_s22, %s5749_s20  ;;  %p5758_p0 = scmp.lt.s32.totalorder %s5749_s20, %s5749_s20 }
  0x4d   : > { %p5752_p11 = pnand %p5750_p10, %p6222_p7  ;;  %p5759_p2 = por %p5758_p0, %p5757_p13 }
  0x4f   : > { %p5753_p12 = pneg %p5752_p11 }
  0x51   : > { %p5760_p4 = pnand %p5759_p2, %p5753_p12 }
  0x53   : > { %5763 = shalt.err (!%p5760_p4)
}
  0x54   : > { %s7164_s18 = smov 64   ;;  %s7165_s0 = smov 4  }
  0x55   : > { %5447 = dma.hbm_to_vmem [thread:$0]  (!%p6206_p5), %s7183_s3, 9216, %s6210_s22, [#allocation11], %s7164_s18, %s7164_s18, %s7165_s0  }
  0x56   : > { %s7184_s5 = sld [smem:[#allocation34_spill]] }
  0x5c   : > { %s5764_s19 = scalar_lea.hbm %s7184_s5, 1024 }
  0x5d   : > { %p5765_p6 = scmp.ne.s32.totalorder %s7184_s5, %s5764_s19  ;;  %p5771_p1 = scmp.lt.u32.totalorder %s5764_s19, %s7184_s5 }
  0x5f   : > { %p5767_p8 = pnand %p5765_p6, %p6222_p7 }
  0x61   : > { %p5768_p9 = pneg %p5767_p8 }
  0x63   : > { %p5773_p3 = pnand %p5771_p1, %p5768_p9 }
  0x65   : > { %5776 = shalt.err (!%p5773_p3)
}
  0x66   : > { %s5777_s8 = scalar_lea.vmem %s305_s25, 1024  ;;  %p5785_p13 = scmp.lt.s32.totalorder %s305_s25, %s305_s25 }
  0x67   : > { %p5778_p10 = scmp.ne.s32.totalorder %s305_s25, %s5777_s8  ;;  %p5786_p0 = scmp.lt.s32.totalorder %s5777_s8, %s5777_s8 }
  0x69   : > { %p5780_p11 = pnand %p5778_p10, %p6222_p7  ;;  %p5787_p2 = por %p5786_p0, %p5785_p13 }
  0x6b   : > { %p5781_p12 = pneg %p5780_p11 }
  0x6d   : > { %p5788_p4 = pnand %p5787_p2, %p5781_p12 }
  0x6f   : > { %5791 = shalt.err (!%p5788_p4)
}
  0x70   : > { %5453 = dma.hbm_to_vmem [thread:$0]  (!%p6206_p5), %s7184_s5, 1024, %s305_s25, [#allocation14], %s7164_s18, %s7164_s18, %s7165_s0  }
  0x71   : > { %s6079_s12 = smov [#allocation9]   ;;  %s6080_s26 = smov [#allocation12]  }
  0x72   : > { %s270_s11 = sshll.u32 %s6079_s12, 4  ;;  %s294_s19 = sshll.u32 %s6080_s26, 4  ;;  %s271_s11 = int_to_ptr.vmem [resolvable:$true] %s270_s11  ;;  %s295_s19 = int_to_ptr.vmem [resolvable:$true] %s294_s19 }
  0x73   : > { %s7185_s2 = sld [smem:[#allocation31_spill]] }
  0x79   : > { %s5792_s20 = scalar_lea.hbm %s7185_s2, 16 }
  0x7a   : > { %p5793_p6 = scmp.ne.s32.totalorder %s7185_s2, %s5792_s20  ;;  %p5799_p1 = scmp.lt.u32.totalorder %s5792_s20, %s7185_s2 }
  0x7c   : > { %p5795_p8 = pnand %p5793_p6, %p6222_p7 }
  0x7e   : > { %p5796_p9 = pneg %p5795_p8 }
  0x80   : > { %p5801_p3 = pnand %p5799_p1, %p5796_p9 }
  0x82   : > { %5804 = shalt.err (!%p5801_p3)
}
  0x83   : > { %s5805_s25 = scalar_lea.vmem %s271_s11, 16  ;;  %s5812_s22 = scalar_lea.vmem %s271_s11, 32 }
  0x84   : > { %p5806_p10 = scmp.ne.s32.totalorder %s271_s11, %s5805_s25  ;;  %p5813_p13 = scmp.lt.s32.totalorder %s271_s11, %s271_s11 }
  0x85   : > { %p5814_p0 = scmp.lt.s32.totalorder %s5812_s22, %s5805_s25 }
  0x86   : > { %p5808_p11 = pnand %p5806_p10, %p6222_p7 }
  0x87   : > { %p5815_p2 = por %p5814_p0, %p5813_p13 }
  0x88   : > { %p5809_p12 = pneg %p5808_p11 }
  0x8a   : > { %p5816_p4 = pnand %p5815_p2, %p5809_p12 }
  0x8c   : > { %5819 = shalt.err (!%p5816_p4)
}
  0x8d   : > { %5444 = dma.hbm_to_vmem [thread:$0]  (!%p6206_p5), %s7185_s2, 16, %s271_s11, [#allocation8]  }
  0x8e   : > { %s7186_s4 = sld [smem:[#allocation33_spill]] }
  0x94   : > { %s5820_s24 = scalar_lea.hbm %s7186_s4, 16 }
  0x95   : > { %p5821_p6 = scmp.ne.s32.totalorder %s7186_s4, %s5820_s24  ;;  %p5827_p1 = scmp.lt.u32.totalorder %s5820_s24, %s7186_s4 }
  0x97   : > { %p5823_p8 = pnand %p5821_p6, %p6222_p7 }
  0x99   : > { %p5824_p9 = pneg %p5823_p8 }
  0x9b   : > { %p5829_p3 = pnand %p5827_p1, %p5824_p9 }
  0x9d   : > { %5832 = shalt.err (!%p5829_p3)
}
  0x9e   : > { %s5833_s25 = scalar_lea.vmem %s295_s19, 16  ;;  %s5840_s11 = scalar_lea.vmem %s295_s19, 32 }
  0x9f   : > { %p5834_p10 = scmp.ne.s32.totalorder %s295_s19, %s5833_s25  ;;  %p5841_p13 = scmp.lt.s32.totalorder %s295_s19, %s295_s19 }
  0xa0   : > { %p5842_p0 = scmp.lt.s32.totalorder %s5840_s11, %s5833_s25 }
  0xa1   : > { %p5836_p11 = pnand %p5834_p10, %p6222_p7 }
  0xa2   : > { %p5843_p2 = por %p5842_p0, %p5841_p13 }
  0xa3   : > { %p5837_p12 = pneg %p5836_p11 }
  0xa5   : > { %p5844_p4 = pnand %p5843_p2, %p5837_p12 }
  0xa7   : > { %5847 = shalt.err (!%p5844_p4)
}
  0xa8   : > { %5450 = dma.hbm_to_vmem [thread:$0]  (!%p6206_p5), %s7186_s4, 16, %s295_s19, [#allocation11]  }
  0xa9   : > { %s6081_s12 = smov [#allocation15]   ;;  %s6082_s26 = smov [#allocation16]  }
  0xaa   : > { %s318_s27 = sshll.u32 %s6081_s12, 4  ;;  %s329_s24 = sshll.u32 %s6082_s26, 4  ;;  %s319_s27 = int_to_ptr.vmem [resolvable:$true] %s318_s27  ;;  %s330_s24 = int_to_ptr.vmem [resolvable:$true] %s329_s24 }
  0xab   : > { %s5848_s8 = scalar_lea.hbm %s7153_s6, 32 }
  0xac   : > { %p5849_p6 = scmp.ne.s32.totalorder %s7153_s6, %s5848_s8  ;;  %p5855_p1 = scmp.lt.u32.totalorder %s5848_s8, %s7153_s6 }
  0xae   : > { %p5851_p8 = pnand %p5849_p6, %p6222_p7 }
  0xb0   : > { %p5852_p9 = pneg %p5851_p8 }
  0xb2   : > { %p5857_p3 = pnand %p5855_p1, %p5852_p9 }
  0xb4   : > { %5860 = shalt.err (!%p5857_p3)
}
  0xb5   : > { %s5861_s19 = scalar_lea.vmem %s319_s27, 32  ;;  %p5869_p13 = scmp.lt.s32.totalorder %s319_s27, %s319_s27 }
  0xb6   : > { %p5862_p10 = scmp.ne.s32.totalorder %s319_s27, %s5861_s19  ;;  %p5870_p0 = scmp.lt.s32.totalorder %s5861_s19, %s5861_s19 }
  0xb8   : > { %p5864_p11 = pnand %p5862_p10, %p6222_p7  ;;  %p5871_p2 = por %p5870_p0, %p5869_p13 }
  0xba   : > { %p5865_p12 = pneg %p5864_p11 }
  0xbc   : > { %p5872_p4 = pnand %p5871_p2, %p5865_p12 }
  0xbe   : > { %5875 = shalt.err (!%p5872_p4)
}
  0xbf   : > { %5456 = dma.hbm_to_vmem [thread:$0]  (!%p6206_p5), %s7153_s6, 32, %s319_s27, [#allocation14]  }
  0xc0   : > { %s5876_s20 = scalar_lea.hbm %s7154_s7, 16 }
  0xc1   : > { %p5877_p6 = scmp.ne.s32.totalorder %s7154_s7, %s5876_s20  ;;  %p5883_p1 = scmp.lt.u32.totalorder %s5876_s20, %s7154_s7 }
  0xc3   : > { %p5879_p8 = pnand %p5877_p6, %p6222_p7 }
  0xc5   : > { %p5880_p9 = pneg %p5879_p8 }
  0xc7   : > { %p5885_p3 = pnand %p5883_p1, %p5880_p9 }
  0xc9   : > { %5888 = shalt.err (!%p5885_p3)
}
  0xca   : > { %s5889_s22 = scalar_lea.vmem %s330_s24, 16  ;;  %s5896_s27 = scalar_lea.vmem %s330_s24, 32 }
  0xcb   : > { %p5890_p10 = scmp.ne.s32.totalorder %s330_s24, %s5889_s22  ;;  %p5897_p13 = scmp.lt.s32.totalorder %s330_s24, %s330_s24 }
  0xcc   : > { %p5898_p0 = scmp.lt.s32.totalorder %s5896_s27, %s5889_s22 }
  0xcd   : > { %p5892_p11 = pnand %p5890_p10, %p6222_p7 }
  0xce   : > { %p5899_p2 = por %p5898_p0, %p5897_p13 }
  0xcf   : > { %p5893_p12 = pneg %p5892_p11 }
  0xd1   : > { %p5900_p4 = pnand %p5899_p2, %p5893_p12 }
  0xd3   : > { %5903 = shalt.err (!%p5900_p4)
}
  0xd4   : > { %5459 = dma.hbm_to_vmem [thread:$0]  (!%p6206_p5), %s7154_s7, 16, %s330_s24, [#allocation17]  }
  0xd5   : > { %s4472_s21 = sadd.s32 4294967294, %s6072_s15   ;;  %s37_s23 = sadd.s32 1, %s6064_s13 }
  0xd6   : > { %s40_s12 = sadd.s32 1, %s6068_s14  ;;  %p38_p7 = scmp.ge.s32.totalorder %s37_s23, 2 }
  0xd7   : > { %s7187_s26 = sld [smem:[#allocation25_spill]]  ;;  %s47_s16 = sadd.s32 1, %s6052_s10 }
  0xd8   : > { %p54_p6 = scmp.ne.s32.totalorder %s6052_s10, %s6048_s9  ;;  %p55_p8 = scmp.eq.s32.totalorder %s6072_s15, 0 }
  0xd9   : > { %s7234_s23 = smov (%p38_p7, %s37_s23), 0  ;;  %s7236_s12 = smov (!%p38_p7, %s40_s12), %s6068_s14 }
  0xda   : > { %p6368_p9 = por %p55_p8, %p54_p6  ;;  %p60_p5 = scmp.ne.s32.totalorder %s6048_s9, %s6044_s30 }
  0xdb   : > { %p42_p1 = scmp.ge.s32.totalorder %s7236_s12, 2  ;;  %s218_s20 = ssub.s32 %s6064_s13, %s7234_s23 }
  0xdc   : > { %p7189_p3 = scmp.ne.s32.totalorder %s7177_s17, 0  ;;  %s222_s1 = sadd.s32 1, %s6040_s29 }
  0xdd   : > { %s7238_s12 = smov (%p42_p1, %s7236_s12), 0  ;;  %p232_p11 = scmp.ne.s32.totalorder %s6040_s29, %s6036_s28 }
  0xde   : > { %p6378_p10 = por %p7189_p3, %p60_p5  ;;  %s7191_s25 = sadd.s32 4294967295, %s6072_s15  }
  0xdf   : > { %p233_p12 = scmp.eq.s32.totalorder %s7191_s25, 3  ;;  %s44_s11 = ssub.s32 %s6068_s14, %s7238_s12 }
  0xe0   : > { %p238_p13 = scmp.ne.s32.totalorder %s6036_s28, %s7187_s26  ;;  %p45_p0 = scmp.eq.s32.totalorder %s44_s11, 0 }
  0xe1   : > { %s219_s30 = sor.u32 %s218_s20, %s44_s11  ;;  %p6393_p4 = por %p233_p12, %p232_p11 }
  0xe2   : > { %p220_p2 = scmp.eq.s32.totalorder %s219_s30, 0  ;;  %p239_p7 = scmp.eq.s32.totalorder %s4472_s21, 3 }
  0xe3   : > { %s7192_s22 = scalar_select %p6393_p4, 1, 0 }
  0xe4   : > { %s6398_s27 = scalar_select %p45_p0, %s6052_s10, %s47_s16  }
  0xe5   : > { %s6401_s19 = scalar_select %p220_p2, %s6040_s29, %s222_s1  }
  0xe6   : > { %p5475_p6 = scmp.lt.s32.totalorder %s6072_s15, 4  ;;  %s340_s3 = sand.u32 1, %s6052_s10  }
  0xe7   : > { %s4753_s18 = sshll.u32 %s6068_s14, 11  ;;  %p6406_p8 = por %p239_p7, %p238_p13 }
  0xe8   : > { %s4482_s26 = sshll.u32 %s340_s3, 7  ;;  %s7194_s11 = sld [smem:[#allocation29_spill]] }
  0xe9   : > { %s7193_s25 = scalar_select %p6406_p8, 1, 0 }
  0xea   : > { %p6417_p5 = pnand %p5475_p6, %p6368_p9  ;;  %s344_s16 = scalar_lea.vmem [#allocation4], %s4482_s26 }
  0xeb   : > { %s351_s1 = sshll.u32 %s344_s16, 4  ;;  %s6423_s4 = scalar_lea.sflag [#allocation5], %s340_s3  ;;  %s6421_s1 = int_to_ptr.vmem [resolvable:$true] %s351_s1 }
  0xec   : > { %p5906_p3 = pneg %p6417_p5 }
  0xee   : > { %s7195_s2 = smov %s7194_s11  ;;  %s6413_s30 = scalar_lea.hbm %s7194_s11, %s4753_s18 }
  0xef   : > { %s5904_s0 = scalar_lea.hbm %s6413_s30, 2048  ;;  %s5909_s20 = scalar_lea.hbm %s7195_s2, 4096 }
  0xf0   : > { %p5905_p1 = scmp.ne.s32.totalorder %s6413_s30, %s5904_s0  ;;  %p5910_p9 = scmp.lt.u32.totalorder %s6413_s30, %s7195_s2 }
  0xf1   : > { %p5911_p13 = scmp.lt.u32.totalorder %s5909_s20, %s5904_s0  ;;  %p5913_p2 = scmp.lt.u32.totalorder %s5904_s0, %s6413_s30 }
  0xf2   : > { %p5907_p11 = pnand %p5906_p3, %p5905_p1 }
  0xf3   : > { %p5912_p0 = por %p5911_p13, %p5910_p9 }
  0xf4   : > { %p5908_p12 = pneg %p5907_p11 }
  0xf5   : > { %p5914_p7 = por %p5913_p2, %p5912_p0 }
  0xf7   : > { %p5915_p6 = pnand %p5914_p7, %p5908_p12 }
  0xf9   : > { %5918 = shalt.err (!%p5915_p6)
}
  0xfa   : > { %s5919_s3 = scalar_lea.vmem %s6421_s1, 2048  ;;  %s6083_s26 = smov [#allocation4]  }
  0xfb   : > { %p5920_p1 = scmp.ne.s32.totalorder %s6421_s1, %s5919_s3  ;;  %s5924_s16 = sshll.u32 %s6083_s26, 4  ;;  %s5925_s16 = int_to_ptr.vmem [resolvable:$false] %s5924_s16 }
  0xfc   : > { %s5926_s5 = scalar_lea.vmem %s5925_s16, 4096  ;;  %p5927_p4 = scmp.lt.s32.totalorder %s6421_s1, %s5925_s16 }
  0xfd   : > { %p5922_p11 = pnand %p5920_p1, %p5906_p3  ;;  %p5928_p9 = scmp.lt.s32.totalorder %s5926_s5, %s5919_s3 }
  0xff   : > { %p5923_p8 = pneg %p5922_p11  ;;  %p5929_p13 = por %p5928_p9, %p5927_p4 }
 0x101   : > { %p5930_p0 = pnand %p5929_p13, %p5923_p8 }
 0x103   : > { %5933 = shalt.err (!%p5930_p0)
}
 0x104   : > { %s7197_s0 = smov 4   ;;  %s7198_s18 = smov 64  }
 0x105   : > { %5463 = dma.hbm_to_vmem [thread:$0]  (!%p6417_p5), %s6413_s30, 2048, %s6421_s1, %s6423_s4, %s7198_s18, %s7198_s18, %s7197_s0  }
 0x106   : > { %s7199_s24 = sld [smem:[#allocation28_spill]] }
 0x10c   : > { %p7200_p3 = scmp.ne.s32.totalorder %s7199_s24, 0 }
 0x10d   : > { %s365_s20 = sand.u32 (!%p7200_p3), 1, %s6048_s9  }
 0x10e   : > { %363 = sbr.rel (%p7200_p3) target bundleno = 1192 (0x4a8), region = 52  ;;  %s4486_s11 = sshll.u32 (!%p7200_p3), %s365_s20, 7 }
 0x10f   : > { %s366_s3 = scalar_lea.sflag (!%p7200_p3), [#allocation5], %s365_s20  ;;  %s6457_s26 = scalar_lea.vmem (!%p7200_p3), [#allocation4], %s4486_s11 }
 0x115   : > { %6007 = dma.done.wait (%p6378_p10), %s366_s3, 2048  }
 0x116   : > { %6009 = vsyncadd (%p6378_p10), %s366_s3, 4294965248  ;;  %p7201_p4 = scmp.ne.s32.totalorder %s7177_s17, 0 }
 0x118   : > { %6011 = dma.done.wait (%p7201_p4), [#allocation8], 48  }
 0x119   : > { %6013 = vsyncadd (%p7201_p4), [#allocation8], 4294967248 }
 0x11a   : > { %6015 = dma.done.wait (%p7201_p4), [#allocation11], 9232  }
 0x11b   : > { %6017 = vsyncadd (%p7201_p4), [#allocation11], 4294958064 }
 0x11c   : > { %6019 = dma.done.wait (%p7201_p4), [#allocation14], 1056  }
 0x11d   : > { %6021 = vsyncadd (%p7201_p4), [#allocation14], 4294966240 }
 0x11e   : > { %6023 = dma.done.wait (%p7201_p4), [#allocation17], 16  }
 0x11f   : > { %6025 = vsyncadd (%p7201_p4), [#allocation17], 4294967280  ;;  %s7202_s4 = sld [smem:[#allocation26_spill]]  ;;  %v6084_v0 = vmov 0.0   ;;  %vm6085_vm0 = vmmov 0   ;;  %vm541_vm1 = vcmask 1041408  }
 0x120   : > { %5134 = vmatprep.subr.bf16.mxu1 %v6084_v0  ;;  %5136 = vmatprep.mubr.msk.bf16.mxu1 %vm6085_vm0, %v6084_v0  ;;  %vm516_vm2 = vcmask 31744   ;;  %v468_v1 = vld [vmem:[#allocation7] sm:$0x3]  ;;  %v5595_v13 = vld [vmem:[#allocation10 + $0x140] sm:$0xff]   ;;  %vm804_vm3 = vcmask 1040384   ;;  %v5596_v16 = vld [vmem:[#allocation10 + $0x148] sm:$0xff]  }
 0x121   : > { %v543_v2 = vsel %vm541_vm1, %v468_v1, 0  ;;  %5404 = vmatprep.subr.msk.bf16.mxu0 %vm541_vm1, %v468_v1  ;;  %vm805_vm4 = vsmask.f32 256  ;;  %v813_v15 = vld [vmem:[#allocation2 + $0x18] sm:$0x1]  ;;  %v5597_v20 = vld [vmem:[#allocation10 + $0x100] sm:$0xff]  }
 0x122   : > { %5117 = vmatpush3.bf16.msra.mxu0 %v543_v2  ;;  %5135 = vmatpush3.bf16.msra.mxu1 %v543_v2  ;;  %vm6517_vm5 = vmand %vm804_vm3, %vm805_vm4  ;;  %vm837_vm6 = vsmask.f32 7938  ;;  %v810_v19 = vld [vmem:[#allocation2 + $0xc] sm:$0x1]  ;;  %v845_v22 = vld [vmem:[#allocation2 + $0x20] sm:$0x1] }
 0x123   : > { %5140 = vmatprep.subr.bf16.mxu1 %v6084_v0  ;;  %v814_v17 = vsel %vm6517_vm5, 0, %v813_v15  ;;  %vm6524_vm7 = vmand %vm804_vm3, %vm837_vm6  ;;  %v811_v21 = vsel %vm6517_vm5, 0, %v810_v19  ;;  %v5598_v23 = vld [vmem:[#allocation10 + $0xc0] sm:$0xff]   ;;  %v842_v25 = vld [vmem:[#allocation2 + $0x14] sm:$0x1]  ;;  %4851 = vmatprep.subr.bf16.mxu0 %v5597_v20  ;;  %vm896_vm8 = vcmask 1043456  }
 0x124   : > { %815 = vst [vmem:[#allocation2 + $0x18] sm:$0x1] %v814_v17  ;;  %812 = vst [vmem:[#allocation2 + $0xc] sm:$0x1] %v811_v21  ;;  %v846_v24 = vsel %vm6524_vm7, 0, %v845_v22  ;;  %v843_v26 = vsel %vm6524_vm7, 0, %v842_v25 }
 0x125   : > { %s4755_s8 = sshll.u32 %s7202_s4, 6  ;;  %s6481_s30 = sshll.u32 %s7202_s4, 3  ;;  %847 = vst [vmem:[#allocation2 + $0x20] sm:$0x1] %v846_v24  ;;  %v5599_v27 = vld [vmem:[#allocation10 + $0x150] sm:$0xff]   ;;  %v5600_v28 = vld [vmem:[#allocation10 + $0x108] sm:$0xff]   ;;  %vm6581_vm10 = vmand %vm896_vm8, %vm837_vm6 }
 0x126   : > { %s4498_s21 = sadd.s32 4294967295, %s6481_s30  ;;  %s6486_s1 = sadd.s32 8, %s6481_s30  ;;  %844 = vst [vmem:[#allocation2 + $0x14] sm:$0x1] %v843_v26  ;;  %v819_v29 = vld [vmem:[#allocation2 + $0x30] sm:$0x1] }
 0x127   : > { %p453_p10 = scmp.gt.s32.totalorder %s4498_s21, 0  ;;  %p461_p8 = scmp.lt.s32.totalorder %s6486_s1, 15  ;;  %v820_v30 = vsel %vm6517_vm5, 0, %v819_v29  ;;  %v816_v31 = vld [vmem:[#allocation2 + $0x24] sm:$0x1]  ;;  %v5602_v34 = vld [vmem:[#allocation10 + $0x158] sm:$0xff]  }
 0x128   : > { %s6490_s17 = scalar_lea.vmem %s6457_s26, %s4755_s8 [#allocation4]  ;;  %821 = vst [vmem:[#allocation2 + $0x30] sm:$0x1] %v820_v30  ;;  %v817_v32 = vsel %vm6517_vm5, 0, %v816_v31  ;;  %v5601_v33 = vld [vmem:[#allocation10 + $0xc8] sm:$0xff]   ;;  %v5603_v35 = vld [vmem:[#allocation10 + $0x110] sm:$0xff]   ;;  %v5605_v41 = vld [vmem:[#allocation10 + $0x160] sm:$0xff]  }
 0x129   : > { %s7240_s21 = smov (!%p453_p10, %s4498_s21), 0  ;;  %v5585_v3 = vld [vmem:[%s6490_s17] sm:$0xff]   ;;  %v5586_v4 = vld [vmem:[%s6490_s17 + $0x8] sm:$0xff]   ;;  %v5587_v5 = vld [vmem:[%s6490_s17 + $0x10] sm:$0xff]   ;;  %818 = vst [vmem:[#allocation2 + $0x24] sm:$0x1] %v817_v32 }
 0x12a   : > { %s462_s16 = scalar_select %p461_p8, %s6486_s1, 15  ;;  %5118 = vmatprep.mubr.msk.bf16.mxu0 %vm516_vm2, %v5585_v3  ;;  %v5588_v7 = vld [vmem:[%s6490_s17 + $0x18] sm:$0xff]   ;;  %v5589_v8 = vld [vmem:[%s6490_s17 + $0x20] sm:$0xff]   ;;  %v5590_v10 = vld [vmem:[%s6490_s17 + $0x28] sm:$0xff]   ;;  %vm874_vm9 = vsmask.f32 4368 }
 0x12b   : > { %s4756_s5 = sshll.u32 %s7240_s21, 3  ;;  %5119 = vmatmul.mubr.msk.bf16.vlgmr.msra.gmra.mrb[0].mxu0 %vm516_vm2, %v5586_v4  ;;  %v5592_v11 = vld [vmem:[%s6490_s17 + $0x30] sm:$0xff]   ;;  %v5593_v12 = vld [vmem:[%s6490_s17 + $0x38] sm:$0xff]   ;;  %v848_v39 = vld [vmem:[#allocation2 + $0x2c] sm:$0x1]  ;;  %p666_p5 = scmp.gt.s32.totalorder %s6481_s30, 0 }
 0x12c   : > { %s457_s0 = scalar_lea.vmem %s6457_s26, %s4756_s5 [#allocation4]  ;;  %s4757_s18 = sshll.u32 %s462_s16, 3  ;;  %5122 = vmatprep.mubr.msk.bf16.mxu0 %vm516_vm2, %v5587_v5  ;;  %4852 = vmatpush3.bf16.msra.mxu0 %v5598_v23  ;;  %v5604_v36 = vld [vmem:[#allocation10 + $0xd0] sm:$0xff]   ;;  %v851_v37 = vld [vmem:[#allocation2 + $0x38] sm:$0x1]  ;;  %v849_v40 = vsel %vm6524_vm7, 0, %v848_v39  ;;  %v5608_v47 = vld [vmem:[#allocation10 + $0x168] sm:$0xff]  }
 0x12d   : > { %v5591_v6 = vld [vmem:[%s457_s0] sm:$0xff]   ;;  %s465_s24 = scalar_lea.vmem %s6457_s26, %s4757_s18 [#allocation4]  ;;  %4853 = vmatprep.subr.bf16.mxu0 %v5600_v28  ;;  %v852_v38 = vsel %vm6524_vm7, 0, %v851_v37  ;;  %v5606_v42 = vld [vmem:[#allocation10 + $0x118] sm:$0xff]   ;;  %850 = vst [vmem:[#allocation2 + $0x2c] sm:$0x1] %v849_v40  ;;  %v5611_v55 = vld [vmem:[#allocation10 + $0x170] sm:$0xff]  }
 0x12e   : > { %5137 = vmatmul.mubr.msk.bf16.vlgmr.msra.gmra.mrb[0].mxu1 %vm516_vm2, %v5591_v6  ;;  %v5594_v9 = vld [vmem:[%s465_s24] sm:$0xff]   ;;  %853 = vst [vmem:[#allocation2 + $0x38] sm:$0x1] %v852_v38  ;;  %v5607_v43 = vld [vmem:[#allocation10 + $0xd8] sm:$0xff]   ;;  %v825_v44 = vld [vmem:[#allocation2 + $0x48] sm:$0x1] }
 0x12f   : > { %5141 = vmatpush3.bf16.msra.mxu1 %v543_v2  ;;  %5142 = vmatprep.mubr.msk.bf16.mxu1 %vm6085_vm0, %v6084_v0  ;;  %v826_v45 = vsel %vm6517_vm5, 0, %v825_v44  ;;  %v822_v46 = vld [vmem:[#allocation2 + $0x3c] sm:$0x1]  ;;  %v857_v50 = vld [vmem:[#allocation2 + $0x50] sm:$0x1]  ;;  %v5612_v57 = vld [vmem:[#allocation10 + $0x128] sm:$0xff]  }
 0x130   : > { %5146 = vmatprep.subr.bf16.mxu1 %v5595_v13  ;;  %4854 = vmatpush3.bf16.msra.mxu0 %v5601_v33  ;;  %v5609_v48 = vld [vmem:[#allocation10 + $0x120] sm:$0xff]   ;;  %827 = vst [vmem:[#allocation2 + $0x48] sm:$0x1] %v826_v45  ;;  %v823_v49 = vsel %vm6517_vm5, 0, %v822_v46  ;;  %v858_v52 = vsel %vm6524_vm7, 0, %v857_v50  ;;  %v5613_v60 = vld [vmem:[#allocation10 + $0xe8] sm:$0xff]   ;;  %vm6588_vm11 = vmor %vm805_vm4, %vm874_vm9 }
 0x131   : > { %4855 = vmatprep.subr.bf16.mxu0 %v5603_v35  ;;  %v5610_v51 = vld [vmem:[#allocation10 + $0xe0] sm:$0xff]   ;;  %824 = vst [vmem:[#allocation2 + $0x3c] sm:$0x1] %v823_v49  ;;  %859 = vst [vmem:[#allocation2 + $0x50] sm:$0x1] %v858_v52  ;;  %v5614_v2 = vld [vmem:[#allocation10 + $0x178] sm:$0xff]  }
 0x132   : > { %v854_v53 = vld [vmem:[#allocation2 + $0x44] sm:$0x1]  ;;  %v807_v56 = vld [vmem:[#allocation2] sm:$0x1]  ;;  %v828_v62 = vld [vmem:[#allocation2 + $0x54] sm:$0x1] }
 0x133   : > { %5123 = vmatmul.mubr.msk.bf16.gmra.mrb[4].mxu0 %vm516_vm2, %v5588_v7  ;;  %v855_v54 = vsel %vm6524_vm7, 0, %v854_v53  ;;  %v808_v58 = vsel %vm6517_vm5, 0, %v807_v56  ;;  %v831_v59 = vld [vmem:[#allocation2 + $0x60] sm:$0x1]  ;;  %v829_v63 = vsel %vm6517_vm5, 0, %v828_v62  ;;  %v5615_v3 = vld [vmem:[#allocation10 + $0x130] sm:$0xff]  }
 0x134   : > { %5126 = vmatprep.mubr.msk.bf16.mxu0 %vm516_vm2, %v5589_v8  ;;  %4856 = vmatpush3.bf16.msra.mxu0 %v5604_v36  ;;  %856 = vst [vmem:[#allocation2 + $0x44] sm:$0x1] %v855_v54  ;;  %809 = vst [vmem:[#allocation2] sm:$0x1] %v808_v58  ;;  %v832_v61 = vsel %vm6517_vm5, 0, %v831_v59  ;;  %v5616_v5 = vld [vmem:[#allocation10 + $0xf0] sm:$0xff]  }
 0x135   : > { %4857 = vmatprep.subr.bf16.mxu0 %v5606_v42  ;;  %833 = vst [vmem:[#allocation2 + $0x60] sm:$0x1] %v832_v61  ;;  %v839_v0 = vld [vmem:[#allocation2 + $0x8] sm:$0x1]  ;;  %830 = vst [vmem:[#allocation2 + $0x54] sm:$0x1] %v829_v63 }
 0x136   : > { %5143 = vmatmul.mubr.msk.bf16.vlgmr.msra.gmra.mrb[4].mxu1 %vm516_vm2, %v5594_v9  ;;  %v840_v1 = vsel %vm6524_vm7, 0, %v839_v0  ;;  %v863_v4 = vld [vmem:[#allocation2 + $0x68] sm:$0x1]  ;;  %v860_v7 = vld [vmem:[#allocation2 + $0x5c] sm:$0x1]  ;;  %vm1574_vm12 = vcmask 1042432  }
 0x137   : > { %5147 = vmatpush3.bf16.msra.mxu1 %v5595_v13  ;;  %841 = vst [vmem:[#allocation2 + $0x8] sm:$0x1] %v840_v1  ;;  %v864_v6 = vsel %vm6524_vm7, 0, %v863_v4  ;;  %v861_v8 = vsel %vm6524_vm7, 0, %v860_v7  ;;  %v5617_v9 = vld [vmem:[#allocation10 + $0x40] sm:$0xff]   ;;  %vm1575_vm13 = vcmask 1046532  }
 0x138   : > { %5148 = vmatprep.subr.bf16.mxu1 %v5596_v16  ;;  %4858 = vmatpush3.bf16.msra.mxu0 %v5607_v43  ;;  %865 = vst [vmem:[#allocation2 + $0x68] sm:$0x1] %v864_v6  ;;  %862 = vst [vmem:[#allocation2 + $0x5c] sm:$0x1] %v861_v8  ;;  %s667_s20 = scalar_select %p666_p5, 1.0, 0.0 }
 0x139   : > { %4859 = vmatprep.subr.bf16.mxu0 %v5609_v48  ;;  %v6563_v13 = vld [vmem:[#allocation9] ss:$0 sm:$0xff]  ;;  %v1106_v58 = vld [vmem:[#allocation2 + $0xc] sm:$0xf]  ;;  %v1117_v1 = vld [vmem:[#allocation2 + $0x20] sm:$0x1] }
 0x13a   : > { %s670_s11 = sshrl.u32 %s667_s20, 16  ;;  %p669_p12 = scmp.ne.f32.partialorder %s667_s20, %s667_s20  ;;  %v1113_v50 = vld [vmem:[#allocation2 + $0x18] sm:$0xf]  ;;  %v1110_v7 = vld [vmem:[#allocation2 + $0x14] sm:$0x1]  ;;  %vm6664_vm14 = vmor %vm1574_vm12, %vm1575_vm13 }
 0x13b   : > { %5127 = vmatmul.mubr.msk.bf16.gmra.mrb[8].mxu0 %vm516_vm2, %v5590_v10  ;;  %5149 = vmatpush3.bf16.msra.mxu1 %v5596_v16  ;;  %v5618_v10 = vld [vmem:[#allocation10 + $0x138] sm:$0xff]   ;;  %s671_s3 = sand.u32 1, %s670_s11  ;;  %vm1291_vm15 = vsmask.f32 3328  ;;  %vm1292_vm0 = vsmask.f32 7440 }
 0x13c   : > { %5130 = vmatprep.mubr.msk.bf16.mxu0 %vm516_vm2, %v5592_v11  ;;  %5150 = vmatprep.subr.bf16.mxu1 %v5599_v27  ;;  %v5620_v11 = vld [vmem:[#allocation10 + $0xf8] sm:$0xff]   ;;  %s672_s26 = sadd.s32 32767, %s671_s3  ;;  %vm6690_vm3 = vmor %vm1291_vm15, %vm1292_vm0  ;;  %p678_p2 = scmp.lt.s32.totalorder %s6486_s1, 16 }
 0x13d   : > { %4860 = vmatpush3.bf16.msra.mxu0 %v5610_v51  ;;  %s673_s8 = sadd.s32 %s672_s26, %s667_s20  ;;  %p7218_p1 = scmp.ne.s32.totalorder %s7192_s22, 0 }
 0x13e   : > { %4861 = vmatprep.subr.bf16.mxu0 %v5612_v57  ;;  %s674_s21 = sand.u32 4294901760, %s673_s8 }
 0x13f   : > { %5151 = vmatpush3.bf16.msra.mxu1 %v5599_v27  ;;  %s7242_s21 = smov (%p669_p12, %s674_s21), 2143289344 }
 0x140   : > { %5152 = vmatprep.subr.bf16.mxu1 %v5602_v34  ;;  %s677_s16 = sshrl.u32 %s7242_s21, 16 }
 0x141   : > { %4862 = vmatpush3.bf16.msra.mxu0 %v5613_v60  ;;  %s742_s5 = sshll.u32 %s677_s16, 16 }
 0x142   : > { %4863 = vmatprep.subr.bf16.mxu0 %v5615_v3  ;;  %s6568_s30 = sor.u32 %s742_s5, %s677_s16  ;;  %s7215_s5 = sld [smem:[#allocation27_spill]] }
 0x143   : > { %5131 = vmatmul.mubr.msk.bf16.gmra.mrb[12].mxu0 %vm516_vm2, %v5593_v12  ;;  %5153 = vmatpush3.bf16.msra.mxu1 %v5602_v34  ;;  %v5639_v12 = vld [vmem:[#allocation10 + $0x1c0] sm:$0xff]   ;;  %v744_v33 = vstv %s6568_s30  ;;  %s6773_s0 = scalar_select %p678_p2, 1.0, 0.0 }
 0x144   : > { %5154 = vmatprep.subr.bf16.mxu1 %v5605_v41  ;;  %s4790_s30 = sshll.u32 %s7202_s4, 4 }
 0x145   : > { %4864 = vmatpush3.bf16.msra.mxu0 %v5616_v5  ;;  %s682_s1 = sshrl.u32 %s6773_s0, 16  ;;  %p681_p7 = scmp.ne.f32.partialorder %s6773_s0, %s6773_s0 }
 0x146   : > { %4865 = vmatprep.subr.bf16.mxu0 %v5618_v10  ;;  %s6782_s18 = sand.u32 1, %s682_s1 }
 0x147   : > { %5155 = vmatpush3.bf16.msra.mxu1 %v5605_v41  ;;  %s684_s24 = sadd.s32 32767, %s6782_s18 }
 0x148   : > { %5156 = vmatprep.subr.bf16.mxu1 %v5608_v47  ;;  %s6795_s20 = sadd.s32 %s684_s24, %s6773_s0  ;;  %s4749_s0 = sshll.u32 %s7215_s5, 5 }
 0x149   : > { %4866 = vmatpush3.bf16.msra.mxu0 %v5620_v11  ;;  %s686_s11 = sand.u32 4294901760, %s6795_s20  ;;  %s4308_s1 = sadd.s32 %s4790_s30, %s4749_s0 }
 0x14a   : > { %5011 = vmatprep.subr.bf16.mxu0 %v5639_v12  ;;  %s7244_s11 = smov (%p681_p7, %s686_s11), 2143289344  ;;  %s4750_s18 = sshll.u32 %s4308_s1, 6 }
 0x14b   : > { %5157 = vmatpush3.bf16.msra.mxu1 %v5608_v47  ;;  %s689_s3 = sshrl.u32 %s7244_s11, 16  ;;  %s7216_s11 = sld [smem:[#allocation35_spill]] }
 0x14c   : > { %5158 = vmatprep.subr.bf16.mxu1 %v5611_v55  ;;  %s799_s26 = sshll.u32 %s689_s3, 16  ;;  %s6086_s5 = smov [#allocation18]  }
 0x14d   : > { %s6829_s8 = sor.u32 %s799_s26, %s689_s3  ;;  %s5938_s30 = sshll.u32 %s6086_s5, 4  ;;  %s5939_s30 = int_to_ptr.vmem [resolvable:$false] %s5938_s30 }
 0x14e   : > { %s5940_s0 = scalar_lea.vmem %s5939_s30, 2048 }
 0x14f   : > { %5159 = vmatpush3.bf16.msra.mxu1 %v5611_v55 }
 0x150   : > { %5160 = vmatprep.subr.bf16.mxu1 %v5614_v2 }
 0x151   : > { %s7217_s3 = smov %s7216_s11  ;;  %s7080_s26 = scalar_lea.hbm %s7216_s11, %s4750_s18 }
 0x153   : > { %5161 = vmatpush3.bf16.msra.mxu1 %v5614_v2 }
 0x154   : > { %4931 = vmatprep.subr.bf16.mxu1 %v5617_v9 }
 0x1fe   : > { %v5120_v15 = vpop.f32.mrb[0].mxu0 }
 0x1ff   : > { %v588_v16 = vadd.f32 %v5120_v15, %v6563_v13  ;;  %v579_v17 = vpop.f32.mrb[1].mxu0 }
 0x200   : > { %v580_v19 = vadd.f32 %v6563_v13, %v579_v17  ;;  %v5121_v20 = vpop.f32.mrb[2].mxu0 }
 0x201   : > { %v644_v21 = vmax.f32 %v588_v16, 0.0  ;;  %v591_v22 = vadd.f32 %v5121_v20, %v6563_v13  ;;  %v582_v23 = vpop.f32.mrb[3].mxu0  ;;  %v732_v26 = vpop.f32.mrb[0].mxu1 }
 0x202   : > { %v642_v24 = vmax.f32 %v580_v19, 0.0  ;;  %v583_v25 = vadd.f32 %v6563_v13, %v582_v23  ;;  %v5138_v29 = vpop.f32.mrb[1].mxu1  ;;  %v6573_v37 = vadd.f32 %v6563_v13, %v732_v26 }
 0x203   : > { %v4760_v27 = vpack.c.bf16 %v644_v21, %v644_v21  ;;  %v645_v28 = vmax.f32 %v591_v22, 0.0  ;;  %v735_v32 = vpop.f32.mrb[2].mxu1 }
 0x204   : > { %v4758_v30 = vpack.c.bf16 %v642_v24, %v642_v24  ;;  %v643_v31 = vmax.f32 %v583_v25, 0.0  ;;  %v5139_v38 = vpop.f32.mrb[3].mxu1  ;;  %v6576_v43 = vadd.f32 %v6563_v13, %v735_v32  ;;  %v739_v19 = vmax.f32 %v6573_v37, 0.0 }
 0x205   : > { %v963_v34 = vshrl.u32 %v4760_v27, 16  ;;  %v966_v35 = vshll.u32 %v4760_v27, 16  ;;  %v4761_v36 = vpack.c.bf16 %v645_v28, %v645_v28 }
 0x206   : > { %v946_v39 = vshrl.u32 %v4758_v30, 16  ;;  %v949_v40 = vshll.u32 %v4758_v30, 16  ;;  %v4759_v41 = vpack.c.bf16 %v643_v31, %v643_v31  ;;  %v5124_v42 = vpop.f32.mrb[4].mxu0  ;;  %v1127_v30 = vld [vmem:[#allocation2 + $0x30] sm:$0xf] }
 0x207   : > { %v965_v44 = vrot.slane %v963_v34, 7  ;;  %v971_v45 = vshrl.u32 %v4761_v36, 16  ;;  %v974_v46 = vshll.u32 %v4761_v36, 16  ;;  %v604_v47 = vadd.f32 %v5124_v42, %v6563_v13  ;;  %v595_v48 = vpop.f32.mrb[5].mxu0 }
 0x208   : > { %v948_v51 = vrot.slane %v946_v39, 7  ;;  %v954_v52 = vshrl.u32 %v4759_v41, 16  ;;  %v957_v53 = vshll.u32 %v4759_v41, 16  ;;  %v596_v54 = vadd.f32 %v6563_v13, %v595_v48  ;;  %v5125_v55 = vpop.f32.mrb[6].mxu0  ;;  %v1120_v39 = vld [vmem:[#allocation2 + $0x24] sm:$0xf] }
 0x209   : > { %v968_v56 = vor.u32 %v966_v35, %v965_v44  ;;  %v969_v57 = vrot.slane %v965_v44, 4  ;;  %v973_v59 = vrot.slane %v971_v45, 7  ;;  %v648_v60 = vmax.f32 %v604_v47, 0.0  ;;  %v598_v61 = vpop.f32.mrb[7].mxu0 }
 0x20a   : > { %v951_v62 = vor.u32 %v949_v40, %v948_v51  ;;  %v952_v63 = vrot.slane %v948_v51, 4  ;;  %v956_v2 = vrot.slane %v954_v52, 7  ;;  %v646_v3 = vmax.f32 %v596_v54, 0.0 }
 0x20b   : > { %v1114_v4 = vsel %vm6581_vm10, %v968_v56, %v1113_v50  ;;  %v976_v5 = vor.u32 %v974_v46, %v973_v59  ;;  %v978_v6 = vrot.slane %v973_v59, 4  ;;  %v4764_v8 = vpack.c.bf16 %v648_v60, %v648_v60  ;;  %v1131_v60 = vld [vmem:[#allocation2 + $0x38] sm:$0x1] }
 0x20c   : > { %1115 = vst [vmem:[#allocation2 + $0x18] sm:$0xf] %v1114_v4  ;;  %v1107_v9 = vsel %vm6581_vm10, %v951_v62, %v1106_v58  ;;  %v959_v10 = vor.u32 %v957_v53, %v956_v2  ;;  %v961_v11 = vrot.slane %v956_v2, 4  ;;  %v4762_v12 = vpack.c.bf16 %v646_v3, %v646_v3 }
 0x20d   : > { %1108 = vst [vmem:[#allocation2 + $0xc] sm:$0xf] %v1107_v9  ;;  %v977_v15 = vsel %vm6588_vm11, %v969_v57, %v976_v5  ;;  %v1118_v16 = vsel %vm6517_vm5, %v978_v6, %v1117_v1  ;;  %v997_v17 = vshrl.u32 %v4764_v8, 16  ;;  %v1000_v22 = vshll.u32 %v4764_v8, 16 }
 0x20e   : > { %1116 = vst [vmem:[#allocation2 + $0x1c] sm:$0xf] %v977_v15  ;;  %1119 = vst [vmem:[#allocation2 + $0x20] sm:$0x1] %v1118_v16  ;;  %v960_v20 = vsel %vm6588_vm11, %v952_v63, %v959_v10  ;;  %v1111_v21 = vsel %vm6517_vm5, %v961_v11, %v1110_v7  ;;  %v980_v23 = vshrl.u32 %v4762_v12, 16  ;;  %v5128_v24 = vpop.f32.mrb[8].mxu0  ;;  %v607_v26 = vadd.f32 %v5125_v55, %v6563_v13 }
 0x20f   : > { %1109 = vst [vmem:[#allocation2 + $0x10] sm:$0xf] %v960_v20  ;;  %1112 = vst [vmem:[#allocation2 + $0x14] sm:$0x1] %v1111_v21  ;;  %v6605_v25 = vrot.slane %v997_v17, 7  ;;  %v599_v27 = vadd.f32 %v6563_v13, %v598_v61  ;;  %v620_v28 = vadd.f32 %v5128_v24, %v6563_v13  ;;  %v611_v29 = vpop.f32.mrb[9].mxu0 }
 0x210   : > { %v982_v31 = vrot.slane %v980_v23, 7  ;;  %v983_v32 = vshll.u32 %v4762_v12, 16  ;;  %v612_v34 = vadd.f32 %v6563_v13, %v611_v29  ;;  %v5129_v35 = vpop.f32.mrb[10].mxu0  ;;  %v740_v36 = vmax.f32 %v6576_v43, 0.0  ;;  %v1124_v61 = vld [vmem:[#allocation2 + $0x2c] sm:$0x1] }
 0x211   : > { %v1002_v37 = vor.u32 %v1000_v22, %v6605_v25  ;;  %v1003_v38 = vrot.slane %v6605_v25, 4  ;;  %v649_v40 = vmax.f32 %v607_v26, 0.0  ;;  %v647_v41 = vmax.f32 %v599_v27, 0.0  ;;  %v614_v42 = vpop.f32.mrb[11].mxu0  ;;  %v1141_v10 = vld [vmem:[#allocation2 + $0x48] sm:$0xf] }
 0x212   : > { %v985_v44 = vor.u32 %v983_v32, %v982_v31  ;;  %v986_v45 = vrot.slane %v982_v31, 4  ;;  %v652_v46 = vmax.f32 %v620_v28, 0.0  ;;  %v650_v47 = vmax.f32 %v612_v34, 0.0  ;;  %v1134_v23 = vld [vmem:[#allocation2 + $0x3c] sm:$0xf] }
 0x213   : > { %v1128_v48 = vsel %vm6581_vm10, %v1002_v37, %v1127_v30  ;;  %v4765_v50 = vpack.c.bf16 %v649_v40, %v649_v40  ;;  %v4763_v51 = vpack.c.bf16 %v647_v41, %v647_v41  ;;  %v623_v52 = vadd.f32 %v5129_v35, %v6563_v13 }
 0x214   : > { %1129 = vst [vmem:[#allocation2 + $0x30] sm:$0xf] %v1128_v48  ;;  %v1121_v43 = vsel %vm6581_vm10, %v985_v44, %v1120_v39  ;;  %v4768_v53 = vpack.c.bf16 %v652_v46, %v652_v46  ;;  %v4766_v54 = vpack.c.bf16 %v650_v47, %v650_v47  ;;  %v615_v55 = vadd.f32 %v6563_v13, %v614_v42 }
 0x215   : > { %1122 = vst [vmem:[#allocation2 + $0x24] sm:$0xf] %v1121_v43  ;;  %v1005_v56 = vshrl.u32 %v4765_v50, 16  ;;  %v1008_v57 = vshll.u32 %v4765_v50, 16  ;;  %v988_v58 = vshrl.u32 %v4763_v51, 16  ;;  %v991_v59 = vshll.u32 %v4763_v51, 16 }
 0x216   : > { %v1031_v62 = vshrl.u32 %v4768_v53, 16  ;;  %v1034_v63 = vshll.u32 %v4768_v53, 16  ;;  %v1014_v1 = vshrl.u32 %v4766_v54, 16  ;;  %v1017_v2 = vshll.u32 %v4766_v54, 16  ;;  %v5132_v3 = vpop.f32.mrb[12].mxu0  ;;  %v6645_v51 = vpop.f32.mrb[4].mxu1 }
 0x217   : > { %v1007_v4 = vrot.slane %v1005_v56, 7  ;;  %v990_v5 = vrot.slane %v988_v58, 7  ;;  %v653_v6 = vmax.f32 %v623_v52, 0.0  ;;  %v651_v7 = vmax.f32 %v615_v55, 0.0  ;;  %v627_v8 = vpop.f32.mrb[13].mxu0  ;;  %v5144_v55 = vpop.f32.mrb[5].mxu1 }
 0x218   : > { %v6620_v9 = vrot.slane %v1031_v62, 7  ;;  %v6622_v11 = vrot.slane %v1014_v1, 7  ;;  %v741_v12 = vpack.c.bf16 %v740_v36, %v739_v19  ;;  %v636_v15 = vadd.f32 %v5132_v3, %v6563_v13  ;;  %v5133_v16 = vpop.f32.mrb[14].mxu0  ;;  %v1145_v43 = vld [vmem:[#allocation2 + $0x50] sm:$0x1] }
 0x219   : > { %v1010_v17 = vor.u32 %v1008_v57, %v1007_v4  ;;  %v1012_v20 = vrot.slane %v1007_v4, 4  ;;  %v993_v21 = vor.u32 %v991_v59, %v990_v5  ;;  %v995_v22 = vrot.slane %v990_v5, 4  ;;  %v630_v24 = vpop.f32.mrb[15].mxu0  ;;  %v1138_v56 = vld [vmem:[#allocation2 + $0x44] sm:$0x1] }
 0x21a   : > { %v1036_v25 = vor.u32 %v1034_v63, %v6620_v9  ;;  %v1037_v26 = vrot.slane %v6620_v9, 4  ;;  %v1019_v27 = vor.u32 %v1017_v2, %v6622_v11  ;;  %v1020_v28 = vrot.slane %v6622_v11, 4  ;;  %v898_v9 = vld [vmem:[#allocation2] sm:$0xf]  ;;  %v2073_v11 = vld [vmem:[#allocation2 + $0xc] sm:$0xe] }
 0x21b   : > { %v1011_v19 = vsel %vm6588_vm11, %v1003_v38, %v1010_v17  ;;  %v1132_v29 = vsel %vm6517_vm5, %v1012_v20, %v1131_v60  ;;  %v994_v30 = vsel %vm6588_vm11, %v986_v45, %v993_v21  ;;  %v1125_v31 = vsel %vm6517_vm5, %v995_v22, %v1124_v61  ;;  %v1155_v20 = vld [vmem:[#allocation2 + $0x60] sm:$0xf]  ;;  %v1159_v55 = vld [vmem:[#allocation2 + $0x68] sm:$0x1] }
 0x21c   : > { %1130 = vst [vmem:[#allocation2 + $0x34] sm:$0xf] %v1011_v19  ;;  %1133 = vst [vmem:[#allocation2 + $0x38] sm:$0x1] %v1132_v29  ;;  %v1142_v32 = vsel %vm6581_vm10, %v1036_v25, %v1141_v10  ;;  %v1135_v34 = vsel %vm6581_vm10, %v1019_v27, %v1134_v23  ;;  %v4769_v35 = vpack.c.bf16 %v653_v6, %v653_v6  ;;  %v656_v38 = vmax.f32 %v636_v15, 0.0 }
 0x21d   : > { %1123 = vst [vmem:[#allocation2 + $0x28] sm:$0xf] %v994_v30  ;;  %1126 = vst [vmem:[#allocation2 + $0x2c] sm:$0x1] %v1125_v31  ;;  %v4767_v36 = vpack.c.bf16 %v651_v7, %v651_v7  ;;  %v746_v37 = vmul.bf16 %v744_v33, %v741_v12  ;;  %v628_v39 = vadd.f32 %v6563_v13, %v627_v8  ;;  %v902_v10 = vld [vmem:[#allocation2 + $0x8] sm:$0x1] }
 0x21e   : > { %1143 = vst [vmem:[#allocation2 + $0x48] sm:$0xf] %v1142_v32  ;;  %1136 = vst [vmem:[#allocation2 + $0x3c] sm:$0xf] %v1135_v34  ;;  %v639_v40 = vadd.f32 %v5133_v16, %v6563_v13  ;;  %v1039_v41 = vshrl.u32 %v4769_v35, 16  ;;  %v1042_v42 = vshll.u32 %v4769_v35, 16  ;;  %v4772_v48 = vpack.c.bf16 %v656_v38, %v656_v38 }
 0x21f   : > { %v1022_v44 = vshrl.u32 %v4767_v36, 16  ;;  %v1025_v45 = vshll.u32 %v4767_v36, 16  ;;  %v4524_v46 = vcombine.low %v746_v37, %v746_v37  ;;  %v4525_v47 = vcombine.high %v746_v37, %v746_v37  ;;  %v2074_v25 = vld [vmem:[#allocation2 + $0x10] sm:$0xf]  ;;  %v2075_v29 = vld [vmem:[#allocation2 + $0x14] sm:$0x1] }
 0x220   : > { %v654_v50 = vmax.f32 %v628_v39, 0.0  ;;  %v1041_v52 = vrot.slane %v1039_v41, 7  ;;  %v657_v53 = vmax.f32 %v639_v40, 0.0  ;;  %v631_v54 = vadd.f32 %v6563_v13, %v630_v24  ;;  %v2077_v37 = vld [vmem:[#allocation2 + $0x1c] sm:$0xf]  ;;  %v5693_v36 = vld [vmem:[#allocation13 + $0x10] sm:$0xff]  }
 0x221   : > { %v1024_v33 = vrot.slane %v1022_v44, 7  ;;  %v877_v57 = vshrl.u32 %v4524_v46, 16  ;;  %v880_v58 = vshll.u32 %v4524_v46, 16  ;;  %v885_v59 = vshrl.u32 %v4525_v47, 16  ;;  %v1148_v38 = vld [vmem:[#allocation2 + $0x54] sm:$0xf] }
 0x222   : > { %v888_v60 = vshll.u32 %v4525_v47, 16  ;;  %v1044_v61 = vor.u32 %v1042_v42, %v1041_v52  ;;  %v1046_v62 = vrot.slane %v1041_v52, 4  ;;  %v1065_v4 = vshrl.u32 %v4772_v48, 16  ;;  %v2078_v47 = vld [vmem:[#allocation2 + $0x20] sm:$0x1] }
 0x223   : > { %v1027_v63 = vor.u32 %v1025_v45, %v1024_v33  ;;  %v1029_v1 = vrot.slane %v1024_v33, 4  ;;  %v879_v2 = vrot.slane %v877_v57, 7  ;;  %v887_v3 = vrot.slane %v885_v59, 7 }
 0x224   : > { %v1068_v5 = vshll.u32 %v4772_v48, 16  ;;  %v1045_v6 = vsel %vm6588_vm11, %v1037_v26, %v1044_v61  ;;  %v1146_v13 = vsel %vm6517_vm5, %v1046_v62, %v1145_v43  ;;  %v1067_v21 = vrot.slane %v1065_v4, 7  ;;  %v2076_v26 = vld [vmem:[#allocation2 + $0x18] sm:$0xe]  ;;  %v1817_v62 = vld [vmem:[#allocation2 + $0xc] sm:$0xf] }
 0x225   : > { %v1028_v7 = vsel %vm6588_vm11, %v1020_v28, %v1027_v63  ;;  %v1139_v8 = vsel %vm6517_vm5, %v1029_v1, %v1138_v56  ;;  %1144 = vst [vmem:[#allocation2 + $0x4c] sm:$0xf] %v1045_v6  ;;  %1147 = vst [vmem:[#allocation2 + $0x50] sm:$0x1] %v1146_v13  ;;  %v882_v12 = vor.u32 %v880_v58, %v879_v2  ;;  %v883_v15 = vrot.slane %v879_v2, 4 }
 0x226   : > { %1137 = vst [vmem:[#allocation2 + $0x40] sm:$0xf] %v1028_v7  ;;  %1140 = vst [vmem:[#allocation2 + $0x44] sm:$0x1] %v1139_v8  ;;  %v890_v16 = vor.u32 %v888_v60, %v887_v3  ;;  %v892_v17 = vrot.slane %v887_v3, 4  ;;  %v4770_v22 = vpack.c.bf16 %v654_v50, %v654_v50  ;;  %v4773_v23 = vpack.c.bf16 %v657_v53, %v657_v53 }
 0x227   : > { %v655_v24 = vmax.f32 %v631_v54, 0.0  ;;  %v899_v28 = vsel %vm6581_vm10, %v882_v12, %v898_v9  ;;  %v4592_v30 = vrot.slane %v2073_v11, 9  ;;  %v1070_v31 = vor.u32 %v1068_v5, %v1067_v21  ;;  %v1152_v1 = vld [vmem:[#allocation2 + $0x5c] sm:$0x1]  ;;  %v1818_v5 = vld [vmem:[#allocation2 + $0x10] sm:$0xf] }
 0x228   : > { %v891_v27 = vsel %vm6588_vm11, %v883_v15, %v890_v16  ;;  %v903_v19 = vsel %vm6517_vm5, %v892_v17, %v902_v10  ;;  %900 = vst [vmem:[#allocation2] sm:$0xf] %v899_v28  ;;  %v1071_v32 = vrot.slane %v1067_v21, 4  ;;  %v1048_v34 = vshrl.u32 %v4770_v22, 16  ;;  %v5619_v9 = vld [vmem:[#allocation10] sm:$0xff]  }
 0x229   : > { %901 = vst [vmem:[#allocation2 + $0x4] sm:$0xf] %v891_v27  ;;  %904 = vst [vmem:[#allocation2 + $0x8] sm:$0x1] %v903_v19  ;;  %v1051_v35 = vshll.u32 %v4770_v22, 16  ;;  %v1073_v39 = vshrl.u32 %v4773_v23, 16  ;;  %v4771_v41 = vpack.c.bf16 %v655_v24, %v655_v24  ;;  %v1156_v44 = vsel %vm6581_vm10, %v1070_v31, %v1155_v20 }
 0x22a   : > { %v1076_v40 = vshll.u32 %v4773_v23, 16  ;;  %v2123_v42 = vrot.slane %v2074_v25, 5  ;;  %v1050_v45 = vrot.slane %v1048_v34, 7  ;;  %v2126_v46 = vrot.slane %v2075_v29, 5  ;;  %1157 = vst [vmem:[#allocation2 + $0x60] sm:$0xf] %v1156_v44 }
 0x22b   : > { %v4593_v48 = vrot.slane %v2076_v26, 9  ;;  %v1075_v50 = vrot.slane %v1073_v39, 7  ;;  %v1056_v52 = vshrl.u32 %v4771_v41, 16  ;;  %v1059_v43 = vshll.u32 %v4771_v41, 16  ;;  %v1819_v10 = vld [vmem:[#allocation2 + $0x14] sm:$0x1] }
 0x22c   : > { %v2124_v33 = vsel %vm6664_vm14, %v4592_v30, %v2123_v42  ;;  %v1053_v53 = vor.u32 %v1051_v35, %v1050_v45  ;;  %v1054_v54 = vrot.slane %v1050_v45, 4  ;;  %v2125_v56 = vrot.slane %v2123_v42, 4  ;;  %v1820_v11 = vld [vmem:[#allocation2 + $0x18] sm:$0xf]  ;;  %v1821_v20 = vld [vmem:[#allocation2 + $0x1c] sm:$0xf] }
 0x22d   : > { %v2130_v57 = vrot.slane %v2077_v37, 5  ;;  %v1078_v58 = vor.u32 %v1076_v40, %v1075_v50  ;;  %v1080_v59 = vrot.slane %v1075_v50, 4  ;;  %v1058_v60 = vrot.slane %v1056_v52, 7  ;;  %v1822_v21 = vld [vmem:[#allocation2 + $0x20] sm:$0x1]  ;;  %v5621_v26 = vld [vmem:[#allocation10 + $0x48] sm:$0xff]  }
 0x22e   : > { %v2133_v61 = vrot.slane %v2078_v47, 5  ;;  %v1149_v63 = vsel %vm6581_vm10, %v1053_v53, %v1148_v38  ;;  %v2127_v2 = vsel %vm6664_vm14, %v2125_v56, %v2126_v46  ;;  %v1842_v16 = vshrl.u32 %v1817_v62, 16  ;;  %v2079_v27 = vld [vmem:[#allocation2 + $0x24] sm:$0xe]  ;;  %v2081_v34 = vld [vmem:[#allocation2 + $0x2c] sm:$0x1] }
 0x22f   : > { %v2131_v3 = vsel %vm6664_vm14, %v4593_v48, %v2130_v57  ;;  %v2132_v4 = vrot.slane %v2130_v57, 4  ;;  %1150 = vst [vmem:[#allocation2 + $0x54] sm:$0xf] %v1149_v63  ;;  %v1079_v6 = vsel %vm6588_vm11, %v1071_v32, %v1078_v58  ;;  %v1160_v13 = vsel %vm6517_vm5, %v1080_v59, %v1159_v55  ;;  %v5623_v31 = vld [vmem:[#allocation10 + $0x8] sm:$0xff]   ;;  %v2082_v40 = vld [vmem:[#allocation2 + $0x30] sm:$0xe] }
 0x230   : > { %v1061_v7 = vor.u32 %v1059_v43, %v1058_v60  ;;  %v1063_v8 = vrot.slane %v1058_v60, 4  ;;  %1158 = vst [vmem:[#allocation2 + $0x64] sm:$0xf] %v1079_v6  ;;  %1161 = vst [vmem:[#allocation2 + $0x68] sm:$0x1] %v1160_v13  ;;  %v4600_v12 = vcombine.low %v2124_v33, %v2127_v2  ;;  %v1845_v17 = vshll.u32 %v1817_v62, 16 }
 0x231   : > { %v2134_v15 = vsel %vm6664_vm14, %v2132_v4, %v2133_v61  ;;  %v1851_v25 = vshll.u32 %v1818_v5, 16  ;;  %v1844_v28 = vrot.slane %v1842_v16, 4  ;;  %v1855_v29 = vshrl.u32 %v1818_v5, 16  ;;  %v2080_v32 = vld [vmem:[#allocation2 + $0x28] sm:$0xf]  ;;  %v5624_v46 = vld [vmem:[#allocation10 + $0x50] sm:$0xff]  }
 0x232   : > { %v1062_v22 = vsel %vm6588_vm11, %v1054_v54, %v1061_v7  ;;  %v1153_v23 = vsel %vm6517_vm5, %v1063_v8, %v1152_v1  ;;  %v4601_v24 = vcombine.low %v2131_v3, %v2134_v15  ;;  %5162 = vmatprep.mubr.bf16.mxu1 %v4600_v12  ;;  %v1847_v19 = vrot.slane %v1845_v17, 5  ;;  %v6694_v33 = vld [vmem:[#allocation2 + $0x24] sm:$0xf]  ;;  %v2083_v57 = vld [vmem:[#allocation2 + $0x34] sm:$0xf]  ;;  %v5625_v4 = vld [vmem:[#allocation10 + $0x10] sm:$0xff]  }
 0x233   : > { %1151 = vst [vmem:[#allocation2 + $0x58] sm:$0xf] %v1062_v22  ;;  %1154 = vst [vmem:[#allocation2 + $0x5c] sm:$0x1] %v1153_v23  ;;  %v1861_v30 = vshll.u32 %v1819_v10, 16  ;;  %v1853_v35 = vrot.slane %v1851_v25, 5 }
 0x234   : > { %5163 = vmatmul.mubr.bf16.vlgmr.msra.gmra.mrb[8].mxu1 %v4601_v24  ;;  %v1866_v37 = vshrl.u32 %v1820_v11, 16  ;;  %v1869_v38 = vshll.u32 %v1820_v11, 16  ;;  %v1875_v39 = vshll.u32 %v1821_v20, 16  ;;  %v1848_v41 = vor.u32 %v1847_v19, %v1844_v28  ;;  %v2084_v62 = vld [vmem:[#allocation2 + $0x38] sm:$0x1]  ;;  %v5640_v10 = vld [vmem:[#allocation10 + $0x180] sm:$0xff]  }
 0x235   : > { %4932 = vmatpush3.bf16.msra.mxu1 %v5619_v9  ;;  %v1857_v42 = vrot.slane %v1855_v29, 4  ;;  %v1863_v44 = vrot.slane %v1861_v30, 5  ;;  %v1879_v45 = vshrl.u32 %v1821_v20, 16  ;;  %v1885_v43 = vshll.u32 %v1822_v21, 16  ;;  %v5626_v5 = vld [vmem:[#allocation10 + $0x58] sm:$0xff]   ;;  %v5622_v12 = vld [vmem:[#allocation2 + $0xc] sm:$0xff]  }
 0x236   : > { %4933 = vmatprep.subr.bf16.mxu1 %v5621_v26  ;;  %v1868_v48 = vrot.slane %v1866_v37, 4  ;;  %v1871_v50 = vrot.slane %v1869_v38, 5  ;;  %v1877_v52 = vrot.slane %v1875_v39, 5  ;;  %v1849_v53 = vrot.slane %v1848_v41, 4  ;;  %v1824_v9 = vld [vmem:[#allocation2 + $0x28] sm:$0xf] }
 0x237   : > { %v1858_v54 = vor.u32 %v1857_v42, %v1853_v35  ;;  %v1881_v55 = vrot.slane %v1879_v45, 4  ;;  %v4594_v56 = vrot.slane %v2079_v27, 9  ;;  %v1887_v59 = vrot.slane %v1885_v43, 5  ;;  %v5628_v17 = vld [vmem:[#allocation10 + $0x18] sm:$0xff]   ;;  %v1825_v20 = vld [vmem:[#allocation2 + $0x2c] sm:$0x1] }
 0x238   : > { %v1872_v58 = vor.u32 %v1871_v50, %v1868_v48  ;;  %v2137_v60 = vrot.slane %v2080_v32, 5  ;;  %v2140_v61 = vrot.slane %v2081_v34, 5  ;;  %v1854_v63 = vsel %vm6690_vm3, %v1849_v53, %v1853_v35  ;;  %v5644_v22 = vld [vmem:[#allocation10 + $0x1c8] sm:$0xff]   ;;  %v6703_v23 = vpop.f32.mrb[6].mxu1  ;;  %v2085_v28 = vld [vmem:[#allocation2 + $0x3c] sm:$0xe] }
 0x239   : > { %v1859_v1 = vrot.slane %v1858_v54, 4  ;;  %4934 = vmatpush3.bf16.msra.mxu1 %v5623_v31  ;;  %v1882_v2 = vor.u32 %v1881_v55, %v1877_v52  ;;  %v4595_v3 = vrot.slane %v2082_v40, 9  ;;  %v2144_v8 = vrot.slane %v2083_v57, 5  ;;  %v2086_v19 = vld [vmem:[#allocation2 + $0x40] sm:$0xf]  ;;  %v5645_v57 = vld [vmem:[#allocation10 + $0x188] sm:$0xff]  }
 0x23a   : > { %v1873_v6 = vrot.slane %v1872_v58, 4  ;;  %v2138_v13 = vsel %vm6664_vm14, %v4594_v56, %v2137_v60  ;;  %v2139_v7 = vrot.slane %v2137_v60, 4  ;;  %4935 = vmatprep.subr.bf16.mxu1 %v5624_v46  ;;  %v2147_v16 = vrot.slane %v2084_v62, 5  ;;  %v2087_v34 = vld [vmem:[#allocation2 + $0x44] sm:$0x1]  ;;  %v5629_v42 = vld [vmem:[#allocation10 + $0x60] sm:$0xff]  }
 0x23b   : > { %v1864_v11 = vsel %vm6690_vm3, %v1859_v1, %v1863_v44  ;;  %v1883_v15 = vrot.slane %v1882_v2, 4  ;;  %v1890_v21 = vshrl.u32 %v6694_v33, 16  ;;  %v2145_v27 = vsel %vm6664_vm14, %v4595_v3, %v2144_v8  ;;  %v2088_v35 = vld [vmem:[#allocation2 + $0x48] sm:$0xe]  ;;  %v2089_v37 = vld [vmem:[#allocation2 + $0x4c] sm:$0xf] }
 0x23c   : > { %v4584_v24 = vcombine.low %v1854_v63, %v1864_v11  ;;  %v1878_v25 = vsel %vm6690_vm3, %v1873_v6, %v1877_v52  ;;  %v2141_v26 = vsel %vm6664_vm14, %v2139_v7, %v2140_v61  ;;  %v2146_v31 = vrot.slane %v2144_v8, 4  ;;  %v1826_v44 = vld [vmem:[#allocation2 + $0x30] sm:$0xf]  ;;  %v5630_v52 = vld [vmem:[#allocation10 + $0x20] sm:$0xff]   ;;  %v1827_v62 = vld [vmem:[#allocation2 + $0x34] sm:$0xf] }
 0x23d   : > { %v1888_v29 = vsel %vm6690_vm3, %v1883_v15, %v1887_v59  ;;  %v4602_v30 = vcombine.low %v2138_v13, %v2141_v26  ;;  %4936 = vmatpush3.bf16.msra.mxu1 %v5625_v4  ;;  %v1892_v32 = vrot.slane %v1890_v21, 4  ;;  %v1893_v39 = vshll.u32 %v6694_v33, 16  ;;  %v2090_v56 = vld [vmem:[#allocation2 + $0x50] sm:$0x1]  ;;  %v5631_v33 = vld [vmem:[#allocation10 + $0x68] sm:$0xff]   ;;  %v5627_v13 = vld [vmem:[#allocation2 + $0x18] sm:$0xff]  }
 0x23e   : > { %2466 = vmatprep.mubr.bf16.mxu0 %v4584_v24  ;;  %v4585_v38 = vcombine.low %v1878_v25, %v1888_v29  ;;  %4937 = vmatprep.subr.bf16.mxu1 %v5626_v5  ;;  %v1899_v40 = vshll.u32 %v1824_v9, 16  ;;  %v1903_v41 = vshrl.u32 %v1824_v9, 16  ;;  %v2148_v45 = vsel %vm6664_vm14, %v2146_v31, %v2147_v16  ;;  %v5649_v63 = vld [vmem:[#allocation10 + $0x1d0] sm:$0xff]   ;;  %v1828_v5 = vld [vmem:[#allocation2 + $0x38] sm:$0x1]  ;;  %v5633_v9 = vld [vmem:[#allocation10 + $0x28] sm:$0xff]  }
 0x23f   : > { %2467 = vmatmul.mubr.bf16.vlgmr.msra.gmra.mrb[16].mxu0 %v5622_v12  ;;  %5166 = vmatprep.mubr.bf16.mxu1 %v4602_v30  ;;  %v1909_v46 = vshll.u32 %v1825_v20, 16  ;;  %v4596_v48 = vrot.slane %v2085_v28, 9  ;;  %v2151_v50 = vrot.slane %v2086_v19, 5  ;;  %v4603_v43 = vcombine.low %v2145_v27, %v2148_v45  ;;  %v5650_v6 = vld [vmem:[#allocation10 + $0x190] sm:$0xff]   ;;  %v2091_v20 = vld [vmem:[#allocation2 + $0x54] sm:$0xe] }
 0x240   : > { %2474 = vmatprep.mubr.bf16.mxu0 %v4585_v38  ;;  %v1895_v53 = vrot.slane %v1893_v39, 5  ;;  %v1901_v54 = vrot.slane %v1899_v40, 5  ;;  %v1905_v55 = vrot.slane %v1903_v41, 4  ;;  %5012 = vmatpush3.bf16.msra.mxu0 %v5640_v10  ;;  %v2154_v61 = vrot.slane %v2087_v34, 5  ;;  %v2092_v21 = vld [vmem:[#allocation2 + $0x58] sm:$0xf] }
 0x241   : > { %4938 = vmatpush3.bf16.msra.mxu1 %v5628_v17  ;;  %v1911_v58 = vrot.slane %v1909_v46, 5  ;;  %v2152_v59 = vsel %vm6664_vm14, %v4596_v48, %v2151_v50  ;;  %v2153_v60 = vrot.slane %v2151_v50, 4  ;;  %5013 = vmatprep.subr.bf16.mxu0 %v5644_v22  ;;  %v4597_v3 = vrot.slane %v2088_v35, 9  ;;  %v5634_v22 = vld [vmem:[#allocation10 + $0x70] sm:$0xff]   ;;  %v2094_v24 = vld [vmem:[#allocation2 + $0x60] sm:$0xe] }
 0x242   : > { %5167 = vmatmul.mubr.bf16.gmra.mrb[12].mxu1 %v4603_v43  ;;  %v1896_v1 = vor.u32 %v1895_v53, %v1892_v32  ;;  %v1906_v2 = vor.u32 %v1905_v55, %v1901_v54  ;;  %4939 = vmatprep.subr.bf16.mxu1 %v5629_v42  ;;  %v2158_v4 = vrot.slane %v2089_v37, 5  ;;  %v2161_v8 = vrot.slane %v2090_v56, 5  ;;  %v2093_v19 = vld [vmem:[#allocation2 + $0x5c] sm:$0x1]  ;;  %v1267_v29 = vld [vmem:[#allocation2] sm:$0xf] }
 0x243   : > { %v2155_v7 = vsel %vm6664_vm14, %v2153_v60, %v2154_v61  ;;  %v1914_v10 = vshrl.u32 %v1826_v44, 16  ;;  %v1917_v11 = vshll.u32 %v1826_v44, 16  ;;  %v1923_v28 = vshll.u32 %v1827_v62, 16  ;;  %v5653_v30 = vld [vmem:[#allocation10 + $0x1d8] sm:$0xff]   ;;  %v2095_v41 = vld [vmem:[#allocation2 + $0x64] sm:$0xf] }
 0x244   : > { %v1897_v12 = vrot.slane %v1896_v1, 4  ;;  %v1907_v15 = vrot.slane %v1906_v2, 4  ;;  %v4604_v16 = vcombine.low %v2152_v59, %v2155_v7  ;;  %v2159_v17 = vsel %vm6664_vm14, %v4597_v3, %v2158_v4  ;;  %5014 = vmatpush3.bf16.msra.mxu0 %v5645_v57  ;;  %v2096_v42 = vld [vmem:[#allocation2 + $0x68] sm:$0x1]  ;;  %v5635_v44 = vld [vmem:[#allocation10 + $0x30] sm:$0xff]   ;;  %v5654_v45 = vld [vmem:[#allocation10 + $0x198] sm:$0xff]  }
 0x245   : > { %v2160_v25 = vrot.slane %v2158_v4, 4  ;;  %4940 = vmatpush3.bf16.msra.mxu1 %v5630_v52  ;;  %v1916_v26 = vrot.slane %v1914_v10, 4  ;;  %v1919_v27 = vrot.slane %v1917_v11, 5  ;;  %5015 = vmatprep.subr.bf16.mxu0 %v5649_v63  ;;  %v1927_v34 = vshrl.u32 %v1827_v62, 16  ;;  %v1268_v43 = vld [vmem:[#allocation2 + $0x4] sm:$0xf] }
 0x246   : > { %v1902_v31 = vsel %vm6690_vm3, %v1897_v12, %v1901_v54  ;;  %v1912_v32 = vsel %vm6690_vm3, %v1907_v15, %v1911_v58  ;;  %5170 = vmatprep.mubr.bf16.mxu1 %v4604_v16  ;;  %4941 = vmatprep.subr.bf16.mxu1 %v5631_v33  ;;  %v1933_v35 = vshll.u32 %v1828_v5, 16  ;;  %v1925_v40 = vrot.slane %v1923_v28, 5  ;;  %v5636_v53 = vld [vmem:[#allocation10 + $0x78] sm:$0xff]   ;;  %v5656_v54 = vld [vmem:[#allocation10 + $0x1e0] sm:$0xff]   ;;  %v1269_v3 = vld [vmem:[#allocation2 + $0x8] sm:$0x1] }
 0x247   : > { %2475 = vmatmul.mubr.bf16.gmra.mrb[20].mxu0 %v5627_v13  ;;  %v4586_v37 = vcombine.low %v1902_v31, %v1912_v32  ;;  %v2162_v38 = vsel %vm6664_vm14, %v2160_v25, %v2161_v8  ;;  %v1920_v39 = vor.u32 %v1919_v27, %v1916_v26  ;;  %v1929_v48 = vrot.slane %v1927_v34, 4  ;;  %v5657_v62 = vld [vmem:[#allocation10 + $0x1a0] sm:$0xff]   ;;  %v5638_v5 = vld [vmem:[#allocation10 + $0x38] sm:$0xff]   ;;  %v5632_v13 = vld [vmem:[#allocation2 + $0x24] sm:$0xff]  }
 0x248   : > { %v4605_v46 = vcombine.low %v2159_v17, %v2162_v38  ;;  %v1935_v50 = vrot.slane %v1933_v35, 5  ;;  %v4598_v52 = vrot.slane %v2091_v20, 9  ;;  %5016 = vmatpush3.bf16.msra.mxu0 %v5650_v6  ;;  %v2165_v56 = vrot.slane %v2092_v21, 5  ;;  %v1829_v6 = vld [vmem:[#allocation2 + $0x3c] sm:$0xf]  ;;  %v5145_v21 = vpop.f32.mrb[7].mxu1 }
 0x249   : > { %2482 = vmatprep.mubr.bf16.mxu0 %v4586_v37  ;;  %4942 = vmatpush3.bf16.msra.mxu1 %v5633_v9  ;;  %v1921_v55 = vrot.slane %v1920_v39, 4  ;;  %v2168_v33 = vrot.slane %v2093_v19, 5  ;;  %v4599_v57 = vrot.slane %v2094_v24, 9  ;;  %v1930_v58 = vor.u32 %v1929_v48, %v1925_v40  ;;  %v1830_v11 = vld [vmem:[#allocation2 + $0x40] sm:$0xf]  ;;  %v5660_v28 = vld [vmem:[#allocation10 + $0x1e8] sm:$0xff]  }
 0x24a   : > { %5171 = vmatmul.mubr.bf16.gmra.mrb[16].mxu1 %v4605_v46  ;;  %4943 = vmatprep.subr.bf16.mxu1 %v5634_v22  ;;  %v2172_v59 = vrot.slane %v2095_v41, 5  ;;  %v2175_v60 = vrot.slane %v2096_v42, 5  ;;  %v1295_v61 = vshrl.u32 %v1267_v29, 16  ;;  %v2166_v1 = vsel %vm6664_vm14, %v4598_v52, %v2165_v56  ;;  %v6734_v12 = vld [vmem:[#allocation10 + $0x80] sm:$0xff]   ;;  %v1831_v27 = vld [vmem:[#allocation2 + $0x44] sm:$0x1] }
 0x24b   : > { %v1926_v63 = vsel %vm6690_vm3, %v1921_v55, %v1925_v40  ;;  %v2167_v2 = vrot.slane %v2165_v56, 4  ;;  %v1298_v4 = vshll.u32 %v1267_v29, 16  ;;  %5017 = vmatprep.subr.bf16.mxu0 %v5653_v30  ;;  %v1931_v7 = vrot.slane %v1930_v58, 4  ;;  %v1270_v32 = vld [vmem:[#allocation2 + $0xc] sm:$0xf]  ;;  %v5661_v34 = vld [vmem:[#allocation10 + $0x1a8] sm:$0xff]  }
 0x24c   : > { %v2173_v8 = vsel %vm6664_vm14, %v4599_v57, %v2172_v59  ;;  %v2174_v9 = vrot.slane %v2172_v59, 4  ;;  %v1297_v10 = vrot.slane %v1295_v61, 4  ;;  %5018 = vmatpush3.bf16.msra.mxu0 %v5654_v45  ;;  %v1304_v17 = vshll.u32 %v1268_v43, 16  ;;  %v5663_v35 = vld [vmem:[#allocation10 + $0x1f0] sm:$0xff]   ;;  %v1832_v57 = vld [vmem:[#allocation2 + $0x48] sm:$0xf] }
 0x24d   : > { %v2169_v15 = vsel %vm6664_vm14, %v2167_v2, %v2168_v33  ;;  %4944 = vmatpush3.bf16.msra.mxu1 %v5635_v44  ;;  %v1300_v16 = vrot.slane %v1298_v4, 5  ;;  %v1308_v20 = vshrl.u32 %v1268_v43, 16  ;;  %5019 = vmatprep.subr.bf16.mxu0 %v5656_v54  ;;  %v1936_v22 = vsel %vm6690_vm3, %v1931_v7, %v1935_v50  ;;  %v1271_v41 = vld [vmem:[#allocation2 + $0x10] sm:$0xf]  ;;  %v1272_v43 = vld [vmem:[#allocation2 + $0x14] sm:$0x1] }
 0x24e   : > { %v4606_v24 = vcombine.low %v2166_v1, %v2169_v15  ;;  %v2176_v25 = vsel %vm6664_vm14, %v2174_v9, %v2175_v60  ;;  %v1314_v26 = vshll.u32 %v1269_v3, 16  ;;  %4945 = vmatprep.subr.bf16.mxu1 %v5636_v53  ;;  %v4587_v19 = vcombine.low %v1926_v63, %v1936_v22  ;;  %v5664_v58 = vld [vmem:[#allocation10 + $0x1b0] sm:$0xff]   ;;  %v5667_v1 = vld [vmem:[#allocation10 + $0x1f8] sm:$0xff]   ;;  %v5642_v22 = vld [vmem:[#allocation2] sm:$0xff]  }
 0x24f   : > { %2483 = vmatmul.mubr.bf16.gmra.mrb[24].mxu0 %v5632_v13  ;;  %v4607_v29 = vcombine.low %v2173_v8, %v2176_v25  ;;  %v1301_v30 = vor.u32 %v1300_v16, %v1297_v10  ;;  %v1306_v31 = vrot.slane %v1304_v17, 5  ;;  %v1310_v37 = vrot.slane %v1308_v20, 4  ;;  %v1833_v63 = vld [vmem:[#allocation2 + $0x4c] sm:$0xf]  ;;  %v5637_v2 = vld [vmem:[#allocation2 + $0x30] sm:$0xff]   ;;  %v5646_v20 = vld [vmem:[#allocation10 + $0x88] sm:$0xff]  }
 0x250   : > { %5174 = vmatprep.mubr.bf16.mxu1 %v4606_v24  ;;  %v1316_v38 = vrot.slane %v1314_v26, 5  ;;  %v1938_v39 = vshrl.u32 %v1829_v6, 16  ;;  %v1941_v40 = vshll.u32 %v1829_v6, 16  ;;  %5020 = vmatpush3.bf16.msra.mxu0 %v5657_v62  ;;  %v1947_v44 = vshll.u32 %v1830_v11, 16  ;;  %v1834_v17 = vld [vmem:[#allocation2 + $0x50] sm:$0x1] }
 0x251   : > { %2490 = vmatprep.mubr.bf16.mxu0 %v4587_v19  ;;  %v1302_v42 = vrot.slane %v1301_v30, 4  ;;  %4946 = vmatpush3.bf16.msra.mxu1 %v5638_v5  ;;  %v1951_v45 = vshrl.u32 %v1830_v11, 16  ;;  %v1957_v46 = vshll.u32 %v1831_v27, 16  ;;  %v1311_v48 = vor.u32 %v1310_v37, %v1306_v31  ;;  %v1273_v27 = vld [vmem:[#allocation2 + $0x18] sm:$0xf] }
 0x252   : > { %5175 = vmatmul.mubr.bf16.gmra.mrb[20].mxu1 %v4607_v29  ;;  %v1940_v50 = vrot.slane %v1938_v39, 4  ;;  %v1943_v52 = vrot.slane %v1941_v40, 5  ;;  %5178 = vmatprep.subr.bf16.mxu1 %v6734_v12  ;;  %v1319_v53 = vshrl.u32 %v1270_v32, 16  ;;  %v1949_v55 = vrot.slane %v1947_v44, 5  ;;  %v5651_v39 = vld [vmem:[#allocation10 + $0x90] sm:$0xff]  }
 0x253   : > { %v1307_v54 = vsel %vm6690_vm3, %v1302_v42, %v1306_v31  ;;  %v1953_v56 = vrot.slane %v1951_v45, 4  ;;  %v1959_v33 = vrot.slane %v1957_v46, 5  ;;  %5021 = vmatprep.subr.bf16.mxu0 %v5660_v28  ;;  %v1312_v59 = vrot.slane %v1311_v48, 4  ;;  %v5668_v28 = vld [vmem:[#allocation10 + $0x1b8] sm:$0xff]   ;;  %v1275_v44 = vld [vmem:[#allocation2 + $0x20] sm:$0x1] }
 0x254   : > { %v1944_v60 = vor.u32 %v1943_v52, %v1940_v50  ;;  %v1321_v61 = vrot.slane %v1319_v53, 4  ;;  %v1322_v62 = vshll.u32 %v1270_v32, 16  ;;  %5022 = vmatpush3.bf16.msra.mxu0 %v5661_v34  ;;  %v1328_v4 = vshll.u32 %v1271_v41, 16  ;;  %v5643_v48 = vld [vmem:[#allocation2 + $0x3c] sm:$0xff]   ;;  %v1835_v53 = vld [vmem:[#allocation2 + $0x54] sm:$0xf] }
 0x255   : > { %v1954_v3 = vor.u32 %v1953_v56, %v1949_v55  ;;  %v1332_v5 = vshrl.u32 %v1271_v41, 16  ;;  %v1338_v6 = vshll.u32 %v1272_v43, 16  ;;  %5023 = vmatprep.subr.bf16.mxu0 %v5663_v35  ;;  %v1317_v13 = vsel %vm6690_vm3, %v1312_v59, %v1316_v38  ;;  %v1274_v38 = vld [vmem:[#allocation2 + $0x1c] sm:$0xf] }
 0x256   : > { %v1945_v7 = vrot.slane %v1944_v60, 4  ;;  %v1324_v8 = vrot.slane %v1322_v62, 5  ;;  %v1962_v9 = vshrl.u32 %v1832_v57, 16  ;;  %v4552_v10 = vcombine.low %v1307_v54, %v1317_v13  ;;  %v1836_v60 = vld [vmem:[#allocation2 + $0x58] sm:$0xf] }
 0x257   : > { %2491 = vmatmul.mubr.bf16.gmra.mrb[28].mxu0 %v5637_v2  ;;  %v1955_v11 = vrot.slane %v1954_v3, 4  ;;  %v1330_v15 = vrot.slane %v1328_v4, 5  ;;  %v1334_v16 = vrot.slane %v1332_v5, 4  ;;  %v1340_v25 = vrot.slane %v1338_v6, 5  ;;  %v5658_v62 = vld [vmem:[#allocation10 + $0x98] sm:$0xff]   ;;  %v5647_v6 = vld [vmem:[#allocation2 + $0xc] sm:$0xff]  }
 0x258   : > { %v1950_v21 = vsel %vm6690_vm3, %v1945_v7, %v1949_v55  ;;  %v1325_v24 = vor.u32 %v1324_v8, %v1321_v61  ;;  %v1964_v26 = vrot.slane %v1962_v9, 4  ;;  %5024 = vmatpush3.bf16.msra.mxu0 %v5664_v58  ;;  %2804 = vmatprep.mubr.bf16.mxu1 %v4552_v10  ;;  %v1965_v30 = vshll.u32 %v1832_v57, 16  ;;  %v1837_v61 = vld [vmem:[#allocation2 + $0x5c] sm:$0x1]  ;;  %v1276_v4 = vld [vmem:[#allocation2 + $0x24] sm:$0xf] }
 0x259   : > { %v1960_v19 = vsel %vm6690_vm3, %v1955_v11, %v1959_v33  ;;  %v1335_v29 = vor.u32 %v1334_v16, %v1330_v15  ;;  %v1971_v31 = vshll.u32 %v1833_v63, 16  ;;  %5025 = vmatprep.subr.bf16.mxu0 %v5667_v1  ;;  %v1975_v35 = vshrl.u32 %v1833_v63, 16 }
 0x25a   : > { %v4588_v32 = vcombine.low %v1950_v21, %v1960_v19  ;;  %2805 = vmatmul.mubr.bf16.vlgmr.msra.gmra.mrb[24].mxu1 %v5642_v22  ;;  %v1326_v34 = vrot.slane %v1325_v24, 4  ;;  %v1981_v37 = vshll.u32 %v1834_v17, 16  ;;  %v1967_v41 = vrot.slane %v1965_v30, 5  ;;  %v1277_v22 = vld [vmem:[#allocation2 + $0x28] sm:$0xf]  ;;  %v5665_v24 = vld [vmem:[#allocation10 + $0xa0] sm:$0xff]  }
 0x25b   : > { %5179 = vmatpush3.bf16.msra.mxu1 %v6734_v12  ;;  %v1336_v40 = vrot.slane %v1335_v29, 4  ;;  %v1973_v42 = vrot.slane %v1971_v31, 5  ;;  %v1343_v45 = vshrl.u32 %v1273_v27, 16  ;;  %v1977_v50 = vrot.slane %v1975_v35, 4  ;;  %v1278_v29 = vld [vmem:[#allocation2 + $0x2c] sm:$0x1] }
 0x25c   : > { %2498 = vmatprep.mubr.bf16.mxu0 %v4588_v32  ;;  %v1331_v46 = vsel %vm6690_vm3, %v1326_v34, %v1330_v15  ;;  %v1983_v52 = vrot.slane %v1981_v37, 5  ;;  %5180 = vmatprep.subr.bf16.mxu1 %v5646_v20  ;;  %v1346_v43 = vshll.u32 %v1273_v27, 16  ;;  %v1968_v55 = vor.u32 %v1967_v41, %v1964_v26  ;;  %v5648_v26 = vld [vmem:[#allocation2 + $0x48] sm:$0xff]   ;;  %v1838_v41 = vld [vmem:[#allocation2 + $0x60] sm:$0xf] }
 0x25d   : > { %v1341_v54 = vsel %vm6690_vm3, %v1336_v40, %v1340_v25  ;;  %v1345_v12 = vrot.slane %v1343_v45, 4  ;;  %v1352_v56 = vshll.u32 %v1274_v38, 16  ;;  %5026 = vmatpush3.bf16.msra.mxu0 %v5668_v28  ;;  %v1978_v57 = vor.u32 %v1977_v50, %v1973_v42 }
 0x25e   : > { %v4553_v33 = vcombine.low %v1331_v46, %v1341_v54  ;;  %v1348_v58 = vrot.slane %v1346_v43, 5  ;;  %v1356_v59 = vshrl.u32 %v1274_v38, 16  ;;  %v1969_v63 = vrot.slane %v1968_v55, 4  ;;  %v1839_v46 = vld [vmem:[#allocation2 + $0x64] sm:$0xf] }
 0x25f   : > { %2499 = vmatmul.mubr.bf16.gmra.mrb[32].mxu0 %v5643_v48  ;;  %5181 = vmatpush3.bf16.msra.mxu1 %v5646_v20  ;;  %v1354_v1 = vrot.slane %v1352_v56, 5  ;;  %v1362_v2 = vshll.u32 %v1275_v44, 16  ;;  %v1986_v3 = vshrl.u32 %v1835_v53, 16  ;;  %v1979_v5 = vrot.slane %v1978_v57, 4  ;;  %v5670_v54 = vld [vmem:[#allocation10 + $0xa8] sm:$0xff]  }
 0x260   : > { %2812 = vmatprep.mubr.bf16.mxu1 %v4553_v33  ;;  %v1349_v13 = vor.u32 %v1348_v58, %v1345_v12  ;;  %v1358_v7 = vrot.slane %v1356_v59, 4  ;;  %v1989_v8 = vshll.u32 %v1835_v53, 16  ;;  %5182 = vmatprep.subr.bf16.mxu1 %v5651_v39  ;;  %v1974_v9 = vsel %vm6690_vm3, %v1969_v63, %v1973_v42  ;;  %v1840_v53 = vld [vmem:[#allocation2 + $0x68] sm:$0x1]  ;;  %v5652_v12 = vld [vmem:[#allocation2 + $0x18] sm:$0xff]  }
 0x261   : > { %v1364_v10 = vrot.slane %v1362_v2, 5  ;;  %v1988_v11 = vrot.slane %v1986_v3, 4  ;;  %v1995_v15 = vshll.u32 %v1836_v60, 16  ;;  %v1984_v16 = vsel %vm6690_vm3, %v1979_v5, %v1983_v52  ;;  %v1279_v58 = vld [vmem:[#allocation2 + $0x30] sm:$0xf] }
 0x262   : > { %2813 = vmatmul.mubr.bf16.gmra.mrb[28].mxu1 %v5647_v6  ;;  %v1350_v17 = vrot.slane %v1349_v13, 4  ;;  %v1359_v20 = vor.u32 %v1358_v7, %v1354_v1  ;;  %v1991_v21 = vrot.slane %v1989_v8, 5  ;;  %v4589_v25 = vcombine.low %v1974_v9, %v1984_v16  ;;  %v5673_v16 = vld [vmem:[#allocation10 + $0xb0] sm:$0xff]  }
 0x263   : > { %v1997_v27 = vrot.slane %v1995_v15, 5  ;;  %v1999_v28 = vshrl.u32 %v1836_v60, 16  ;;  %v2005_v19 = vshll.u32 %v1837_v61, 16  ;;  %5183 = vmatpush3.bf16.msra.mxu1 %v5651_v39  ;;  %v1367_v34 = vshrl.u32 %v1276_v4, 16 }
 0x264   : > { %v1355_v30 = vsel %vm6690_vm3, %v1350_v17, %v1354_v1  ;;  %v1360_v31 = vrot.slane %v1359_v20, 4  ;;  %v1992_v32 = vor.u32 %v1991_v21, %v1988_v11  ;;  %5184 = vmatprep.subr.bf16.mxu1 %v5658_v62  ;;  %2506 = vmatprep.mubr.bf16.mxu0 %v4589_v25  ;;  %v1370_v38 = vshll.u32 %v1276_v4, 16  ;;  %v1280_v1 = vld [vmem:[#allocation2 + $0x34] sm:$0xf]  ;;  %v1281_v21 = vld [vmem:[#allocation2 + $0x38] sm:$0x1] }
 0x265   : > { %v2001_v35 = vrot.slane %v1999_v28, 4  ;;  %v2007_v37 = vrot.slane %v2005_v19, 5  ;;  %v1376_v40 = vshll.u32 %v1277_v22, 16  ;;  %v1369_v45 = vrot.slane %v1367_v34, 4  ;;  %v5659_v28 = vld [vmem:[#allocation2 + $0x24] sm:$0xff]  }
 0x266   : > { %v1365_v42 = vsel %vm6690_vm3, %v1360_v31, %v1364_v10  ;;  %v1993_v44 = vrot.slane %v1992_v32, 4  ;;  %v1380_v39 = vshrl.u32 %v1277_v22, 16  ;;  %v1372_v52 = vrot.slane %v1370_v38, 5  ;;  %v5655_v10 = vld [vmem:[#allocation2 + $0x54] sm:$0xff]  }
 0x267   : > { %v4554_v48 = vcombine.low %v1355_v30, %v1365_v42  ;;  %2507 = vmatmul.mubr.bf16.gmra.mrb[36].mxu0 %v5648_v26  ;;  %v2002_v50 = vor.u32 %v2001_v35, %v1997_v27  ;;  %v1378_v43 = vrot.slane %v1376_v40, 5  ;;  %5185 = vmatpush3.bf16.msra.mxu1 %v5658_v62  ;;  %v1386_v33 = vshll.u32 %v1278_v29, 16  ;;  %v3039_v29 = vld [vmem:[#allocation2 + $0x18] sm:$0xf]  ;;  %v3040_v30 = vld [vmem:[#allocation2 + $0x1c] sm:$0xf] }
 0x268   : > { %v1998_v55 = vsel %vm6690_vm3, %v1993_v44, %v1997_v27  ;;  %v1382_v56 = vrot.slane %v1380_v39, 4  ;;  %v2010_v57 = vshrl.u32 %v1838_v41, 16  ;;  %5186 = vmatprep.subr.bf16.mxu1 %v5665_v24  ;;  %v1373_v60 = vor.u32 %v1372_v52, %v1369_v45  ;;  %v3041_v44 = vld [vmem:[#allocation2 + $0x20] sm:$0x1] }
 0x269   : > { %2820 = vmatprep.mubr.bf16.mxu1 %v4554_v48  ;;  %v2003_v59 = vrot.slane %v2002_v50, 4  ;;  %v2013_v61 = vshll.u32 %v1838_v41, 16  ;;  %v2019_v63 = vshll.u32 %v1839_v46, 16  ;;  %v1388_v62 = vrot.slane %v1386_v33, 5 }
 0x26a   : > { %2821 = vmatmul.mubr.bf16.gmra.mrb[32].mxu1 %v5652_v12  ;;  %v1383_v2 = vor.u32 %v1382_v56, %v1378_v43  ;;  %v2012_v3 = vrot.slane %v2010_v57, 4  ;;  %v2023_v4 = vshrl.u32 %v1839_v46, 16  ;;  %v1374_v6 = vrot.slane %v1373_v60, 4  ;;  %v1283_v57 = vld [vmem:[#allocation2 + $0x40] sm:$0xf] }
 0x26b   : > { %v2008_v5 = vsel %vm6690_vm3, %v2003_v59, %v2007_v37  ;;  %v2015_v13 = vrot.slane %v2013_v61, 5  ;;  %v2021_v7 = vrot.slane %v2019_v63, 5  ;;  %5187 = vmatpush3.bf16.msra.mxu1 %v5665_v24  ;;  %v2029_v15 = vshll.u32 %v1840_v53, 16  ;;  %v5676_v37 = vld [vmem:[#allocation10 + $0xb8] sm:$0xff]   ;;  %v6784_v63 = vld [vmem:[#allocation10 + $0x200] sm:$0xff]  }
 0x26c   : > { %v4590_v8 = vcombine.low %v1998_v55, %v2008_v5  ;;  %v1384_v9 = vrot.slane %v1383_v2, 4  ;;  %v2025_v11 = vrot.slane %v2023_v4, 4  ;;  %5188 = vmatprep.subr.bf16.mxu1 %v5670_v54  ;;  %v1379_v17 = vsel %vm6690_vm3, %v1374_v6, %v1378_v43  ;;  %v5662_v2 = vld [vmem:[#allocation2 + $0x60] sm:$0xff]  }
 0x26d   : > { %v2016_v20 = vor.u32 %v2015_v13, %v2012_v3  ;;  %v1391_v22 = vshrl.u32 %v1279_v58, 16  ;;  %v1394_v25 = vshll.u32 %v1279_v58, 16  ;;  %v2031_v27 = vrot.slane %v2029_v15, 5  ;;  %v1284_v3 = vld [vmem:[#allocation2 + $0x44] sm:$0x1] }
 0x26e   : > { %2514 = vmatprep.mubr.bf16.mxu0 %v4590_v8  ;;  %v1389_v24 = vsel %vm6690_vm3, %v1384_v9, %v1388_v62  ;;  %v2026_v26 = vor.u32 %v2025_v11, %v2021_v7  ;;  %v1400_v19 = vshll.u32 %v1280_v1, 16  ;;  %v1404_v41 = vshrl.u32 %v1280_v1, 16  ;;  %v3042_v9 = vld [vmem:[#allocation2 + $0x24] sm:$0xf] }
 0x26f   : > { %v4555_v31 = vcombine.low %v1379_v17, %v1389_v24  ;;  %2515 = vmatmul.mubr.bf16.gmra.mrb[40].mxu0 %v5655_v10  ;;  %v2017_v32 = vrot.slane %v2016_v20, 4  ;;  %v1393_v34 = vrot.slane %v1391_v22, 4  ;;  %v1396_v35 = vrot.slane %v1394_v25, 5  ;;  %5189 = vmatpush3.bf16.msra.mxu1 %v5670_v54  ;;  %v1282_v54 = vld [vmem:[#allocation2 + $0x3c] sm:$0xf] }
 0x270   : > { %v2027_v38 = vrot.slane %v2026_v26, 4  ;;  %v1402_v40 = vrot.slane %v1400_v19, 5  ;;  %v1410_v42 = vshll.u32 %v1281_v21, 16  ;;  %5190 = vmatprep.subr.bf16.mxu1 %v5673_v16  ;;  %v3064_v46 = vshrl.u32 %v3039_v29, 16  ;;  %v3043_v25 = vld [vmem:[#allocation2 + $0x28] sm:$0xf] }
 0x271   : > { %2828 = vmatprep.mubr.bf16.mxu1 %v4555_v31  ;;  %v2022_v45 = vsel %vm6690_vm3, %v2017_v32, %v2021_v7  ;;  %v1397_v39 = vor.u32 %v1396_v35, %v1393_v34  ;;  %v3067_v48 = vshll.u32 %v3039_v29, 16  ;;  %v1406_v52 = vrot.slane %v1404_v41, 4  ;;  %v3044_v24 = vld [vmem:[#allocation2 + $0x2c] sm:$0x1]  ;;  %v1285_v41 = vld [vmem:[#allocation2 + $0x48] sm:$0xf] }
 0x272   : > { %v2032_v50 = vsel %vm6690_vm3, %v2027_v38, %v2031_v27  ;;  %2829 = vmatmul.mubr.bf16.gmra.mrb[36].mxu1 %v5659_v28  ;;  %v1412_v43 = vrot.slane %v1410_v42, 5  ;;  %v3073_v53 = vshll.u32 %v3040_v30, 16  ;;  %v3066_v56 = vrot.slane %v3064_v46, 4  ;;  %v1286_v46 = vld [vmem:[#allocation2 + $0x4c] sm:$0xf] }
 0x273   : > { %v4591_v55 = vcombine.low %v2022_v45, %v2032_v50  ;;  %v1398_v12 = vrot.slane %v1397_v39, 4  ;;  %v3069_v33 = vrot.slane %v3067_v48, 5  ;;  %5191 = vmatpush3.bf16.msra.mxu1 %v5673_v16  ;;  %v1407_v58 = vor.u32 %v1406_v52, %v1402_v40 }
 0x274   : > { %v3075_v59 = vrot.slane %v3073_v53, 5  ;;  %v3077_v60 = vshrl.u32 %v3040_v30, 16  ;;  %v3083_v61 = vshll.u32 %v3041_v44, 16  ;;  %5192 = vmatprep.subr.bf16.mxu1 %v5676_v37  ;;  %v1415_v4 = vshrl.u32 %v1282_v54, 16  ;;  %v5666_v30 = vld [vmem:[#allocation2 + $0x30] sm:$0xff]   ;;  %v5669_v53 = vld [vmem:[#allocation2 + $0x18] sm:$0xff]  }
 0x275   : > { %2522 = vmatprep.mubr.bf16.mxu0 %v4591_v55  ;;  %v1403_v1 = vsel %vm6690_vm3, %v1398_v12, %v1402_v40  ;;  %v3070_v62 = vor.u32 %v3069_v33, %v3066_v56  ;;  %v1418_v5 = vshll.u32 %v1282_v54, 16  ;;  %v1408_v6 = vrot.slane %v1407_v58, 4  ;;  %v1287_v56 = vld [vmem:[#allocation2 + $0x50] sm:$0x1] }
 0x276   : > { %v3079_v13 = vrot.slane %v3077_v60, 4  ;;  %v3085_v7 = vrot.slane %v3083_v61, 5  ;;  %v1424_v8 = vshll.u32 %v1283_v57, 16  ;;  %v1417_v11 = vrot.slane %v1415_v4, 4  ;;  %v3045_v61 = vld [vmem:[#allocation2 + $0x30] sm:$0xf] }
 0x277   : > { %2523 = vmatmul.mubr.bf16.gmra.mrb[44].mxu0 %v5662_v2  ;;  %v3071_v10 = vrot.slane %v3070_v62, 4  ;;  %v1420_v15 = vrot.slane %v1418_v5, 5  ;;  %v1428_v16 = vshrl.u32 %v1283_v57, 16  ;;  %5193 = vmatpush3.bf16.msra.mxu1 %v5676_v37  ;;  %v1413_v17 = vsel %vm6690_vm3, %v1408_v6, %v1412_v43  ;;  %v3046_v4 = vld [vmem:[#allocation2 + $0x34] sm:$0xf] }
 0x278   : > { %v3080_v20 = vor.u32 %v3079_v13, %v3075_v59  ;;  %v1426_v21 = vrot.slane %v1424_v8, 5  ;;  %v1434_v22 = vshll.u32 %v1284_v3, 16  ;;  %5210 = vmatprep.subr.bf16.mxu1 %v6784_v63  ;;  %v4556_v26 = vcombine.low %v1403_v1, %v1413_v17 }
 0x279   : > { %v3076_v27 = vsel %vm6690_vm3, %v3071_v10, %v3075_v59  ;;  %v1421_v28 = vor.u32 %v1420_v15, %v1417_v11  ;;  %v1430_v19 = vrot.slane %v1428_v16, 4  ;;  %v3088_v32 = vshrl.u32 %v3042_v9, 16  ;;  %v5671_v10 = vld [vmem:[#allocation2 + $0x3c] sm:$0xff]  }
 0x27a   : > { %v3081_v29 = vrot.slane %v3080_v20, 4  ;;  %v1436_v31 = vrot.slane %v1434_v22, 5  ;;  %v3091_v34 = vshll.u32 %v3042_v9, 16  ;;  %2836 = vmatprep.mubr.bf16.mxu1 %v4556_v26  ;;  %v3097_v38 = vshll.u32 %v3043_v25, 16 }
 0x27b   : > { %v1422_v35 = vrot.slane %v1421_v28, 4  ;;  %v1431_v37 = vor.u32 %v1430_v19, %v1426_v21  ;;  %v3101_v40 = vshrl.u32 %v3043_v25, 16  ;;  %2837 = vmatmul.mubr.bf16.gmra.mrb[40].mxu1 %v5666_v30  ;;  %v3090_v44 = vrot.slane %v3088_v32, 4  ;;  %v1288_v25 = vld [vmem:[#allocation2 + $0x54] sm:$0xf] }
 0x27c   : > { %v3086_v42 = vsel %vm6690_vm3, %v3081_v29, %v3085_v7  ;;  %v3093_v45 = vrot.slane %v3091_v34, 5  ;;  %v3107_v39 = vshll.u32 %v3044_v24, 16  ;;  %v3099_v43 = vrot.slane %v3097_v38, 5  ;;  %v1289_v19 = vld [vmem:[#allocation2 + $0x58] sm:$0xf]  ;;  %v5672_v34 = vld [vmem:[#allocation2 + $0x24] sm:$0xff]  }
 0x27d   : > { %v4664_v48 = vcombine.low %v3076_v27, %v3086_v42  ;;  %v1427_v50 = vsel %vm6690_vm3, %v1422_v35, %v1426_v21  ;;  %v1432_v52 = vrot.slane %v1431_v37, 4  ;;  %v3103_v55 = vrot.slane %v3101_v40, 4  ;;  %v3047_v21 = vld [vmem:[#allocation2 + $0x38] sm:$0x1] }
 0x27e   : > { %v3094_v54 = vor.u32 %v3093_v45, %v3090_v44  ;;  %v3109_v12 = vrot.slane %v3107_v39, 5  ;;  %v1439_v33 = vshrl.u32 %v1285_v41, 16  ;;  %v1442_v58 = vshll.u32 %v1285_v41, 16  ;;  %v1290_v44 = vld [vmem:[#allocation2 + $0x5c] sm:$0x1] }
 0x27f   : > { %3688 = vmatprep.mubr.bf16.mxu0 %v4664_v48  ;;  %v1437_v57 = vsel %vm6690_vm3, %v1432_v52, %v1436_v31  ;;  %v1448_v59 = vshll.u32 %v1286_v46, 16  ;;  %v1452_v60 = vshrl.u32 %v1286_v46, 16  ;;  %v3104_v62 = vor.u32 %v3103_v55, %v3099_v43  ;;  %v3048_v46 = vld [vmem:[#allocation2 + $0x3c] sm:$0xf] }
 0x280   : > { %v4557_v1 = vcombine.low %v1427_v50, %v1437_v57  ;;  %3689 = vmatmul.mubr.bf16.vlgmr.msra.gmra.mrb[48].mxu0 %v5669_v53  ;;  %v3095_v2 = vrot.slane %v3094_v54, 4  ;;  %v1441_v3 = vrot.slane %v1439_v33, 4  ;;  %v1444_v5 = vrot.slane %v1442_v58, 5  ;;  %v3049_v53 = vld [vmem:[#allocation2 + $0x40] sm:$0xf]  ;;  %v5674_v58 = vld [vmem:[#allocation2 + $0x48] sm:$0xff]  }
 0x281   : > { %v1450_v6 = vrot.slane %v1448_v59, 5  ;;  %v1454_v13 = vrot.slane %v1452_v60, 4  ;;  %v1458_v7 = vshll.u32 %v1287_v56, 16  ;;  %v3105_v9 = vrot.slane %v3104_v62, 4  ;;  %v5699_v60 = vld [vmem:[#allocation9] ss:$0 sm:$0xff] }
 0x282   : > { %2844 = vmatprep.mubr.bf16.mxu1 %v4557_v1  ;;  %v3100_v8 = vsel %vm6690_vm3, %v3095_v2, %v3099_v43  ;;  %v3112_v11 = vshrl.u32 %v3045_v61, 16  ;;  %v3115_v15 = vshll.u32 %v3045_v61, 16  ;;  %v1445_v16 = vor.u32 %v1444_v5, %v1441_v3  ;;  %v3050_v62 = vld [vmem:[#allocation2 + $0x44] sm:$0x1] }
 0x283   : > { %v1455_v17 = vor.u32 %v1454_v13, %v1450_v6  ;;  %v1460_v20 = vrot.slane %v1458_v7, 5  ;;  %v3121_v22 = vshll.u32 %v3046_v4, 16  ;;  %v3110_v24 = vsel %vm6690_vm3, %v3105_v9, %v3109_v12  ;;  %2845 = vmatmul.mubr.bf16.gmra.mrb[44].mxu1 %v5671_v10  ;;  %v5675_v7 = vld [vmem:[#allocation2 + $0x30] sm:$0xff]  }
 0x284   : > { %v3114_v26 = vrot.slane %v3112_v11, 4  ;;  %v3117_v27 = vrot.slane %v3115_v15, 5  ;;  %v3125_v28 = vshrl.u32 %v3046_v4, 16  ;;  %v4665_v29 = vcombine.low %v3100_v8, %v3110_v24  ;;  %v834_v15 = vld [vmem:[#allocation2 + $0x6c] sm:$0x1] }
 0x285   : > { %v1446_v30 = vrot.slane %v1445_v16, 4  ;;  %v1456_v31 = vrot.slane %v1455_v17, 4  ;;  %v3123_v32 = vrot.slane %v3121_v22, 5  ;;  %v3131_v38 = vshll.u32 %v3047_v21, 16  ;;  %v866_v16 = vld [vmem:[#allocation2 + $0x74] sm:$0x1] }
 0x286   : > { %v3118_v35 = vor.u32 %v3117_v27, %v3114_v26  ;;  %v3127_v37 = vrot.slane %v3125_v28, 4  ;;  %v1463_v40 = vshrl.u32 %v1288_v25, 16  ;;  %3696 = vmatprep.mubr.bf16.mxu0 %v4665_v29  ;;  %v1466_v45 = vshll.u32 %v1288_v25, 16  ;;  %v1526_v25 = vld [vmem:[#allocation2] sm:$0xe] }
 0x287   : > { %v1451_v41 = vsel %vm6690_vm3, %v1446_v30, %v1450_v6  ;;  %v1461_v42 = vsel %vm6690_vm3, %v1456_v31, %v1460_v20  ;;  %v1472_v39 = vshll.u32 %v1289_v19, 16  ;;  %v3133_v43 = vrot.slane %v3131_v38, 5  ;;  %v1528_v29 = vld [vmem:[#allocation2 + $0x8] sm:$0x1] }
 0x288   : > { %v4558_v48 = vcombine.low %v1451_v41, %v1461_v42  ;;  %3697 = vmatmul.mubr.bf16.gmra.mrb[52].mxu0 %v5672_v34  ;;  %v3119_v50 = vrot.slane %v3118_v35, 4  ;;  %v3128_v52 = vor.u32 %v3127_v37, %v3123_v32  ;;  %v1465_v54 = vrot.slane %v1463_v40, 4  ;;  %v3051_v35 = vld [vmem:[#allocation2 + $0x48] sm:$0xf] }
 0x289   : > { %v1468_v55 = vrot.slane %v1466_v45, 5  ;;  %v1474_v12 = vrot.slane %v1472_v39, 5  ;;  %v1476_v56 = vshrl.u32 %v1289_v19, 16  ;;  %v1482_v59 = vshll.u32 %v1290_v44, 16  ;;  %v1527_v19 = vld [vmem:[#allocation2 + $0x4] sm:$0xf] }
 0x28a   : > { %2852 = vmatprep.mubr.bf16.mxu1 %v4558_v48  ;;  %v3124_v33 = vsel %vm6690_vm3, %v3119_v50, %v3123_v32  ;;  %v3129_v57 = vrot.slane %v3128_v52, 4  ;;  %v790_v61 = vadd.f32 %v5699_v60, %v6645_v51  ;;  %v3136_v3 = vshrl.u32 %v3048_v46, 16  ;;  %v3052_v39 = vld [vmem:[#allocation2 + $0x4c] sm:$0xf]  ;;  %v5677_v48 = vld [vmem:[#allocation2 + $0x54] sm:$0xff]  }
 0x28b   : > { %v1469_v1 = vor.u32 %v1468_v55, %v1465_v54  ;;  %v1478_v2 = vrot.slane %v1476_v56, 4  ;;  %v3139_v4 = vshll.u32 %v3048_v46, 16  ;;  %2853 = vmatmul.mubr.bf16.gmra.mrb[48].mxu1 %v5674_v58  ;;  %v1484_v6 = vrot.slane %v1482_v59, 5  ;;  %v3053_v52 = vld [vmem:[#allocation2 + $0x50] sm:$0x1] }
 0x28c   : > { %v3134_v5 = vsel %vm6690_vm3, %v3129_v57, %v3133_v43  ;;  %v796_v13 = vmax.f32 %v790_v61, 0.0  ;;  %v3145_v8 = vshll.u32 %v3049_v53, 16  ;;  %v3138_v11 = vrot.slane %v3136_v3, 4 }
 0x28d   : > { %v4666_v9 = vcombine.low %v3124_v33, %v3134_v5  ;;  %v1470_v10 = vrot.slane %v1469_v1, 4  ;;  %v1479_v51 = vor.u32 %v1478_v2, %v1474_v12  ;;  %v3141_v17 = vrot.slane %v3139_v4, 5  ;;  %v1529_v5 = vld [vmem:[#allocation2 + $0xc] sm:$0xe] }
 0x28e   : > { %v3147_v20 = vrot.slane %v3145_v8, 5  ;;  %v3149_v21 = vshrl.u32 %v3049_v53, 16  ;;  %v3155_v22 = vshll.u32 %v3050_v62, 16  ;;  %v793_v27 = vadd.f32 %v5699_v60, %v6703_v23 }
 0x28f   : > { %3704 = vmatprep.mubr.bf16.mxu0 %v4666_v9  ;;  %v1475_v24 = vsel %vm6690_vm3, %v1470_v10, %v1474_v12  ;;  %v1480_v26 = vrot.slane %v1479_v51, 4  ;;  %v801_v28 = vstv %s6829_s8  ;;  %v3142_v30 = vor.u32 %v3141_v17, %v3138_v11  ;;  %v1532_v11 = vld [vmem:[#allocation2 + $0x18] sm:$0xe] }
 0x290   : > { %3705 = vmatmul.mubr.bf16.gmra.mrb[56].mxu0 %v5675_v7  ;;  %v3151_v31 = vrot.slane %v3149_v21, 4  ;;  %v3157_v32 = vrot.slane %v3155_v22, 5  ;;  %v835_v34 = vsel %vm6517_vm5, 0, %v834_v15  ;;  %v797_v38 = vmax.f32 %v793_v27, 0.0  ;;  %v5678_v7 = vld [vmem:[#allocation2 + $0x3c] sm:$0xff]  }
 0x291   : > { %v1485_v37 = vsel %vm6690_vm3, %v1480_v26, %v1484_v6  ;;  %836 = vst [vmem:[#allocation2 + $0x6c] sm:$0x1] %v835_v34  ;;  %v867_v40 = vsel %vm6524_vm7, 0, %v866_v16  ;;  %v4560_v23 = vrot.slane %v1526_v25, 9  ;;  %v3143_v42 = vrot.slane %v3142_v30, 4 }
 0x292   : > { %v4559_v41 = vcombine.low %v1475_v24, %v1485_v37  ;;  %v3152_v44 = vor.u32 %v3151_v31, %v3147_v20  ;;  %868 = vst [vmem:[#allocation2 + $0x74] sm:$0x1] %v867_v40  ;;  %v1579_v45 = vrot.slane %v1527_v19, 5  ;;  %v798_v46 = vpack.c.bf16 %v797_v38, %v796_v13  ;;  %v1530_v6 = vld [vmem:[#allocation2 + $0x10] sm:$0xf] }
 0x293   : > { %v1582_v50 = vrot.slane %v1528_v29, 5  ;;  %v3160_v43 = vshrl.u32 %v3051_v35, 16  ;;  %v3163_v53 = vshll.u32 %v3051_v35, 16  ;;  %v3148_v54 = vsel %vm6690_vm3, %v3143_v42, %v3147_v20  ;;  %v1531_v13 = vld [vmem:[#allocation2 + $0x14] sm:$0x1] }
 0x294   : > { %2860 = vmatprep.mubr.bf16.mxu1 %v4559_v41  ;;  %v3153_v55 = vrot.slane %v3152_v44, 4  ;;  %v1580_v18 = vsel %vm6664_vm14, %v4560_v23, %v1579_v45  ;;  %v1581_v12 = vrot.slane %v1579_v45, 4  ;;  %v803_v56 = vmul.bf16 %v801_v28, %v798_v46  ;;  %v1533_v26 = vld [vmem:[#allocation2 + $0x1c] sm:$0xf]  ;;  %v1534_v29 = vld [vmem:[#allocation2 + $0x20] sm:$0x1] }
 0x295   : > { %2861 = vmatmul.mubr.bf16.gmra.mrb[52].mxu1 %v5677_v48  ;;  %v3162_v33 = vrot.slane %v3160_v43, 4  ;;  %v3165_v57 = vrot.slane %v3163_v53, 5  ;;  %v3169_v58 = vshll.u32 %v3052_v39, 16  ;;  %v3173_v61 = vshrl.u32 %v3052_v39, 16  ;;  %v3054_v44 = vld [vmem:[#allocation2 + $0x54] sm:$0xf] }
 0x296   : > { %v3158_v59 = vsel %vm6690_vm3, %v3153_v55, %v3157_v32  ;;  %v1583_v60 = vsel %vm6664_vm14, %v1581_v12, %v1582_v50  ;;  %v3179_v1 = vshll.u32 %v3053_v52, 16  ;;  %v4542_v62 = vcombine.low %v803_v56, %v803_v56  ;;  %v5680_v50 = vld [vmem:[#allocation10 + $0x208] sm:$0xff]   ;;  %v3055_v52 = vld [vmem:[#allocation2 + $0x58] sm:$0xf]  ;;  %v3056_v43 = vld [vmem:[#allocation2 + $0x5c] sm:$0x1] }
 0x297   : > { %v4667_v2 = vcombine.low %v3148_v54, %v3158_v59  ;;  %v4543_v3 = vcombine.high %v803_v56, %v803_v56  ;;  %v4568_v4 = vcombine.low %v1580_v18, %v1583_v60  ;;  %v3166_v8 = vor.u32 %v3165_v57, %v3162_v33  ;;  %v5681_v12 = vld [vmem:[#allocation2 + $0x48] sm:$0xff]   ;;  %v1535_v56 = vld [vmem:[#allocation2 + $0x24] sm:$0xe] }
 0x298   : > { %v3171_v9 = vrot.slane %v3169_v58, 5  ;;  %v3175_v10 = vrot.slane %v3173_v61, 4  ;;  %v3181_v51 = vrot.slane %v3179_v1, 5  ;;  %v1168_v15 = vshrl.u32 %v4542_v62, 16  ;;  %v1188_v31 = vld [vmem:[#allocation2 + $0x6c] sm:$0xf] }
 0x299   : > { %3712 = vmatprep.mubr.bf16.mxu0 %v4667_v2  ;;  %v1171_v16 = vshll.u32 %v4542_v62, 16  ;;  %v1176_v17 = vshrl.u32 %v4543_v3, 16  ;;  %v1179_v20 = vshll.u32 %v4543_v3, 16  ;;  %5194 = vmatprep.mubr.bf16.mxu1 %v4568_v4  ;;  %v3167_v21 = vrot.slane %v3166_v8, 4  ;;  %v1192_v32 = vld [vmem:[#allocation2 + $0x74] sm:$0x1] }
 0x29a   : > { %3713 = vmatmul.mubr.bf16.gmra.mrb[60].mxu0 %v5678_v7  ;;  %v3176_v22 = vor.u32 %v3175_v10, %v3171_v9  ;;  %v4561_v25 = vrot.slane %v1529_v5, 9  ;;  %v1586_v24 = vrot.slane %v1530_v6, 5  ;;  %v1170_v27 = vrot.slane %v1168_v15, 7  ;;  %v1536_v33 = vld [vmem:[#allocation2 + $0x28] sm:$0xf]  ;;  %v5682_v15 = vld [vmem:[#allocation10 + $0x210] sm:$0xff]  }
 0x29b   : > { %v1178_v28 = vrot.slane %v1176_v17, 7  ;;  %v1589_v19 = vrot.slane %v1531_v13, 5  ;;  %v4562_v30 = vrot.slane %v1532_v11, 9  ;;  %v3172_v34 = vsel %vm6690_vm3, %v3167_v21, %v3171_v9  ;;  %v1537_v60 = vld [vmem:[#allocation2 + $0x2c] sm:$0x1] }
 0x29c   : > { %v3177_v35 = vrot.slane %v3176_v22, 4  ;;  %v1587_v37 = vsel %vm6664_vm14, %v4561_v25, %v1586_v24  ;;  %v1588_v38 = vrot.slane %v1586_v24, 4  ;;  %v1173_v40 = vor.u32 %v1171_v16, %v1170_v27  ;;  %v1538_v61 = vld [vmem:[#allocation2 + $0x30] sm:$0xe]  ;;  %v1539_v62 = vld [vmem:[#allocation2 + $0x34] sm:$0xf] }
 0x29d   : > { %v1174_v23 = vrot.slane %v1170_v27, 4  ;;  %v1181_v41 = vor.u32 %v1179_v20, %v1178_v28  ;;  %v1183_v42 = vrot.slane %v1178_v28, 4  ;;  %v1593_v46 = vrot.slane %v1533_v26, 5  ;;  %v1540_v13 = vld [vmem:[#allocation2 + $0x38] sm:$0x1] }
 0x29e   : > { %v3182_v45 = vsel %vm6690_vm3, %v3177_v35, %v3181_v51  ;;  %v1590_v39 = vsel %vm6664_vm14, %v1588_v38, %v1589_v19  ;;  %v1596_v48 = vrot.slane %v1534_v29, 5  ;;  %v1189_v54 = vsel %vm6581_vm10, %v1173_v40, %v1188_v31  ;;  %v3057_v51 = vld [vmem:[#allocation2 + $0x60] sm:$0xf]  ;;  %v3058_v26 = vld [vmem:[#allocation2 + $0x64] sm:$0xf]  ;;  %v5683_v35 = vld [vmem:[#allocation10 + $0x218] sm:$0xff]  }
 0x29f   : > { %v1182_v53 = vsel %vm6588_vm11, %v1174_v23, %v1181_v41  ;;  %v1193_v55 = vsel %vm6517_vm5, %v1183_v42, %v1192_v32  ;;  %v4668_v18 = vcombine.low %v3172_v34, %v3182_v45  ;;  %1190 = vst [vmem:[#allocation2 + $0x6c] sm:$0xf] %v1189_v54  ;;  %v4569_v57 = vcombine.low %v1587_v37, %v1590_v39  ;;  %v3059_v28 = vld [vmem:[#allocation2 + $0x68] sm:$0x1]  ;;  %v1542_v41 = vld [vmem:[#allocation2 + $0x40] sm:$0xf] }
 0x2a0   : > { %1191 = vst [vmem:[#allocation2 + $0x70] sm:$0xf] %v1182_v53  ;;  %1194 = vst [vmem:[#allocation2 + $0x74] sm:$0x1] %v1193_v55  ;;  %v1594_v58 = vsel %vm6664_vm14, %v4562_v30, %v1593_v46  ;;  %v1595_v59 = vrot.slane %v1593_v46, 4  ;;  %v3184_v0 = vshrl.u32 %v3054_v44, 16 }
 0x2a1   : > { %3720 = vmatprep.mubr.bf16.mxu0 %v4668_v18  ;;  %v3187_v49 = vshll.u32 %v3054_v44, 16  ;;  %v3193_v1 = vshll.u32 %v3055_v52, 16  ;;  %v3197_v14 = vshrl.u32 %v3055_v52, 16  ;;  %v3203_v2 = vshll.u32 %v3056_v43, 16  ;;  %5195 = vmatmul.mubr.bf16.vlgmr.msra.gmra.mrb[8].mxu1 %v4569_v57  ;;  %v1541_v53 = vld [vmem:[#allocation2 + $0x3c] sm:$0xe] }
 0x2a2   : > { %v1597_v3 = vsel %vm6664_vm14, %v1595_v59, %v1596_v48  ;;  %3721 = vmatmul.mubr.bf16.gmra.mrb[64].mxu0 %v5681_v12  ;;  %v3186_v4 = vrot.slane %v3184_v0, 4  ;;  %v4563_v5 = vrot.slane %v1535_v56, 9  ;;  %v1600_v6 = vrot.slane %v1536_v33, 5  ;;  %5211 = vmatpush3.bf16.msra.mxu1 %v6784_v63  ;;  %v1545_v54 = vld [vmem:[#allocation2 + $0x4c] sm:$0xf]  ;;  %v5685_v12 = vld [vmem:[#allocation10 + $0x220] sm:$0xff]  }
 0x2a3   : > { %v4570_v7 = vcombine.low %v1594_v58, %v1597_v3  ;;  %v3189_v8 = vrot.slane %v3187_v49, 5  ;;  %v3195_v9 = vrot.slane %v3193_v1, 5  ;;  %v3199_v10 = vrot.slane %v3197_v14, 4  ;;  %5212 = vmatprep.subr.bf16.mxu1 %v5680_v50  ;;  %v1543_v56 = vld [vmem:[#allocation2 + $0x44] sm:$0x1] }
 0x2a4   : > { %v3205_v11 = vrot.slane %v3203_v2, 5  ;;  %v1601_v16 = vsel %vm6664_vm14, %v4563_v5, %v1600_v6  ;;  %v1602_v17 = vrot.slane %v1600_v6, 4  ;;  %v1603_v20 = vrot.slane %v1537_v60, 5  ;;  %v6880_v33 = vld [vmem:[#allocation2 + $0x58] sm:$0xf] }
 0x2a5   : > { %5198 = vmatprep.mubr.bf16.mxu1 %v4570_v7  ;;  %v3190_v21 = vor.u32 %v3189_v8, %v3186_v4  ;;  %v3200_v22 = vor.u32 %v3199_v10, %v3195_v9  ;;  %v4564_v25 = vrot.slane %v1538_v61, 9  ;;  %v1607_v24 = vrot.slane %v1539_v62, 5  ;;  %v1544_v59 = vld [vmem:[#allocation2 + $0x48] sm:$0xe]  ;;  %v1546_v0 = vld [vmem:[#allocation2 + $0x50] sm:$0x1] }
 0x2a6   : > { %v1604_v63 = vsel %vm6664_vm14, %v1602_v17, %v1603_v20  ;;  %v1610_v27 = vrot.slane %v1540_v13, 5  ;;  %v3208_v19 = vshrl.u32 %v3057_v51, 16  ;;  %v3211_v29 = vshll.u32 %v3057_v51, 16  ;;  %5213 = vmatpush3.bf16.msra.mxu1 %v5680_v50  ;;  %v5684_v50 = vld [vmem:[#allocation2 + $0x54] sm:$0xff]   ;;  %v6883_v3 = vld [vmem:[#allocation2 + $0x1c] sm:$0xf] }
 0x2a7   : > { %v3191_v30 = vrot.slane %v3190_v21, 4  ;;  %v3201_v31 = vrot.slane %v3200_v22, 4  ;;  %v4571_v32 = vcombine.low %v1601_v16, %v1604_v63  ;;  %v1608_v34 = vsel %vm6664_vm14, %v4564_v25, %v1607_v24  ;;  %5214 = vmatprep.subr.bf16.mxu1 %v5682_v15  ;;  %v1549_v10 = vld [vmem:[#allocation2 + $0x5c] sm:$0x1]  ;;  %v5686_v20 = vld [vmem:[#allocation10 + $0x228] sm:$0xff]  }
 0x2a8   : > { %v1609_v37 = vrot.slane %v1607_v24, 4  ;;  %v3210_v38 = vrot.slane %v3208_v19, 4  ;;  %v3213_v40 = vrot.slane %v3211_v29, 5  ;;  %v3217_v23 = vshll.u32 %v3058_v26, 16  ;;  %v3061_v22 = vld [vmem:[#allocation2 + $0x70] sm:$0xf] }
 0x2a9   : > { %v3196_v42 = vsel %vm6690_vm3, %v3191_v30, %v3195_v9  ;;  %v3206_v44 = vsel %vm6690_vm3, %v3201_v31, %v3205_v11  ;;  %v3221_v45 = vshrl.u32 %v3058_v26, 16  ;;  %v3227_v39 = vshll.u32 %v3059_v28, 16  ;;  %5199 = vmatmul.mubr.bf16.gmra.mrb[12].mxu1 %v4571_v32  ;;  %v3060_v11 = vld [vmem:[#allocation2 + $0x6c] sm:$0xf]  ;;  %v3062_v25 = vld [vmem:[#allocation2 + $0x74] sm:$0x1] }
 0x2aa   : > { %v4669_v46 = vcombine.low %v3196_v42, %v3206_v44  ;;  %v1611_v48 = vsel %vm6664_vm14, %v1609_v37, %v1610_v27  ;;  %v3214_v52 = vor.u32 %v3213_v40, %v3210_v38  ;;  %v3219_v43 = vrot.slane %v3217_v23, 5  ;;  %5215 = vmatpush3.bf16.msra.mxu1 %v5682_v15  ;;  %v1547_v63 = vld [vmem:[#allocation2 + $0x54] sm:$0xe]  ;;  %v3297_v27 = vld [vmem:[#allocation2 + $0x20] sm:$0x1]  ;;  %v5688_v23 = vld [vmem:[#allocation10 + $0x230] sm:$0xff]  }
 0x2ab   : > { %v4572_v55 = vcombine.low %v1608_v34, %v1611_v48  ;;  %v3223_v18 = vrot.slane %v3221_v45, 4  ;;  %5216 = vmatprep.subr.bf16.mxu1 %v5683_v35  ;;  %v1614_v58 = vrot.slane %v1542_v41, 5  ;;  %v3229_v61 = vrot.slane %v3227_v39, 5  ;;  %v5687_v19 = vld [vmem:[#allocation2 + $0x60] sm:$0xff]   ;;  %v6898_v32 = vld [vmem:[#allocation2 + $0x28] sm:$0xf] }
 0x2ac   : > { %3728 = vmatprep.mubr.bf16.mxu0 %v4669_v46  ;;  %v3215_v57 = vrot.slane %v3214_v52, 4  ;;  %v1621_v49 = vrot.slane %v1545_v54, 5  ;;  %v4565_v1 = vrot.slane %v1541_v53, 9  ;;  %v1617_v2 = vrot.slane %v1543_v56, 5  ;;  %v3295_v34 = vld [vmem:[#allocation2 + $0x18] sm:$0xe] }
 0x2ad   : > { %5202 = vmatprep.mubr.bf16.mxu1 %v4572_v55  ;;  %3729 = vmatmul.mubr.bf16.gmra.mrb[68].mxu0 %v5684_v50  ;;  %v3224_v60 = vor.u32 %v3223_v18, %v3219_v43  ;;  %v1616_v14 = vrot.slane %v1614_v58, 4  ;;  %v1628_v62 = vrot.slane %v6880_v33, 5  ;;  %v4566_v5 = vrot.slane %v1544_v59, 9  ;;  %v3302_v39 = vld [vmem:[#allocation2 + $0x34] sm:$0xf] }
 0x2ae   : > { %5217 = vmatpush3.bf16.msra.mxu1 %v5683_v35  ;;  %v1623_v6 = vrot.slane %v1621_v49, 4  ;;  %v1624_v13 = vrot.slane %v1546_v0, 5  ;;  %v3220_v7 = vsel %vm6690_vm3, %v3215_v57, %v3219_v43  ;;  %v1615_v8 = vsel %vm6664_vm14, %v4565_v1, %v1614_v58  ;;  %v5689_v58 = vld [vmem:[#allocation10 + $0x238] sm:$0xff]   ;;  %v3300_v59 = vld [vmem:[#allocation2 + $0x2c] sm:$0x1] }
 0x2af   : > { %v3225_v4 = vrot.slane %v3224_v60, 4  ;;  %5218 = vmatprep.subr.bf16.mxu1 %v5685_v12  ;;  %v1618_v9 = vsel %vm6664_vm14, %v1616_v14, %v1617_v2  ;;  %v1630_v51 = vrot.slane %v1628_v62, 4  ;;  %v3345_v21 = vrot.slane %v6883_v3, 5  ;;  %v3303_v1 = vld [vmem:[#allocation2 + $0x38] sm:$0x1] }
 0x2b0   : > { %v4573_v16 = vcombine.low %v1615_v8, %v1618_v9  ;;  %v1625_v17 = vsel %vm6664_vm14, %v1623_v6, %v1624_v13  ;;  %v1622_v26 = vsel %vm6664_vm14, %v4566_v5, %v1621_v49  ;;  %v1631_v29 = vrot.slane %v1549_v10, 5  ;;  %v3298_v14 = vld [vmem:[#allocation2 + $0x24] sm:$0xe]  ;;  %v5690_v5 = vld [vmem:[#allocation2 + $0x6c] sm:$0xff]  }
 0x2b1   : > { %v3230_v15 = vsel %vm6690_vm3, %v3225_v4, %v3229_v61  ;;  %v4574_v28 = vcombine.low %v1622_v26, %v1625_v17  ;;  %v3347_v30 = vrot.slane %v3345_v21, 4  ;;  %v3232_v31 = vshrl.u32 %v3060_v11, 16  ;;  %v3301_v13 = vld [vmem:[#allocation2 + $0x30] sm:$0xe]  ;;  %v3304_v26 = vld [vmem:[#allocation2 + $0x3c] sm:$0xe] }
 0x2b2   : > { %v4670_v24 = vcombine.low %v3220_v7, %v3230_v15  ;;  %5203 = vmatmul.mubr.bf16.gmra.mrb[16].mxu1 %v4573_v16  ;;  %v3235_v35 = vshll.u32 %v3060_v11, 16  ;;  %v3241_v37 = vshll.u32 %v3061_v22, 16  ;;  %v3245_v38 = vshrl.u32 %v3061_v22, 16  ;;  %v3308_v7 = vld [vmem:[#allocation2 + $0x4c] sm:$0xf] }
 0x2b3   : > { %5219 = vmatpush3.bf16.msra.mxu1 %v5685_v12  ;;  %v3251_v40 = vshll.u32 %v3062_v25, 16  ;;  %5206 = vmatprep.mubr.bf16.mxu1 %v4574_v28  ;;  %v4567_v41 = vrot.slane %v1547_v63, 9  ;;  %v1632_v42 = vsel %vm6664_vm14, %v1630_v51, %v1631_v29  ;;  %v3348_v44 = vrot.slane %v3297_v27, 5  ;;  %v3306_v22 = vld [vmem:[#allocation2 + $0x44] sm:$0x1] }
 0x2b4   : > { %3736 = vmatprep.mubr.bf16.mxu0 %v4670_v24  ;;  %5220 = vmatprep.subr.bf16.mxu1 %v5686_v20  ;;  %v3234_v45 = vrot.slane %v3232_v31, 4  ;;  %v3237_v46 = vrot.slane %v3235_v35, 5  ;;  %v3243_v48 = vrot.slane %v3241_v37, 5  ;;  %v3247_v50 = vrot.slane %v3245_v38, 4  ;;  %v5700_v25 = vld [vmem:[%s6490_s17] sm:$0xff]  }
 0x2b5   : > { %3737 = vmatmul.mubr.bf16.gmra.mrb[72].mxu0 %v5687_v19  ;;  %v3352_v52 = vrot.slane %v6898_v32, 5  ;;  %v1629_v43 = vsel %vm6664_vm14, %v4567_v41, %v1628_v62  ;;  %v4672_v53 = vrot.slane %v3295_v34, 9  ;;  %v3349_v54 = vsel %vm6664_vm14, %v3347_v30, %v3348_v44  ;;  %v3305_v62 = vld [vmem:[#allocation2 + $0x40] sm:$0xf]  ;;  %v3309_v27 = vld [vmem:[#allocation2 + $0x50] sm:$0x1] }
 0x2b6   : > { %v3238_v55 = vor.u32 %v3237_v46, %v3234_v45  ;;  %v3248_v18 = vor.u32 %v3247_v50, %v3243_v48  ;;  %v3253_v12 = vrot.slane %v3251_v40, 5  ;;  %v3359_v56 = vrot.slane %v3302_v39, 5  ;;  %v3307_v28 = vld [vmem:[#allocation2 + $0x48] sm:$0xe]  ;;  %v3311_v29 = vld [vmem:[#allocation2 + $0x58] sm:$0xf] }
 0x2b7   : > { %5221 = vmatpush3.bf16.msra.mxu1 %v5686_v20  ;;  %v4575_v33 = vcombine.low %v1629_v43, %v1632_v42  ;;  %v3346_v57 = vsel %vm6664_vm14, %v4672_v53, %v3345_v21  ;;  %v3354_v49 = vrot.slane %v3352_v52, 4  ;;  %v3355_v6 = vrot.slane %v3300_v59, 5  ;;  %v3314_v31 = vld [vmem:[#allocation2 + $0x64] sm:$0xf]  ;;  %v3929_v32 = vld [vmem:[#allocation15] sm:$0x3] }
 0x2b8   : > { %5222 = vmatprep.subr.bf16.mxu1 %v5688_v23  ;;  %v4680_v0 = vcombine.low %v3346_v57, %v3349_v54  ;;  %v3239_v60 = vrot.slane %v3238_v55, 4  ;;  %v3249_v61 = vrot.slane %v3248_v18, 4  ;;  %v3361_v2 = vrot.slane %v3359_v56, 4  ;;  %5405 = vmatprep.subr.msk.bf16.mxu0 %vm541_vm1, %v3929_v32  ;;  %v3312_v46 = vld [vmem:[#allocation2 + $0x5c] sm:$0x1]  ;;  %v5701_v43 = vld [vmem:[%s6490_s17 + $0x8] sm:$0xff]  }
 0x2b9   : > { %v3362_v9 = vrot.slane %v3303_v1, 5  ;;  %v4673_v10 = vrot.slane %v3298_v14, 9  ;;  %v3356_v51 = vsel %vm6664_vm14, %v3354_v49, %v3355_v6  ;;  %v3366_v11 = vrot.slane %v3305_v62, 5  ;;  %v3310_v53 = vld [vmem:[#allocation2 + $0x54] sm:$0xe]  ;;  %v5703_v6 = vld [vmem:[%s6490_s17 + $0x18] sm:$0xff]  }
 0x2ba   : > { %5207 = vmatmul.mubr.bf16.gmra.mrb[20].mxu1 %v4575_v33  ;;  %v3244_v3 = vsel %vm6690_vm3, %v3239_v60, %v3243_v48  ;;  %v3254_v4 = vsel %vm6690_vm3, %v3249_v61, %v3253_v12  ;;  %v4674_v15 = vrot.slane %v3301_v13, 9  ;;  %v3373_v47 = vrot.slane %v3308_v7, 5  ;;  %v3317_v55 = vld [vmem:[#allocation2 + $0x70] sm:$0xf]  ;;  %v3316_v61 = vld [vmem:[#allocation2 + $0x6c] sm:$0xe] }
 0x2bb   : > { %5223 = vmatpush3.bf16.msra.mxu1 %v5688_v23  ;;  %5226 = vmatprep.mubr.bf16.mxu1 %v4680_v0  ;;  %v4671_v8 = vcombine.low %v3244_v3, %v3254_v4  ;;  %v3363_v16 = vsel %vm6664_vm14, %v3361_v2, %v3362_v9  ;;  %v3353_v17 = vsel %vm6664_vm14, %v4673_v10, %v3352_v52  ;;  %v3368_v63 = vrot.slane %v3366_v11, 4  ;;  %v3315_v52 = vld [vmem:[#allocation2 + $0x68] sm:$0x1]  ;;  %v5702_v18 = vld [vmem:[%s6490_s17 + $0x10] sm:$0xff]   ;;  %v5704_v13 = vld [vmem:[%s6490_s17 + $0x20] sm:$0xff]  }
 0x2bc   : > { %5224 = vmatprep.subr.bf16.mxu1 %v5689_v58  ;;  %v4681_v20 = vcombine.low %v3353_v17, %v3356_v51  ;;  %v3360_v21 = vsel %vm6664_vm14, %v4674_v15, %v3359_v56  ;;  %v3375_v19 = vrot.slane %v3373_v47, 4  ;;  %v3369_v30 = vrot.slane %v3306_v22, 5  ;;  %v3313_v56 = vld [vmem:[#allocation2 + $0x60] sm:$0xe]  ;;  %v3318_v49 = vld [vmem:[#allocation2 + $0x74] sm:$0x1] }
 0x2bd   : > { %3744 = vmatprep.mubr.bf16.mxu0 %v4671_v8  ;;  %v4682_v24 = vcombine.low %v3360_v21, %v3363_v16  ;;  %v3376_v34 = vrot.slane %v3309_v27, 5  ;;  %v4675_v35 = vrot.slane %v3304_v26, 9  ;;  %v3380_v38 = vrot.slane %v3311_v29, 5  ;;  %v5705_v10 = vld [vmem:[%s6490_s17 + $0x28] sm:$0xff]   ;;  %v5706_v51 = vld [vmem:[%s6490_s17 + $0x30] sm:$0xff]   ;;  %v5691_v15 = vld [vmem:[#allocation13] sm:$0xff]  }
 0x2be   : > { %3745 = vmatmul.mubr.bf16.gmra.mrb[76].mxu0 %v5690_v5  ;;  %v3370_v37 = vsel %vm6664_vm14, %v3368_v63, %v3369_v30  ;;  %v3931_v40 = vsel %vm541_vm1, %v3929_v32, 0  ;;  %v4676_v23 = vrot.slane %v3307_v28, 9  ;;  %v3387_v42 = vrot.slane %v3314_v31, 5  ;;  %v5692_v16 = vld [vmem:[#allocation13 + $0x8] sm:$0xff]   ;;  %v5697_v32 = vld [vmem:[#allocation13 + $0x30] sm:$0xff]  }
 0x2bf   : > { %5225 = vmatpush3.bf16.msra.mxu1 %v5689_v58  ;;  %5244 = vmatprep.mubr.msk.bf16.mxu0 %vm516_vm2, %v5700_v25  ;;  %v3377_v41 = vsel %vm6664_vm14, %v3375_v19, %v3376_v34  ;;  %v3367_v44 = vsel %vm6664_vm14, %v4675_v35, %v3366_v11  ;;  %v3382_v50 = vrot.slane %v3380_v38, 4  ;;  %v3383_v12 = vrot.slane %v3312_v46, 5  ;;  %v5707_v11 = vld [vmem:[%s6490_s17 + $0x38] sm:$0xff]   ;;  %v5696_v29 = vld [vmem:[#allocation13 + $0x28] sm:$0xff]   ;;  %s427_s17 = sand.u32 1, %s6036_s28  }
 0x2c0   : > { %5243 = vmatpush3.bf16.msra.mxu0 %v3931_v40  ;;  %v4683_v45 = vcombine.low %v3367_v44, %v3370_v37  ;;  %v3374_v39 = vsel %vm6664_vm14, %v4676_v23, %v3373_v47  ;;  %v3389_v54 = vrot.slane %v3387_v42, 4  ;;  %v3390_v33 = vrot.slane %v3315_v52, 5  ;;  %5292 = vmatprep.subr.bf16.mxu1 %v5691_v15  ;;  %v5694_v47 = vld [vmem:[#allocation13 + $0x18] sm:$0xff]   ;;  %s4494_s21 = sshll.u32 %s427_s17, 6  ;;  %s7086_s8 = scalar_lea.sflag [#allocation6], %s427_s17 }
 0x2c1   : > { %v4684_v48 = vcombine.low %v3374_v39, %v3377_v41  ;;  %v4677_v57 = vrot.slane %v3310_v53, 9  ;;  %v3384_v58 = vsel %vm6664_vm14, %v3382_v50, %v3383_v12  ;;  %v3394_v59 = vrot.slane %v3317_v55, 5  ;;  %5260 = vmatprep.subr.bf16.mxu0 %v5691_v15  ;;  %v5698_v40 = vld [vmem:[#allocation13 + $0x38] sm:$0xff]   ;;  %s7049_s16 = scalar_lea.vmem [#allocation18], %s4494_s21 }
 0x2c2   : > { %5227 = vmatmul.mubr.bf16.vlgmr.msra.gmra.mrb[8].mxu1 %v4681_v20  ;;  %v4678_v0 = vrot.slane %v3313_v56, 9  ;;  %v3391_v60 = vsel %vm6664_vm14, %v3389_v54, %v3390_v33  ;;  %v4679_v3 = vrot.slane %v3316_v61, 9  ;;  %v3397_v5 = vrot.slane %v3318_v49, 5  ;;  %s4311_s4 = sshll.u32 %s7049_s16, 4  ;;  %s7075_s4 = int_to_ptr.vmem [resolvable:$true] %s4311_s4 }
 0x2c3   : > { %5230 = vmatprep.mubr.bf16.mxu1 %v4682_v24  ;;  %v3381_v1 = vsel %vm6664_vm14, %v4677_v57, %v3380_v38  ;;  %v3396_v4 = vrot.slane %v3394_v59, 4  ;;  %5300 = vmatpush3.bf16.msra.mxu1 %v5691_v15  ;;  %v5695_v24 = vld [vmem:[#allocation13 + $0x20] sm:$0xff]   ;;  %s5934_s21 = scalar_lea.vmem %s7075_s4, 1024  ;;  %p5941_p13 = scmp.lt.s32.totalorder %s7075_s4, %s5939_s30 }
 0x2c4   : > { %v4685_v14 = vcombine.low %v3381_v1, %v3384_v58  ;;  %v3388_v2 = vsel %vm6664_vm14, %v4678_v0, %v3387_v42  ;;  %v3395_v7 = vsel %vm6664_vm14, %v4679_v3, %v3394_v59  ;;  %5293 = vmatprep.subr.bf16.mxu1 %v5692_v16  ;;  %p5935_p6 = scmp.ne.s32.totalorder %s7075_s4, %s5934_s21  ;;  %p5942_p0 = scmp.lt.s32.totalorder %s5940_s0, %s5934_s21 }
 0x2c5   : > { %v4686_v62 = vcombine.low %v3388_v2, %v3391_v60  ;;  %v3398_v8 = vsel %vm6664_vm14, %v3396_v4, %v3397_v5 }
 0x2c6   : > { %5245 = vmatmul.mubr.msk.bf16.vlgmr.msra.gmra.mrb[80].mxu0 %vm516_vm2, %v5701_v43  ;;  %v4687_v9 = vcombine.low %v3395_v7, %v3398_v8  ;;  %p5936_p11 = pnand %p5935_p6, %p7218_p1  ;;  %p5943_p3 = por %p5942_p0, %p5941_p13 }
 0x2c7   : > { %5248 = vmatprep.mubr.msk.bf16.mxu0 %vm516_vm2, %v5702_v18  ;;  %5261 = vmatpush3.bf16.msra.mxu0 %v5691_v15 }
 0x2c8   : > { %5262 = vmatprep.subr.bf16.mxu0 %v5692_v16  ;;  %5301 = vmatpush3.bf16.msra.mxu1 %v5692_v16  ;;  %p5937_p9 = pneg %p5936_p11 }
 0x2c9   : > { %5294 = vmatprep.subr.bf16.mxu1 %v5693_v36 }
 0x2ca   : > { %5231 = vmatmul.mubr.bf16.gmra.mrb[12].mxu1 %v4683_v45  ;;  %p5944_p4 = pnand %p5943_p3, %p5937_p9 }
 0x2cb   : > { %5234 = vmatprep.mubr.bf16.mxu1 %v4684_v48  ;;  %5263 = vmatpush3.bf16.msra.mxu0 %v5692_v16 }
 0x2cc   : > { %5264 = vmatprep.subr.bf16.mxu0 %v5693_v36  ;;  %5302 = vmatpush3.bf16.msra.mxu1 %v5693_v36 }
 0x2cd   : > { %5295 = vmatprep.subr.bf16.mxu1 %v5694_v47 }
 0x2ce   : > { %5249 = vmatmul.mubr.msk.bf16.gmra.mrb[84].mxu0 %vm516_vm2, %v5703_v6 }
 0x2cf   : > { %5252 = vmatprep.mubr.msk.bf16.mxu0 %vm516_vm2, %v5704_v13  ;;  %5265 = vmatpush3.bf16.msra.mxu0 %v5693_v36 }
 0x2d0   : > { %5266 = vmatprep.subr.bf16.mxu0 %v5694_v47  ;;  %5303 = vmatpush3.bf16.msra.mxu1 %v5694_v47 }
 0x2d1   : > { %5296 = vmatprep.subr.bf16.mxu1 %v5695_v24 }
 0x2d2   : > { %5235 = vmatmul.mubr.bf16.gmra.mrb[16].mxu1 %v4685_v14 }
 0x2d3   : > { %5238 = vmatprep.mubr.bf16.mxu1 %v4686_v62  ;;  %5267 = vmatpush3.bf16.msra.mxu0 %v5694_v47 }
 0x2d4   : > { %5268 = vmatprep.subr.bf16.mxu0 %v5695_v24  ;;  %5304 = vmatpush3.bf16.msra.mxu1 %v5695_v24 }
 0x2d5   : > { %5297 = vmatprep.subr.bf16.mxu1 %v5696_v29 }
 0x2d6   : > { %5253 = vmatmul.mubr.msk.bf16.gmra.mrb[88].mxu0 %vm516_vm2, %v5705_v10 }
 0x2d7   : > { %5256 = vmatprep.mubr.msk.bf16.mxu0 %vm516_vm2, %v5706_v51  ;;  %5269 = vmatpush3.bf16.msra.mxu0 %v5695_v24 }
 0x2d8   : > { %5270 = vmatprep.subr.bf16.mxu0 %v5696_v29  ;;  %5305 = vmatpush3.bf16.msra.mxu1 %v5696_v29 }
 0x2d9   : > { %5298 = vmatprep.subr.bf16.mxu1 %v5697_v32 }
 0x2da   : > { %5239 = vmatmul.mubr.bf16.gmra.mrb[20].mxu1 %v4687_v9 }
 0x2db   : > { %5271 = vmatpush3.bf16.msra.mxu0 %v5696_v29 }
 0x2dc   : > { %5272 = vmatprep.subr.bf16.mxu0 %v5697_v32  ;;  %5306 = vmatpush3.bf16.msra.mxu1 %v5697_v32 }
 0x2dd   : > { %5299 = vmatprep.subr.bf16.mxu1 %v5698_v40 }
 0x2de   : > { %5257 = vmatmul.mubr.msk.bf16.gmra.mrb[92].mxu0 %vm516_vm2, %v5707_v11 }
 0x2df   : > { %5273 = vmatpush3.bf16.msra.mxu0 %v5697_v32 }
 0x2e0   : > { %5274 = vmatprep.subr.bf16.mxu0 %v5698_v40  ;;  %5307 = vmatpush3.bf16.msra.mxu1 %v5698_v40 }
 0x2e3   : > { %5275 = vmatpush3.bf16.msra.mxu0 %v5698_v40 }
 0x312   : > { %v4867_v17 = vpop.f32.mrb[16].mxu0 }
 0x313   : > { %v4868_v20 = vpop.f32.mrb[17].mxu0 }
 0x314   : > { %v4869_v21 = vadd.f32 %v4868_v20, %v4867_v17  ;;  %v4870_v22 = vpop.f32.mrb[18].mxu0 }
 0x315   : > { %v4871_v25 = vpop.f32.mrb[19].mxu0 }
 0x316   : > { %v4872_v26 = vadd.f32 %v4871_v25, %v4870_v22 }
 0x31a   : > { %v4873_v63 = vpop.f32.mrb[20].mxu0 }
 0x31b   : > { %v4874_v27 = vpop.f32.mrb[21].mxu0 }
 0x31c   : > { %v4875_v28 = vadd.f32 %v4874_v27, %v4873_v63  ;;  %v4876_v19 = vpop.f32.mrb[22].mxu0 }
 0x31d   : > { %v4877_v30 = vpop.f32.mrb[23].mxu0 }
 0x31e   : > { %v4878_v31 = vadd.f32 %v4877_v30, %v4876_v19 }
 0x322   : > { %v4879_v34 = vpop.f32.mrb[24].mxu0 }
 0x323   : > { %v4880_v35 = vpop.f32.mrb[25].mxu0 }
 0x324   : > { %v4881_v37 = vadd.f32 %v4880_v35, %v4879_v34  ;;  %v4882_v38 = vpop.f32.mrb[26].mxu0 }
 0x325   : > { %v4883_v23 = vpop.f32.mrb[27].mxu0 }
 0x326   : > { %v4884_v41 = vadd.f32 %v4883_v23, %v4882_v38 }
 0x32a   : > { %v4885_v42 = vpop.f32.mrb[28].mxu0 }
 0x32b   : > { %v4886_v44 = vpop.f32.mrb[29].mxu0 }
 0x32c   : > { %v4887_v45 = vadd.f32 %v4886_v44, %v4885_v42  ;;  %v4888_v39 = vpop.f32.mrb[30].mxu0 }
 0x32d   : > { %v4889_v46 = vpop.f32.mrb[31].mxu0  ;;  %v4947_v48 = vpop.f32.mrb[24].mxu1 }
 0x32e   : > { %v4890_v50 = vadd.f32 %v4889_v46, %v4888_v39  ;;  %v4948_v52 = vpop.f32.mrb[25].mxu1 }
 0x32f   : > { %v4949_v43 = vadd.f32 %v4948_v52, %v4947_v48  ;;  %v4950_v53 = vpop.f32.mrb[26].mxu1 }
 0x330   : > { %v4951_v54 = vpop.f32.mrb[27].mxu1 }
 0x331   : > { %v6959_v55 = vadd.f32 %v4949_v43, %v4869_v21  ;;  %v4952_v18 = vadd.f32 %v4951_v54, %v4950_v53 }
 0x332   : > { %v4891_v12 = vpop.f32.mrb[32].mxu0 }
 0x333   : > { %v6961_v56 = vadd.f32 %v4952_v18, %v4872_v26  ;;  %v4892_v33 = vpop.f32.mrb[33].mxu0 }
 0x334   : > { %v4893_v57 = vadd.f32 %v4892_v33, %v4891_v12  ;;  %v4894_v58 = vpop.f32.mrb[34].mxu0 }
 0x335   : > { %v4895_v59 = vpop.f32.mrb[35].mxu0  ;;  %v4953_v0 = vpop.f32.mrb[28].mxu1 }
 0x336   : > { %v4896_v60 = vadd.f32 %v4895_v59, %v4894_v58  ;;  %v4954_v61 = vpop.f32.mrb[29].mxu1 }
 0x337   : > { %v4955_v49 = vadd.f32 %v4954_v61, %v4953_v0  ;;  %v4956_v1 = vpop.f32.mrb[30].mxu1 }
 0x338   : > { %v4957_v14 = vpop.f32.mrb[31].mxu1 }
 0x339   : > { %v6963_v2 = vadd.f32 %v4955_v49, %v4875_v28  ;;  %v4958_v62 = vadd.f32 %v4957_v14, %v4956_v1 }
 0x33a   : > { %v4897_v3 = vpop.f32.mrb[36].mxu0 }
 0x33b   : > { %v6965_v4 = vadd.f32 %v4958_v62, %v4878_v31  ;;  %v4898_v5 = vpop.f32.mrb[37].mxu0 }
 0x33c   : > { %v4899_v6 = vadd.f32 %v4898_v5, %v4897_v3  ;;  %v4900_v13 = vpop.f32.mrb[38].mxu0 }
 0x33d   : > { %v4901_v7 = vpop.f32.mrb[39].mxu0  ;;  %v4959_v8 = vpop.f32.mrb[32].mxu1 }
 0x33e   : > { %v4902_v9 = vadd.f32 %v4901_v7, %v4900_v13  ;;  %v4960_v10 = vpop.f32.mrb[33].mxu1 }
 0x33f   : > { %v4961_v51 = vadd.f32 %v4960_v10, %v4959_v8  ;;  %v4962_v11 = vpop.f32.mrb[34].mxu1 }
 0x340   : > { %v4963_v15 = vpop.f32.mrb[35].mxu1 }
 0x341   : > { %v6967_v16 = vadd.f32 %v4961_v51, %v4881_v37  ;;  %v4964_v36 = vadd.f32 %v4963_v15, %v4962_v11 }
 0x342   : > { %v4903_v47 = vpop.f32.mrb[40].mxu0 }
 0x343   : > { %v6969_v17 = vadd.f32 %v4964_v36, %v4884_v41  ;;  %v4904_v20 = vpop.f32.mrb[41].mxu0 }
 0x344   : > { %v4905_v21 = vadd.f32 %v4904_v20, %v4903_v47  ;;  %v4906_v22 = vpop.f32.mrb[42].mxu0 }
 0x345   : > { %v4907_v25 = vpop.f32.mrb[43].mxu0  ;;  %v4965_v24 = vpop.f32.mrb[36].mxu1 }
 0x346   : > { %v4908_v26 = vadd.f32 %v4907_v25, %v4906_v22  ;;  %v4966_v63 = vpop.f32.mrb[37].mxu1 }
 0x347   : > { %v4967_v27 = vadd.f32 %v4966_v63, %v4965_v24  ;;  %v4968_v28 = vpop.f32.mrb[38].mxu1 }
 0x348   : > { %v4969_v19 = vpop.f32.mrb[39].mxu1 }
 0x349   : > { %v6971_v29 = vadd.f32 %v4967_v27, %v4887_v45  ;;  %v4970_v30 = vadd.f32 %v4969_v19, %v4968_v28 }
 0x34a   : > { %v4909_v31 = vpop.f32.mrb[44].mxu0 }
 0x34b   : > { %v6973_v32 = vadd.f32 %v4970_v30, %v4890_v50  ;;  %v4910_v34 = vpop.f32.mrb[45].mxu0 }
 0x34c   : > { %v4911_v35 = vadd.f32 %v4910_v34, %v4909_v31  ;;  %v4912_v37 = vpop.f32.mrb[46].mxu0 }
 0x34d   : > { %v4913_v38 = vpop.f32.mrb[47].mxu0 }
 0x34e   : > { %v4914_v40 = vadd.f32 %v4913_v38, %v4912_v37  ;;  %v4971_v23 = vpop.f32.mrb[40].mxu1 }
 0x34f   : > { %v4972_v41 = vpop.f32.mrb[41].mxu1 }
 0x350   : > { %v4973_v42 = vadd.f32 %v4972_v41, %v4971_v23  ;;  %v4974_v44 = vpop.f32.mrb[42].mxu1 }
 0x351   : > { %v4975_v39 = vpop.f32.mrb[43].mxu1 }
 0x352   : > { %v6975_v46 = vadd.f32 %v4973_v42, %v4893_v57  ;;  %v4976_v48 = vadd.f32 %v4975_v39, %v4974_v44 }
 0x353   : > { %v5027_v52 = vpop.f32.mrb[48].mxu0 }
 0x354   : > { %v5028_v45 = vpop.f32.mrb[49].mxu0  ;;  %v5341_v43 = vadd.f32 %v4976_v48, %v4896_v60 }
 0x355   : > { %v5029_v53 = vadd.f32 %v5028_v45, %v5027_v52  ;;  %v5030_v54 = vpop.f32.mrb[50].mxu0 }
 0x356   : > { %v5031_v50 = vpop.f32.mrb[51].mxu0  ;;  %v4977_v12 = vpop.f32.mrb[44].mxu1 }
 0x357   : > { %v5032_v18 = vadd.f32 %v5031_v50, %v5030_v54  ;;  %v6978_v33 = vadd.f32 %v6959_v55, %v5029_v53  ;;  %v4978_v58 = vpop.f32.mrb[45].mxu1 }
 0x358   : > { %v4979_v59 = vadd.f32 %v4978_v58, %v4977_v12  ;;  %v4980_v0 = vpop.f32.mrb[46].mxu1 }
 0x359   : > { %v6981_v61 = vadd.f32 %v6961_v56, %v5032_v18  ;;  %v4981_v57 = vpop.f32.mrb[47].mxu1 }
 0x35a   : > { %v5332_v49 = vadd.f32 %v4979_v59, %v4899_v6  ;;  %v4982_v1 = vadd.f32 %v4981_v57, %v4980_v0 }
 0x35b   : > { %v5033_v14 = vpop.f32.mrb[52].mxu0 }
 0x35c   : > { %v5034_v62 = vpop.f32.mrb[53].mxu0  ;;  %v5338_v60 = vadd.f32 %v4982_v1, %v4902_v9 }
 0x35d   : > { %v5035_v3 = vadd.f32 %v5034_v62, %v5033_v14  ;;  %v5036_v5 = vpop.f32.mrb[54].mxu0 }
 0x35e   : > { %v5037_v13 = vpop.f32.mrb[55].mxu0  ;;  %v4983_v8 = vpop.f32.mrb[48].mxu1 }
 0x35f   : > { %v5038_v7 = vadd.f32 %v5037_v13, %v5036_v5  ;;  %v6984_v55 = vadd.f32 %v6963_v2, %v5035_v3  ;;  %v4984_v10 = vpop.f32.mrb[49].mxu1 }
 0x360   : > { %v4985_v51 = vadd.f32 %v4984_v10, %v4983_v8  ;;  %v4986_v11 = vpop.f32.mrb[50].mxu1 }
 0x361   : > { %v6987_v56 = vadd.f32 %v6965_v4, %v5038_v7  ;;  %v4987_v15 = vpop.f32.mrb[51].mxu1 }
 0x362   : > { %v5347_v6 = vadd.f32 %v4985_v51, %v4905_v21  ;;  %v4988_v36 = vadd.f32 %v4987_v15, %v4986_v11  ;;  %v7006_v15 = vld [vmem:[#allocation12] ss:$0 sm:$0xff] }
 0x363   : > { %v5039_v47 = vpop.f32.mrb[56].mxu0 }
 0x364   : > { %v5040_v20 = vpop.f32.mrb[57].mxu0  ;;  %v5353_v9 = vadd.f32 %v4988_v36, %v4908_v26 }
 0x365   : > { %v5041_v22 = vadd.f32 %v5040_v20, %v5039_v47  ;;  %v5042_v25 = vpop.f32.mrb[58].mxu0 }
 0x366   : > { %v5043_v24 = vpop.f32.mrb[59].mxu0 }
 0x367   : > { %v5044_v63 = vadd.f32 %v5043_v24, %v5042_v25  ;;  %v6990_v27 = vadd.f32 %v6967_v16, %v5041_v22 }
 0x368   : > { %v4989_v2 = vpop.f32.mrb[52].mxu1 }
 0x369   : > { %v4990_v28 = vpop.f32.mrb[53].mxu1  ;;  %v6993_v19 = vadd.f32 %v6969_v17, %v5044_v63 }
 0x36a   : > { %v4991_v4 = vadd.f32 %v4990_v28, %v4989_v2  ;;  %v4992_v30 = vpop.f32.mrb[54].mxu1 }
 0x36b   : > { %v4993_v31 = vpop.f32.mrb[55].mxu1 }
 0x36c   : > { %v5344_v21 = vadd.f32 %v4991_v4, %v4911_v35  ;;  %v4994_v34 = vadd.f32 %v4993_v31, %v4992_v30 }
 0x36d   : > { %v5045_v37 = vpop.f32.mrb[60].mxu0 }
 0x36e   : > { %v5350_v38 = vadd.f32 %v4994_v34, %v4914_v40  ;;  %v5046_v26 = vpop.f32.mrb[61].mxu0 }
 0x36f   : > { %v5047_v23 = vadd.f32 %v5046_v26, %v5045_v37  ;;  %v5048_v41 = vpop.f32.mrb[62].mxu0 }
 0x370   : > { %v5049_v42 = vpop.f32.mrb[63].mxu0 }
 0x371   : > { %v5050_v44 = vadd.f32 %v5049_v42, %v5048_v41  ;;  %v5321_v16 = vadd.f32 %v6971_v29, %v5047_v23 }
 0x373   : > { %v5327_v39 = vadd.f32 %v6973_v32, %v5050_v44 }
 0x375   : > { %v5051_v48 = vpop.f32.mrb[64].mxu0 }
 0x376   : > { %v5052_v52 = vpop.f32.mrb[65].mxu0 }
 0x377   : > { %v5053_v17 = vadd.f32 %v5052_v52, %v5051_v48  ;;  %v5054_v45 = vpop.f32.mrb[66].mxu0 }
 0x378   : > { %v5055_v53 = vpop.f32.mrb[67].mxu0 }
 0x379   : > { %v5056_v54 = vadd.f32 %v5055_v53, %v5054_v45  ;;  %v6998_v35 = vadd.f32 %v6975_v46, %v5053_v17 }
 0x37b   : > { %v7000_v50 = vadd.f32 %v5341_v43, %v5056_v54 }
 0x380   : > { %v5057_v40 = vpop.f32.mrb[68].mxu0 }
 0x381   : > { %v5058_v18 = vpop.f32.mrb[69].mxu0 }
 0x382   : > { %v5059_v12 = vadd.f32 %v5058_v18, %v5057_v40  ;;  %v5060_v58 = vpop.f32.mrb[70].mxu0 }
 0x383   : > { %v5061_v59 = vpop.f32.mrb[71].mxu0 }
 0x384   : > { %v5062_v0 = vadd.f32 %v5061_v59, %v5060_v58  ;;  %v5333_v29 = vadd.f32 %v5332_v49, %v5059_v12 }
 0x386   : > { %v5339_v57 = vadd.f32 %v5338_v60, %v5062_v0 }
 0x388   : > { %v5063_v32 = vpop.f32.mrb[72].mxu0 }
 0x389   : > { %v5064_v1 = vpop.f32.mrb[73].mxu0 }
 0x38a   : > { %v5065_v14 = vadd.f32 %v5064_v1, %v5063_v32  ;;  %v5066_v62 = vpop.f32.mrb[74].mxu0 }
 0x38b   : > { %v5067_v3 = vpop.f32.mrb[75].mxu0 }
 0x38c   : > { %v5068_v5 = vadd.f32 %v5067_v3, %v5066_v62  ;;  %v7002_v13 = vadd.f32 %v5347_v6, %v5065_v14 }
 0x38e   : > { %v7004_v46 = vadd.f32 %v5353_v9, %v5068_v5 }
 0x391   : > { %v5069_v43 = vpop.f32.mrb[76].mxu0 }
 0x392   : > { %v5070_v7 = vpop.f32.mrb[77].mxu0 }
 0x393   : > { %v5071_v8 = vadd.f32 %v5070_v7, %v5069_v43  ;;  %v5072_v10 = vpop.f32.mrb[78].mxu0 }
 0x394   : > { %v5073_v51 = vpop.f32.mrb[79].mxu0 }
 0x395   : > { %v5228_v11 = vpop.f32.mrb[8].mxu1  ;;  %v5074_v49 = vadd.f32 %v5073_v51, %v5072_v10  ;;  %v5345_v47 = vadd.f32 %v5344_v21, %v5071_v8 }
 0x396   : > { %v5310_v60 = vadd.f32 %v6984_v55, %v5228_v11  ;;  %v3787_v36 = vpop.f32.mrb[9].mxu1 }
 0x397   : > { %v5313_v20 = vadd.f32 %v6978_v33, %v3787_v36  ;;  %v5229_v22 = vpop.f32.mrb[10].mxu1  ;;  %v5351_v24 = vadd.f32 %v5350_v38, %v5074_v49 }
 0x398   : > { %v3875_v6 = vadd.f32 %v5310_v60, %v7006_v15  ;;  %v5316_v9 = vadd.f32 %v6987_v56, %v5229_v22  ;;  %v3790_v25 = vpop.f32.mrb[11].mxu1 }
 0x399   : > { %v3873_v63 = vadd.f32 %v5313_v20, %v7006_v15  ;;  %v5319_v2 = vadd.f32 %v6981_v61, %v3790_v25 }
 0x39a   : > { %v3876_v28 = vadd.f32 %v5316_v9, %v7006_v15  ;;  %v3891_v55 = vmax.f32 %v3875_v6, 0.0 }
 0x39b   : > { %v3874_v4 = vadd.f32 %v5319_v2, %v7006_v15  ;;  %v3889_v31 = vmax.f32 %v3873_v63, 0.0 }
 0x39c   : > { %v3892_v30 = vmax.f32 %v3876_v28, 0.0 }
 0x39d   : > { %v3890_v21 = vmax.f32 %v3874_v4, 0.0  ;;  %v5232_v33 = vpop.f32.mrb[12].mxu1 }
 0x39e   : > { %v3906_v34 = vpack.c.bf16 %v3892_v30, %v3891_v55  ;;  %v5322_v37 = vadd.f32 %v5321_v16, %v5232_v33  ;;  %v3803_v26 = vpop.f32.mrb[13].mxu1  ;;  %v7040_v30 = vld [vmem:[#allocation16] ss:$0 sm:$0xff] }
 0x39f   : > { %v5325_v56 = vadd.f32 %v6990_v27, %v3803_v26  ;;  %v5233_v23 = vpop.f32.mrb[14].mxu1  ;;  %v3905_v38 = vpack.c.bf16 %v3890_v21, %v3889_v31 }
 0x3a0   : > { %v3879_v41 = vadd.f32 %v5322_v37, %v7006_v15  ;;  %v5328_v42 = vadd.f32 %v5327_v39, %v5233_v23  ;;  %v3806_v61 = vpop.f32.mrb[15].mxu1 }
 0x3a1   : > { %v3877_v44 = vadd.f32 %v5325_v56, %v7006_v15  ;;  %v5331_v48 = vadd.f32 %v6993_v19, %v3806_v61  ;;  %5276 = vmatprep.mubr.bf16.mxu0 %v3905_v38 }
 0x3a2   : > { %v3880_v52 = vadd.f32 %v5328_v42, %v7006_v15  ;;  %5277 = vmatmul.mubr.bf16.vlgmr.msra.gmra.mrb[80].mxu0 %v3906_v34  ;;  %v3895_v16 = vmax.f32 %v3879_v41, 0.0 }
 0x3a3   : > { %v3878_v17 = vadd.f32 %v5331_v48, %v7006_v15  ;;  %v3893_v53 = vmax.f32 %v3877_v44, 0.0 }
 0x3a4   : > { %v3896_v45 = vmax.f32 %v3880_v52, 0.0 }
 0x3a5   : > { %v3894_v27 = vmax.f32 %v3878_v17, 0.0  ;;  %v5236_v54 = vpop.f32.mrb[16].mxu1 }
 0x3a6   : > { %v5334_v40 = vadd.f32 %v5333_v29, %v5236_v54  ;;  %v3819_v18 = vpop.f32.mrb[17].mxu1  ;;  %v3908_v12 = vpack.c.bf16 %v3896_v45, %v3895_v16 }
 0x3a7   : > { %v5337_v39 = vadd.f32 %v6998_v35, %v3819_v18  ;;  %v5237_v58 = vpop.f32.mrb[18].mxu1  ;;  %v3907_v59 = vpack.c.bf16 %v3894_v27, %v3893_v53 }
 0x3a8   : > { %v3883_v19 = vadd.f32 %v5334_v40, %v7006_v15  ;;  %v5340_v0 = vadd.f32 %v5339_v57, %v5237_v58  ;;  %v3822_v32 = vpop.f32.mrb[19].mxu1 }
 0x3a9   : > { %v3881_v1 = vadd.f32 %v5337_v39, %v7006_v15  ;;  %v5343_v14 = vadd.f32 %v7000_v50, %v3822_v32  ;;  %5280 = vmatprep.mubr.bf16.mxu0 %v3907_v59 }
 0x3aa   : > { %v3884_v62 = vadd.f32 %v5340_v0, %v7006_v15  ;;  %5281 = vmatmul.mubr.bf16.gmra.mrb[84].mxu0 %v3908_v12  ;;  %v3899_v3 = vmax.f32 %v3883_v19, 0.0 }
 0x3ab   : > { %v3882_v29 = vadd.f32 %v5343_v14, %v7006_v15  ;;  %v3897_v43 = vmax.f32 %v3881_v1, 0.0 }
 0x3ac   : > { %v3900_v5 = vmax.f32 %v3884_v62, 0.0 }
 0x3ad   : > { %v3898_v35 = vmax.f32 %v3882_v29, 0.0  ;;  %v5240_v7 = vpop.f32.mrb[20].mxu1 }
 0x3ae   : > { %v5346_v8 = vadd.f32 %v5345_v47, %v5240_v7  ;;  %v3835_v10 = vpop.f32.mrb[21].mxu1  ;;  %v3910_v51 = vpack.c.bf16 %v3900_v5, %v3899_v3 }
 0x3af   : > { %v5349_v57 = vadd.f32 %v7002_v13, %v3835_v10  ;;  %v5241_v11 = vpop.f32.mrb[22].mxu1  ;;  %v3909_v49 = vpack.c.bf16 %v3898_v35, %v3897_v43 }
 0x3b0   : > { %v3887_v50 = vadd.f32 %v5346_v8, %v7006_v15  ;;  %v5352_v60 = vadd.f32 %v5351_v24, %v5241_v11  ;;  %v3838_v36 = vpop.f32.mrb[23].mxu1 }
 0x3b1   : > { %v3885_v20 = vadd.f32 %v5349_v57, %v7006_v15  ;;  %v5355_v22 = vadd.f32 %v7004_v46, %v3838_v36  ;;  %5284 = vmatprep.mubr.bf16.mxu0 %v3909_v49  ;;  %v5258_v13 = vpop.f32.mrb[92].mxu0 }
 0x3b2   : > { %v3888_v6 = vadd.f32 %v5352_v60, %v7006_v15  ;;  %5285 = vmatmul.mubr.bf16.gmra.mrb[88].mxu0 %v3910_v51  ;;  %v3903_v9 = vmax.f32 %v3887_v50, 0.0  ;;  %v7034_v28 = vpop.f32.mrb[93].mxu0 }
 0x3b3   : > { %v3886_v47 = vadd.f32 %v5355_v22, %v7006_v15  ;;  %v3901_v63 = vmax.f32 %v3885_v20, 0.0  ;;  %v7036_v4 = vpop.f32.mrb[94].mxu0 }
 0x3b4   : > { %v3904_v25 = vmax.f32 %v3888_v6, 0.0  ;;  %v7038_v46 = vpop.f32.mrb[95].mxu0 }
 0x3b5   : > { %v3902_v2 = vmax.f32 %v3886_v47, 0.0 }
 0x3b6   : > { %v3912_v24 = vpack.c.bf16 %v3904_v25, %v3903_v9 }
 0x3b7   : > { %v3911_v55 = vpack.c.bf16 %v3902_v2, %v3901_v63 }
 0x3b9   : > { %5288 = vmatprep.mubr.bf16.mxu1 %v3911_v55 }
 0x3ba   : > { %5289 = vmatmul.mubr.bf16.vlgmr.msra.gmra.mrb[56].mxu1 %v3912_v24 }
 0x475   : > { %v5278_v31 = vpop.f32.mrb[80].mxu0 }
 0x476   : > { %v4184_v15 = vadd.f32 %v5278_v31, %v7040_v30  ;;  %v4112_v21 = vpop.f32.mrb[81].mxu0 }
 0x477   : > { %v4182_v33 = vadd.f32 %v7040_v30, %v4112_v21  ;;  %v5279_v34 = vpop.f32.mrb[82].mxu0 }
 0x478   : > { %v4185_v37 = vadd.f32 %v5279_v34, %v7040_v30  ;;  %v4115_v26 = vpop.f32.mrb[83].mxu0  ;;  %v4200_v23 = vmax.f32 %v4184_v15, 0.0 }
 0x479   : > { %v4183_v56 = vadd.f32 %v7040_v30, %v4115_v26  ;;  %v4198_v41 = vmax.f32 %v4182_v33, 0.0 }
 0x47a   : > { %v4201_v38 = vmax.f32 %v4185_v37, 0.0 }
 0x47b   : > { %v4199_v42 = vmax.f32 %v4183_v56, 0.0 }
 0x47c   : > { %v4799_v61 = vpack.c.bf16 %v4201_v38, %v4200_v23 }
 0x47d   : > { %v4794_v44 = vpack.c.bf16 %v4199_v42, %v4198_v41  ;;  %v5282_v48 = vpop.f32.mrb[84].mxu0 }
 0x47e   : > { %4831 = vst [vmem:[%s7049_s16 + $0x8] sm:$0xff] %v4799_v61   ;;  %v4188_v52 = vadd.f32 %v5282_v48, %v7040_v30  ;;  %v4128_v17 = vpop.f32.mrb[85].mxu0 }
 0x47f   : > { %4795 = vst [vmem:[%s7049_s16] sm:$0xff] %v4794_v44   ;;  %v4186_v16 = vadd.f32 %v7040_v30, %v4128_v17  ;;  %v5283_v45 = vpop.f32.mrb[86].mxu0 }
 0x480   : > { %v4189_v53 = vadd.f32 %v5283_v45, %v7040_v30  ;;  %v4131_v27 = vpop.f32.mrb[87].mxu0  ;;  %v4204_v40 = vmax.f32 %v4188_v52, 0.0 }
 0x481   : > { %v4187_v54 = vadd.f32 %v7040_v30, %v4131_v27  ;;  %v4202_v12 = vmax.f32 %v4186_v16, 0.0 }
 0x482   : > { %v4205_v18 = vmax.f32 %v4189_v53, 0.0 }
 0x483   : > { %v4203_v39 = vmax.f32 %v4187_v54, 0.0 }
 0x484   : > { %v4809_v58 = vpack.c.bf16 %v4205_v18, %v4204_v40 }
 0x485   : > { %v4804_v59 = vpack.c.bf16 %v4203_v39, %v4202_v12  ;;  %v5286_v19 = vpop.f32.mrb[88].mxu0 }
 0x486   : > { %4833 = vst [vmem:[%s7049_s16 + $0x18] sm:$0xff] %v4809_v58   ;;  %v4192_v0 = vadd.f32 %v5286_v19, %v7040_v30  ;;  %v4144_v32 = vpop.f32.mrb[89].mxu0 }
 0x487   : > { %4832 = vst [vmem:[%s7049_s16 + $0x10] sm:$0xff] %v4804_v59   ;;  %v4190_v1 = vadd.f32 %v7040_v30, %v4144_v32  ;;  %v5287_v14 = vpop.f32.mrb[90].mxu0 }
 0x488   : > { %v4193_v62 = vadd.f32 %v5287_v14, %v7040_v30  ;;  %v4147_v29 = vpop.f32.mrb[91].mxu0  ;;  %v4208_v5 = vmax.f32 %v4192_v0, 0.0 }
 0x489   : > { %v4191_v3 = vadd.f32 %v7040_v30, %v4147_v29  ;;  %v4206_v35 = vmax.f32 %v4190_v1, 0.0 }
 0x48a   : > { %v4209_v43 = vmax.f32 %v4193_v62, 0.0 }
 0x48b   : > { %v4207_v7 = vmax.f32 %v4191_v3, 0.0 }
 0x48c   : > { %v4819_v8 = vpack.c.bf16 %v4209_v43, %v4208_v5 }
 0x48d   : > { %v4814_v10 = vpack.c.bf16 %v4207_v7, %v4206_v35  ;;  %v5290_v51 = vpop.f32.mrb[56].mxu1 }
 0x48e   : > { %4835 = vst [vmem:[%s7049_s16 + $0x28] sm:$0xff] %v4819_v8   ;;  %v4169_v57 = vadd.f32 %v5290_v51, %v5258_v13  ;;  %v4160_v11 = vpop.f32.mrb[57].mxu1 }
 0x48f   : > { %4834 = vst [vmem:[%s7049_s16 + $0x20] sm:$0xff] %v4814_v10   ;;  %v4161_v49 = vadd.f32 %v4160_v11, %v7034_v28  ;;  %v5291_v50 = vpop.f32.mrb[58].mxu1 }
 0x490   : > { %v4196_v60 = vadd.f32 %v7040_v30, %v4169_v57  ;;  %v4172_v36 = vadd.f32 %v5291_v50, %v7036_v4  ;;  %v4163_v20 = vpop.f32.mrb[59].mxu1 }
 0x491   : > { %v4194_v22 = vadd.f32 %v7040_v30, %v4161_v49  ;;  %v4164_v6 = vadd.f32 %v4163_v20, %v7038_v46 }
 0x492   : > { %v4197_v47 = vadd.f32 %v7040_v30, %v4172_v36  ;;  %v4212_v25 = vmax.f32 %v4196_v60, 0.0 }
 0x493   : > { %v4195_v9 = vadd.f32 %v7040_v30, %v4164_v6  ;;  %v4210_v63 = vmax.f32 %v4194_v22, 0.0 }
 0x494   : > { %v4213_v13 = vmax.f32 %v4197_v47, 0.0 }
 0x495   : > { %v4211_v2 = vmax.f32 %v4195_v9, 0.0 }
 0x496   : > { %v4829_v28 = vpack.c.bf16 %v4213_v13, %v4212_v25 }
 0x497   : > { %v4824_v24 = vpack.c.bf16 %v4211_v2, %v4210_v63 }
 0x498   : > { %4837 = vst [vmem:[%s7049_s16 + $0x38] sm:$0xff] %v4829_v28  }
 0x499   : > { %4836 = vst [vmem:[%s7049_s16 + $0x30] sm:$0xff] %v4824_v24  }
 0x49a   : > { %5947 = shalt.err (!%p5944_p4)
}
 0x49b   : > { %s5948_s17 = scalar_lea.hbm %s7080_s26, 1024  ;;  %s5952_s18 = scalar_lea.hbm %s7217_s3, 4096 }
 0x49c   : > { %p5949_p10 = scmp.ne.s32.totalorder %s7080_s26, %s5948_s17  ;;  %p5953_p12 = scmp.lt.u32.totalorder %s7080_s26, %s7217_s3 }
 0x49d   : > { %p5954_p2 = scmp.lt.u32.totalorder %s5952_s18, %s5948_s17  ;;  %p5956_p6 = scmp.lt.u32.totalorder %s5948_s17, %s7080_s26 }
 0x49e   : > { %p5950_p8 = pnand %p5949_p10, %p7218_p1 }
 0x49f   : > { %p5955_p7 = por %p5954_p2, %p5953_p12 }
 0x4a0   : > { %p5951_p5 = pneg %p5950_p8 }
 0x4a1   : > { %p5957_p11 = por %p5956_p6, %p5955_p7 }
 0x4a3   : > { %p5958_p9 = pnand %p5957_p11, %p5951_p5 }
 0x4a5   : > { %5961 = shalt.err (!%p5958_p9)
}
 0x4a6   : > { %s6087_s11 = smov 64   ;;  %s6088_s21 = smov 4  }
 0x4a7   : > { %5436 = dma.vmem_to_hbm [thread:$0]  (%p7218_p1), %s7075_s4, 1024, %s7080_s26, %s7086_s8, %s6087_s11, %s6087_s11, %s6088_s21  }
 0x4a8 PF: > { %s7219_s5 = sld [smem:[#allocation25_spill]]  ;;  %p5483_p13 = scmp.ge.s32.totalorder %s6072_s15, 2 }
 0x4a9   : > { %p7220_p0 = scmp.ne.s32.totalorder %s7193_s25, 0 }
 0x4ab   : > { %p5465_p3 = pnand %p5483_p13, %p7220_p0 }
 0x4ae   : > { %s4326_s30 = sand.u32 1, %s7219_s5  }
 0x4af   : > { %s4327_s0 = scalar_lea.sflag [#allocation6], %s4326_s30 }
 0x4b0   : > { %6027 = dma.done.wait (!%p5465_p3), %s4327_s0, 1024  }
 0x4b1   : > { %6029 = vsyncadd (!%p5465_p3), %s4327_s0, 4294966272  ;;  %s28_s15 = sadd.s32 1, %s6072_s15   ;;  %s7221_s22 = smov %s6398_s27 }
 0x4b2   : > { %p25_p4 = scmp.ge.s32.totalorder %s28_s15, 6   ;;  %s7222_s4 = smov %s7238_s12 }
 0x4b3   : > { %s7223_s27 = smov %s6036_s28  ;;  %s7224_s28 = smov %s6040_s29 }
 0x4b4   : > { %s7225_s29 = smov %s6401_s19  ;;  %s7226_s30 = smov %s6048_s9 }
 0x4b5   : > { %s7227_s9 = smov %s6052_s10  ;;  %s7228_s10 = smov %s7221_s22 }
 0x4b6   : > { %s7229_s11 = smov %s6064_s13  ;;  %s7230_s12 = smov %s6068_s14 }
 0x4b7   : > { %s7231_s13 = smov %s7234_s23  ;;  %s7232_s14 = smov %s7222_s4 }
 0x4b8   :  { %27 = sbr.rel (!%p25_p4) target bundleno = 21 (0x15), region = 133 }
 0x4bf   :  { %4332 = vsyncpa [#allocation5], 1 }
 0x4c0   :  { %4334 = vsyncpa [#allocation5 + $0x1], 1 }
 0x4c1   :  { %4335 = vsyncpa [#allocation8], 1 }
 0x4c2   :  { %4336 = vsyncpa [#allocation11], 1 }
 0x4c3   :  { %4337 = vsyncpa [#allocation14], 1 }
 0x4c4   :  { %4338 = vsyncpa [#allocation17], 1 }
 0x4c5   :  { %4339 = vsyncpa [#allocation6], 1 }
 0x4c6   :  { %4341 = vsyncpa [#allocation6 + $0x1], 1 }

</bundles_post_ra>
